<compile_context>
chip_gen: v6e
topology: v6e:2x2x1
jax: 0.10.0
libtpu: 0.0.40
codegen_flags: <defaults>
</compile_context>

<pallas_src>
import functools

import jax
import jax.numpy as jnp
from jax.experimental import pallas as pl
from jax.experimental.pallas import tpu as pltpu


def _round_up(x, m):
    return ((x + m - 1) // m) * m


# ----------------------------------------------------------------------------
# GRU recurrence kernel.
#   grid = (num_chunks,)  -- sequential ("arbitrary") time axis
#   scalar prefetch: batch_sizes (T_pad,) int32 in SMEM
#   inputs : gi (TT, Bp, 3Hp) bf16, W_hh^T (Hp, 3Hp) bf16, b_hh (1, 3Hp) f32
#   outputs: outputs (TT, Bp, Hp) f32 per chunk, final hidden (Bp, Hp) f32
#   scratch: h_scratch (Bp, Hp) f32 carried across grid steps
# ----------------------------------------------------------------------------
def _gru_kernel(batch_sizes_ref, gi_ref, whh_ref, bhh_ref,
                out_ref, hid_ref, h_scratch):
    c = pl.program_id(0)
    last_chunk = pl.num_programs(0) - 1
    TT, Bp, Hp3 = gi_ref.shape
    Hp = Hp3 // 3

    @pl.when(c == 0)
    def _init():
        h_scratch[...] = jnp.zeros_like(h_scratch)

    h = h_scratch[...]                               # (Bp, Hp) float32 carry
    whh = whh_ref[...]                               # (Hp, 3Hp) bf16 (loaded once)
    bhh = bhh_ref[...].astype(jnp.float32)           # (1, 3Hp)
    # Hoisted batch-row iota; compared against the per-step active-batch count
    # (lengths are sorted descending, as pack_padded_sequence requires).
    row = jax.lax.broadcasted_iota(jnp.int32, (Bp, Hp), 0)

    # Statically unrolled chunk of timesteps (all indexing is static).
    for s in range(TT):
        bs = batch_sizes_ref[c * TT + s]             # scalar read from SMEM
        gi = gi_ref[s].astype(jnp.float32)           # (Bp, 3Hp)

        # Recurrent projection on the MXU, f32 accumulation.
        gh = jnp.dot(h.astype(whh.dtype), whh,
                     preferred_element_type=jnp.float32) + bhh

        i_r, i_z, i_n = gi[:, :Hp], gi[:, Hp:2 * Hp], gi[:, 2 * Hp:]
        h_r, h_z, h_n = gh[:, :Hp], gh[:, Hp:2 * Hp], gh[:, 2 * Hp:]

        # Gate math in float32 (VPU/EUP f32 path; safe on v5e).
        r = jax.nn.sigmoid(i_r + h_r)
        z = jax.nn.sigmoid(i_z + h_z)
        n = jnp.tanh(i_n + r * h_n)
        h_new = (1.0 - z) * n + z * h

        valid = row < bs                              # (Bp, Hp) bool
        h = jnp.where(valid, h_new, h)                # packed-seq: freeze h
        out_ref[s] = jnp.where(valid, h_new, 0.0).astype(out_ref.dtype)

    h_scratch[...] = h

    @pl.when(c == last_chunk)                         # write hidden only once
    def _fin():
        hid_ref[...] = h.astype(hid_ref.dtype)


def _gru_pallas(gi, batch_sizes, w_hh_t, b_hh, time_chunk):
    """gi: (T_pad, Bp, 3Hp) bf16 precomputed input projections (time-major)."""
    T_pad, Bp, Hp3 = gi.shape
    Hp = Hp3 // 3
    num_chunks = T_pad // time_chunk

    grid_spec = pltpu.PrefetchScalarGridSpec(
        num_scalar_prefetch=1,                         # batch_sizes -> SMEM
        grid=(num_chunks,),
        in_specs=[
            pl.BlockSpec((time_chunk, Bp, Hp3), lambda c, bs: (c, 0, 0)),  # gi chunk
            pl.BlockSpec((Hp, Hp3), lambda c, bs: (0, 0)),                 # W_hh^T
            pl.BlockSpec((1, Hp3), lambda c, bs: (0, 0)),                  # b_hh
        ],
        out_specs=[
            pl.BlockSpec((time_chunk, Bp, Hp), lambda c, bs: (c, 0, 0)),   # outputs
            pl.BlockSpec((Bp, Hp), lambda c, bs: (0, 0)),                  # hidden
        ],
        scratch_shapes=[pltpu.VMEM((Bp, Hp), jnp.float32)],
    )

    outputs, hidden = pl.pallas_call(
        _gru_kernel,
        grid_spec=grid_spec,
        out_shape=[
            jax.ShapeDtypeStruct((T_pad, Bp, Hp), jnp.float32),
            jax.ShapeDtypeStruct((Bp, Hp), jnp.float32),
        ],
        compiler_params=pltpu.CompilerParams(
            dimension_semantics=("arbitrary",)),       # time is sequential
    )(batch_sizes, gi, w_hh_t, b_hh)
    return outputs, hidden


@functools.partial(jax.jit, static_argnames=("time_chunk",))
def _encoder_forward(embedding, w_ih_t, b_ih, w_hh_t, b_hh,
                     ids_t, batch_sizes, time_chunk):
    """Embedding gather (time-major) + hoisted input projection + GRU kernel."""
    emb = jnp.take(embedding, ids_t, axis=0)           # (T_pad, Bp, E) f32
    # One big MXU matmul for ALL timesteps (hoisted out of the recurrence).
    gi = jnp.einsum("tbe,eg->tbg",
                    emb.astype(jnp.bfloat16), w_ih_t,
                    preferred_element_type=jnp.float32) + b_ih
    gi = gi.astype(jnp.bfloat16)                        # halve DMA into the kernel
    return _gru_pallas(gi, batch_sizes, w_hh_t, b_hh, time_chunk)


# ----------------------------------------------------------------------------
# Encoder wrapper (embedding table + GRU parameters; PyTorch gate order r,z,n).
# ----------------------------------------------------------------------------
class EncoderPallas:
    def __init__(self, input_size, embedding_size, hidden_size, n_layers=1,
                 bidirec=False, seed=0):
        assert n_layers == 1 and not bidirec, \
            "This kernel implements the default n_layers=1, unidirectional case"
        self.input_size = input_size
        self.embedding_size = embedding_size
        self.hidden_size = hidden_size
        self.time_chunk = 16                      # timesteps per grid step
        H = hidden_size
        Hp = _round_up(H, 128)                    # lane-dense hidden dim
        self.Hp = Hp

        key = jax.random.PRNGKey(seed)
        k_emb, k_wih, k_whh, k_bih, k_bhh = jax.random.split(key, 5)
        s = 0.1
        self.embedding = jax.random.uniform(
            k_emb, (input_size, embedding_size), jnp.float32, -s, s)
        # Unpadded PyTorch-layout parameters (gate order r, z, n).
        w_ih = jax.random.uniform(k_wih, (3 * H, embedding_size), jnp.float32, -s, s)
        w_hh = jax.random.uniform(k_whh, (3 * H, H), jnp.float32, -s, s)
        b_ih = jax.random.uniform(k_bih, (3 * H,), jnp.float32, -s, s)
        b_hh = jax.random.uniform(k_bhh, (3 * H,), jnp.float32, -s, s)

        def pad_gate_axis(x, axis):
            # Split (…,3H,…) into r/z/n, zero-pad each gate H -> Hp, re-concat.
            parts = jnp.split(x, 3, axis=axis)
            pad = [(0, 0)] * x.ndim
            pad[axis] = (0, Hp - H)
            return jnp.concatenate([jnp.pad(p, pad) for p in parts], axis=axis)

        # Pre-transposed, gate-block-padded weights. Zero padding keeps the
        # padded hidden lanes exactly zero throughout the recurrence.
        self.w_ih_t_p = pad_gate_axis(w_ih.T, axis=1).astype(jnp.bfloat16)   # (E, 3Hp)
        w_hh_t = pad_gate_axis(w_hh.T, axis=1)                               # (H, 3Hp)
        self.w_hh_t_p = jnp.pad(w_hh_t, ((0, Hp - H), (0, 0))).astype(jnp.bfloat16)  # (Hp,3Hp)
        self.b_ih_p = pad_gate_axis(b_ih, axis=0)                            # (3Hp,) f32
        self.b_hh_p = pad_gate_axis(b_hh, axis=0).reshape(1, 3 * Hp)         # (1,3Hp) f32

    def __call__(self, inputs, input_lengths):
        """inputs: (B, T) int32 token ids; input_lengths: list/array sorted
        descending (as pack_padded_sequence requires)."""
        inputs = jnp.asarray(inputs, jnp.int32)
        B, T = inputs.shape
        lengths = [int(l) for l in input_lengths]
        assert all(lengths[i] >= lengths[i + 1] for i in range(len(lengths) - 1)), \
            "input_lengths must be sorted descending (pack_padded_sequence)"
        t_max = max(lengths)

        TT = self.time_chunk
        T_pad = _round_up(t_max, TT)              # only process t_max steps
        Bp = _round_up(max(B, 8), 8)              # sublane-dense batch

        # Token ids gathered directly into time-major layout (padded rows/steps
        # are masked out by batch_sizes below).
        ids_t = jnp.zeros((T_pad, Bp), jnp.int32).at[:t_max, :B].set(
            inputs[:, :t_max].T)

        # Per-step active-batch counts (PackedSequence.batch_sizes), zero-padded.
        batch_sizes = jnp.asarray(
            [sum(1 for L in lengths if L > t) for t in range(T_pad)], jnp.int32)

        out_tbh, hid = _encoder_forward(
            self.embedding, self.w_ih_t_p, self.b_ih_p,
            self.w_hh_t_p, self.b_hh_p, ids_t, batch_sizes, TT)

        H = self.hidden_size
        outputs = jnp.transpose(out_tbh[:t_max, :B, :H], (1, 0, 2))  # (B, t_max, H)
        hidden = hid[:B, :H][:, None, :]                             # (B, 1, H)
        return outputs, hidden


if __name__ == "__main__":
    # Small shapes: vocab=16, embedding=32, hidden=32, batch=2, seq=8.
    VOCAB, EMB, HID, B, T = 16, 32, 32, 2, 8

    enc = EncoderPallas(VOCAB, EMB, HID, n_layers=1, bidirec=False, seed=0)

    key = jax.random.PRNGKey(0)
    inputs = jax.random.randint(key, (B, T), 0, VOCAB, dtype=jnp.int32)
    input_lengths = [8, 5]   # sorted decreasing, as pack_padded_sequence requires

    outputs, hidden = enc(inputs, input_lengths)
    outputs = jax.block_until_ready(outputs)
    hidden = jax.block_until_ready(hidden)

    assert outputs.shape == (B, max(input_lengths), HID)
    assert hidden.shape == (B, 1, HID)
    # Padded positions of the shorter sequence must be exactly zero.
    assert float(jnp.abs(outputs[1, input_lengths[1]:, :]).max()) == 0.0
    # Final hidden of each sequence equals its last valid output step.
    assert bool(jnp.allclose(hidden[0, 0], outputs[0, input_lengths[0] - 1]))
    assert bool(jnp.allclose(hidden[1, 0], outputs[1, input_lengths[1] - 1]))

    print("KERNEL_OK")
</pallas_src>

<mosaic_0001>
module attributes {stable_mosaic.version = 11 : i64} {
  func.func @_gru_kernel(%arg0: i32, %arg1: memref<16xi32, #tpu.memory_space<smem>>, %arg2: memref<16x8x384xbf16, #tpu.memory_space<vmem>>, %arg3: memref<128x384xbf16, #tpu.memory_space<vmem>>, %arg4: memref<1x384xf32, #tpu.memory_space<vmem>>, %arg5: memref<16x8x128xf32, #tpu.memory_space<vmem>>, %arg6: memref<8x128xf32, #tpu.memory_space<vmem>>, %arg7: memref<8x128xf32, #tpu.memory_space<vmem>>) attributes {dimension_semantics = [#tpu.dimension_semantics<arbitrary>], iteration_bounds = array<i64: 1>, scalar_prefetch = 1 : i64, scratch_operands = 1 : i64, tpu.core_type = #tpu.core_type<tc>, window_params = [{transform_indices = @transform_0, window_bounds = array<i64: 16, 8, 384>}, {pipeline_mode = #tpu.pipeline_mode<synchronous>, transform_indices = @transform_1, window_bounds = array<i64: 128, 384>}, {pipeline_mode = #tpu.pipeline_mode<synchronous>, transform_indices = @transform_2, window_bounds = array<i64: 1, 384>}, {transform_indices = @transform_3, window_bounds = array<i64: 16, 8, 128>}, {pipeline_mode = #tpu.pipeline_mode<synchronous>, transform_indices = @transform_4, window_bounds = array<i64: 8, 128>}]} {
    %c0_i32 = arith.constant 0 : i32
    %0 = arith.cmpi eq, %arg0, %c0_i32 : i32
    %1 = arith.extui %0 : i1 to i32
    %c0_i32_0 = arith.constant 0 : i32
    %2 = arith.cmpi ne, %1, %c0_i32_0 : i32
    scf.if %2 {
      %cst_186 = arith.constant 0.000000e+00 : f32
      %731 = vector.broadcast %cst_186 : f32 to vector<8x128xf32>
      %c0_187 = arith.constant 0 : index
      %c0_188 = arith.constant 0 : index
      %732 = vector.load %arg7[%c0_187, %c0_188] : memref<8x128xf32, #tpu.memory_space<vmem>>, vector<8x128xf32>
      tpu.vector_store %arg7[%c0_187, %c0_188], %731 {strides = array<i32>} : memref<8x128xf32, #tpu.memory_space<vmem>>, vector<8x128xf32>,
    } else {
    }
    %c0 = arith.constant 0 : index
    %c0_1 = arith.constant 0 : index
    %3 = vector.load %arg7[%c0, %c0_1] : memref<8x128xf32, #tpu.memory_space<vmem>>, vector<8x128xf32>
    %c0_2 = arith.constant 0 : index
    %c0_3 = arith.constant 0 : index
    %4 = vector.load %arg3[%c0_2, %c0_3] : memref<128x384xbf16, #tpu.memory_space<vmem>>, vector<128x384xbf16>
    %c0_4 = arith.constant 0 : index
    %c0_5 = arith.constant 0 : index
    %5 = vector.load %arg4[%c0_4, %c0_5] : memref<1x384xf32, #tpu.memory_space<vmem>>, vector<1x384xf32>
    %6 = tpu.iota {dimensions = array<i32: 0>} : vector<8x128xi32>
    %c16_i32 = arith.constant 16 : i32
    %7 = arith.muli %arg0, %c16_i32 : i32
    %c0_i32_6 = arith.constant 0 : i32
    %8 = arith.addi %7, %c0_i32_6 : i32
    %9 = arith.index_cast %8 : i32 to index
    %10 = memref.load %arg1[%9] : memref<16xi32, #tpu.memory_space<smem>>
    %c0_7 = arith.constant 0 : index
    %c0_8 = arith.constant 0 : index
    %c0_9 = arith.constant 0 : index
    %11 = vector.load %arg2[%c0_7, %c0_8, %c0_9] : memref<16x8x384xbf16, #tpu.memory_space<vmem>>, vector<1x8x384xbf16>
    %12 = vector.shape_cast %11 : vector<1x8x384xbf16> to vector<8x384xbf16>
    %13 = arith.extf %12 : vector<8x384xbf16> to vector<8x384xf32>
    %14 = arith.truncf %3 : vector<8x128xf32> to vector<8x128xbf16>
    %cst = arith.constant dense<0.000000e+00> : vector<8x384xf32>
    %15 = tpu.matmul %14, %4, %cst {dimension_numbers = #tpu.dot_dimension_numbers<[1], [0], [0], [1], [0, 0, 1, 1], [], []>} : vector<8x128xbf16>, vector<128x384xbf16>, vector<8x384xf32> -> vector<8x384xf32>
    %16 = vector.broadcast %5 : vector<1x384xf32> to vector<8x384xf32>
    %17 = arith.addf %15, %16 : vector<8x384xf32>
    %18 = vector.extract_strided_slice %13 {offsets = [0, 0], sizes = [8, 128], strides = [1, 1]} : vector<8x384xf32> to vector<8x128xf32>
    %19 = vector.extract_strided_slice %13 {offsets = [0, 128], sizes = [8, 128], strides = [1, 1]} : vector<8x384xf32> to vector<8x128xf32>
    %20 = vector.extract_strided_slice %13 {offsets = [0, 256], sizes = [8, 128], strides = [1, 1]} : vector<8x384xf32> to vector<8x128xf32>
    %21 = vector.extract_strided_slice %17 {offsets = [0, 0], sizes = [8, 128], strides = [1, 1]} : vector<8x384xf32> to vector<8x128xf32>
    %22 = vector.extract_strided_slice %17 {offsets = [0, 128], sizes = [8, 128], strides = [1, 1]} : vector<8x384xf32> to vector<8x128xf32>
    %23 = vector.extract_strided_slice %17 {offsets = [0, 256], sizes = [8, 128], strides = [1, 1]} : vector<8x384xf32> to vector<8x128xf32>
    %24 = arith.addf %18, %21 : vector<8x128xf32>
    %25 = arith.negf %24 : vector<8x128xf32>
    %26 = math.exp %25 : vector<8x128xf32>
    %cst_10 = arith.constant 1.000000e+00 : f32
    %27 = vector.broadcast %cst_10 : f32 to vector<8x128xf32>
    %28 = arith.addf %27, %26 : vector<8x128xf32>
    %29 = arith.divf %27, %28 : vector<8x128xf32>
    %30 = arith.addf %19, %22 : vector<8x128xf32>
    %31 = arith.negf %30 : vector<8x128xf32>
    %32 = math.exp %31 : vector<8x128xf32>
    %cst_11 = arith.constant 1.000000e+00 : f32
    %33 = vector.broadcast %cst_11 : f32 to vector<8x128xf32>
    %34 = arith.addf %33, %32 : vector<8x128xf32>
    %35 = arith.divf %33, %34 : vector<8x128xf32>
    %36 = arith.mulf %29, %23 : vector<8x128xf32>
    %37 = arith.addf %20, %36 : vector<8x128xf32>
    %38 = math.tanh %37 : vector<8x128xf32>
    %cst_12 = arith.constant 1.000000e+00 : f32
    %39 = vector.broadcast %cst_12 : f32 to vector<8x128xf32>
    %40 = arith.subf %39, %35 : vector<8x128xf32>
    %41 = arith.mulf %40, %38 : vector<8x128xf32>
    %42 = arith.mulf %35, %3 : vector<8x128xf32>
    %43 = arith.addf %41, %42 : vector<8x128xf32>
    %44 = vector.broadcast %10 : i32 to vector<8x128xi32>
    %45 = arith.cmpi slt, %6, %44 : vector<8x128xi32>
    %46 = arith.select %45, %43, %3 : vector<8x128xi1>, vector<8x128xf32>
    %cst_13 = arith.constant 0.000000e+00 : f32
    %47 = vector.broadcast %cst_13 : f32 to vector<8x128xf32>
    %48 = arith.select %45, %43, %47 : vector<8x128xi1>, vector<8x128xf32>
    %c0_14 = arith.constant 0 : index
    %c0_15 = arith.constant 0 : index
    %c0_16 = arith.constant 0 : index
    %49 = vector.load %arg5[%c0_14, %c0_15, %c0_16] : memref<16x8x128xf32, #tpu.memory_space<vmem>>, vector<1x8x128xf32>
    %50 = vector.shape_cast %49 : vector<1x8x128xf32> to vector<8x128xf32>
    %51 = vector.shape_cast %48 : vector<8x128xf32> to vector<1x8x128xf32>
    tpu.vector_store %arg5[%c0_14, %c0_15, %c0_16], %51 {strides = array<i32>} : memref<16x8x128xf32, #tpu.memory_space<vmem>>, vector<1x8x128xf32>,
    %c16_i32_17 = arith.constant 16 : i32
    %52 = arith.muli %arg0, %c16_i32_17 : i32
    %c1_i32 = arith.constant 1 : i32
    %53 = arith.addi %52, %c1_i32 : i32
    %54 = arith.index_cast %53 : i32 to index
    %55 = memref.load %arg1[%54] : memref<16xi32, #tpu.memory_space<smem>>
    %c1 = arith.constant 1 : index
    %c0_18 = arith.constant 0 : index
    %c0_19 = arith.constant 0 : index
    %56 = vector.load %arg2[%c1, %c0_18, %c0_19] : memref<16x8x384xbf16, #tpu.memory_space<vmem>>, vector<1x8x384xbf16>
    %57 = vector.shape_cast %56 : vector<1x8x384xbf16> to vector<8x384xbf16>
    %58 = arith.extf %57 : vector<8x384xbf16> to vector<8x384xf32>
    %59 = arith.truncf %46 : vector<8x128xf32> to vector<8x128xbf16>
    %cst_20 = arith.constant dense<0.000000e+00> : vector<8x384xf32>
    %60 = tpu.matmul %59, %4, %cst_20 {dimension_numbers = #tpu.dot_dimension_numbers<[1], [0], [0], [1], [0, 0, 1, 1], [], []>} : vector<8x128xbf16>, vector<128x384xbf16>, vector<8x384xf32> -> vector<8x384xf32>
    %61 = vector.broadcast %5 : vector<1x384xf32> to vector<8x384xf32>
    %62 = arith.addf %60, %61 : vector<8x384xf32>
    %63 = vector.extract_strided_slice %58 {offsets = [0, 0], sizes = [8, 128], strides = [1, 1]} : vector<8x384xf32> to vector<8x128xf32>
    %64 = vector.extract_strided_slice %58 {offsets = [0, 128], sizes = [8, 128], strides = [1, 1]} : vector<8x384xf32> to vector<8x128xf32>
    %65 = vector.extract_strided_slice %58 {offsets = [0, 256], sizes = [8, 128], strides = [1, 1]} : vector<8x384xf32> to vector<8x128xf32>
    %66 = vector.extract_strided_slice %62 {offsets = [0, 0], sizes = [8, 128], strides = [1, 1]} : vector<8x384xf32> to vector<8x128xf32>
    %67 = vector.extract_strided_slice %62 {offsets = [0, 128], sizes = [8, 128], strides = [1, 1]} : vector<8x384xf32> to vector<8x128xf32>
    %68 = vector.extract_strided_slice %62 {offsets = [0, 256], sizes = [8, 128], strides = [1, 1]} : vector<8x384xf32> to vector<8x128xf32>
    %69 = arith.addf %63, %66 : vector<8x128xf32>
    %70 = arith.negf %69 : vector<8x128xf32>
    %71 = math.exp %70 : vector<8x128xf32>
    %cst_21 = arith.constant 1.000000e+00 : f32
    %72 = vector.broadcast %cst_21 : f32 to vector<8x128xf32>
    %73 = arith.addf %72, %71 : vector<8x128xf32>
    %74 = arith.divf %72, %73 : vector<8x128xf32>
    %75 = arith.addf %64, %67 : vector<8x128xf32>
    %76 = arith.negf %75 : vector<8x128xf32>
    %77 = math.exp %76 : vector<8x128xf32>
    %cst_22 = arith.constant 1.000000e+00 : f32
    %78 = vector.broadcast %cst_22 : f32 to vector<8x128xf32>
    %79 = arith.addf %78, %77 : vector<8x128xf32>
    %80 = arith.divf %78, %79 : vector<8x128xf32>
    %81 = arith.mulf %74, %68 : vector<8x128xf32>
    %82 = arith.addf %65, %81 : vector<8x128xf32>
    %83 = math.tanh %82 : vector<8x128xf32>
    %cst_23 = arith.constant 1.000000e+00 : f32
    %84 = vector.broadcast %cst_23 : f32 to vector<8x128xf32>
    %85 = arith.subf %84, %80 : vector<8x128xf32>
    %86 = arith.mulf %85, %83 : vector<8x128xf32>
    %87 = arith.mulf %80, %46 : vector<8x128xf32>
    %88 = arith.addf %86, %87 : vector<8x128xf32>
    %89 = vector.broadcast %55 : i32 to vector<8x128xi32>
    %90 = arith.cmpi slt, %6, %89 : vector<8x128xi32>
    %91 = arith.select %90, %88, %46 : vector<8x128xi1>, vector<8x128xf32>
    %cst_24 = arith.constant 0.000000e+00 : f32
    %92 = vector.broadcast %cst_24 : f32 to vector<8x128xf32>
    %93 = arith.select %90, %88, %92 : vector<8x128xi1>, vector<8x128xf32>
    %c1_25 = arith.constant 1 : index
    %c0_26 = arith.constant 0 : index
    %c0_27 = arith.constant 0 : index
    %94 = vector.load %arg5[%c1_25, %c0_26, %c0_27] : memref<16x8x128xf32, #tpu.memory_space<vmem>>, vector<1x8x128xf32>
    %95 = vector.shape_cast %94 : vector<1x8x128xf32> to vector<8x128xf32>
    %96 = vector.shape_cast %93 : vector<8x128xf32> to vector<1x8x128xf32>
    tpu.vector_store %arg5[%c1_25, %c0_26, %c0_27], %96 {strides = array<i32>} : memref<16x8x128xf32, #tpu.memory_space<vmem>>, vector<1x8x128xf32>,
    %c16_i32_28 = arith.constant 16 : i32
    %97 = arith.muli %arg0, %c16_i32_28 : i32
    %c2_i32 = arith.constant 2 : i32
    %98 = arith.addi %97, %c2_i32 : i32
    %99 = arith.index_cast %98 : i32 to index
    %100 = memref.load %arg1[%99] : memref<16xi32, #tpu.memory_space<smem>>
    %c2 = arith.constant 2 : index
    %c0_29 = arith.constant 0 : index
    %c0_30 = arith.constant 0 : index
    %101 = vector.load %arg2[%c2, %c0_29, %c0_30] : memref<16x8x384xbf16, #tpu.memory_space<vmem>>, vector<1x8x384xbf16>
    %102 = vector.shape_cast %101 : vector<1x8x384xbf16> to vector<8x384xbf16>
    %103 = arith.extf %102 : vector<8x384xbf16> to vector<8x384xf32>
    %104 = arith.truncf %91 : vector<8x128xf32> to vector<8x128xbf16>
    %cst_31 = arith.constant dense<0.000000e+00> : vector<8x384xf32>
    %105 = tpu.matmul %104, %4, %cst_31 {dimension_numbers = #tpu.dot_dimension_numbers<[1], [0], [0], [1], [0, 0, 1, 1], [], []>} : vector<8x128xbf16>, vector<128x384xbf16>, vector<8x384xf32> -> vector<8x384xf32>
    %106 = vector.broadcast %5 : vector<1x384xf32> to vector<8x384xf32>
    %107 = arith.addf %105, %106 : vector<8x384xf32>
    %108 = vector.extract_strided_slice %103 {offsets = [0, 0], sizes = [8, 128], strides = [1, 1]} : vector<8x384xf32> to vector<8x128xf32>
    %109 = vector.extract_strided_slice %103 {offsets = [0, 128], sizes = [8, 128], strides = [1, 1]} : vector<8x384xf32> to vector<8x128xf32>
    %110 = vector.extract_strided_slice %103 {offsets = [0, 256], sizes = [8, 128], strides = [1, 1]} : vector<8x384xf32> to vector<8x128xf32>
    %111 = vector.extract_strided_slice %107 {offsets = [0, 0], sizes = [8, 128], strides = [1, 1]} : vector<8x384xf32> to vector<8x128xf32>
    %112 = vector.extract_strided_slice %107 {offsets = [0, 128], sizes = [8, 128], strides = [1, 1]} : vector<8x384xf32> to vector<8x128xf32>
    %113 = vector.extract_strided_slice %107 {offsets = [0, 256], sizes = [8, 128], strides = [1, 1]} : vector<8x384xf32> to vector<8x128xf32>
    %114 = arith.addf %108, %111 : vector<8x128xf32>
    %115 = arith.negf %114 : vector<8x128xf32>
    %116 = math.exp %115 : vector<8x128xf32>
    %cst_32 = arith.constant 1.000000e+00 : f32
    %117 = vector.broadcast %cst_32 : f32 to vector<8x128xf32>
    %118 = arith.addf %117, %116 : vector<8x128xf32>
    %119 = arith.divf %117, %118 : vector<8x128xf32>
    %120 = arith.addf %109, %112 : vector<8x128xf32>
    %121 = arith.negf %120 : vector<8x128xf32>
    %122 = math.exp %121 : vector<8x128xf32>
    %cst_33 = arith.constant 1.000000e+00 : f32
    %123 = vector.broadcast %cst_33 : f32 to vector<8x128xf32>
    %124 = arith.addf %123, %122 : vector<8x128xf32>
    %125 = arith.divf %123, %124 : vector<8x128xf32>
    %126 = arith.mulf %119, %113 : vector<8x128xf32>
    %127 = arith.addf %110, %126 : vector<8x128xf32>
    %128 = math.tanh %127 : vector<8x128xf32>
    %cst_34 = arith.constant 1.000000e+00 : f32
    %129 = vector.broadcast %cst_34 : f32 to vector<8x128xf32>
    %130 = arith.subf %129, %125 : vector<8x128xf32>
    %131 = arith.mulf %130, %128 : vector<8x128xf32>
    %132 = arith.mulf %125, %91 : vector<8x128xf32>
    %133 = arith.addf %131, %132 : vector<8x128xf32>
    %134 = vector.broadcast %100 : i32 to vector<8x128xi32>
    %135 = arith.cmpi slt, %6, %134 : vector<8x128xi32>
    %136 = arith.select %135, %133, %91 : vector<8x128xi1>, vector<8x128xf32>
    %cst_35 = arith.constant 0.000000e+00 : f32
    %137 = vector.broadcast %cst_35 : f32 to vector<8x128xf32>
    %138 = arith.select %135, %133, %137 : vector<8x128xi1>, vector<8x128xf32>
    %c2_36 = arith.constant 2 : index
    %c0_37 = arith.constant 0 : index
    %c0_38 = arith.constant 0 : index
    %139 = vector.load %arg5[%c2_36, %c0_37, %c0_38] : memref<16x8x128xf32, #tpu.memory_space<vmem>>, vector<1x8x128xf32>
    %140 = vector.shape_cast %139 : vector<1x8x128xf32> to vector<8x128xf32>
    %141 = vector.shape_cast %138 : vector<8x128xf32> to vector<1x8x128xf32>
    tpu.vector_store %arg5[%c2_36, %c0_37, %c0_38], %141 {strides = array<i32>} : memref<16x8x128xf32, #tpu.memory_space<vmem>>, vector<1x8x128xf32>,
    %c16_i32_39 = arith.constant 16 : i32
    %142 = arith.muli %arg0, %c16_i32_39 : i32
    %c3_i32 = arith.constant 3 : i32
    %143 = arith.addi %142, %c3_i32 : i32
    %144 = arith.index_cast %143 : i32 to index
    %145 = memref.load %arg1[%144] : memref<16xi32, #tpu.memory_space<smem>>
    %c3 = arith.constant 3 : index
    %c0_40 = arith.constant 0 : index
    %c0_41 = arith.constant 0 : index
    %146 = vector.load %arg2[%c3, %c0_40, %c0_41] : memref<16x8x384xbf16, #tpu.memory_space<vmem>>, vector<1x8x384xbf16>
    %147 = vector.shape_cast %146 : vector<1x8x384xbf16> to vector<8x384xbf16>
    %148 = arith.extf %147 : vector<8x384xbf16> to vector<8x384xf32>
    %149 = arith.truncf %136 : vector<8x128xf32> to vector<8x128xbf16>
    %cst_42 = arith.constant dense<0.000000e+00> : vector<8x384xf32>
    %150 = tpu.matmul %149, %4, %cst_42 {dimension_numbers = #tpu.dot_dimension_numbers<[1], [0], [0], [1], [0, 0, 1, 1], [], []>} : vector<8x128xbf16>, vector<128x384xbf16>, vector<8x384xf32> -> vector<8x384xf32>
    %151 = vector.broadcast %5 : vector<1x384xf32> to vector<8x384xf32>
    %152 = arith.addf %150, %151 : vector<8x384xf32>
    %153 = vector.extract_strided_slice %148 {offsets = [0, 0], sizes = [8, 128], strides = [1, 1]} : vector<8x384xf32> to vector<8x128xf32>
    %154 = vector.extract_strided_slice %148 {offsets = [0, 128], sizes = [8, 128], strides = [1, 1]} : vector<8x384xf32> to vector<8x128xf32>
    %155 = vector.extract_strided_slice %148 {offsets = [0, 256], sizes = [8, 128], strides = [1, 1]} : vector<8x384xf32> to vector<8x128xf32>
    %156 = vector.extract_strided_slice %152 {offsets = [0, 0], sizes = [8, 128], strides = [1, 1]} : vector<8x384xf32> to vector<8x128xf32>
    %157 = vector.extract_strided_slice %152 {offsets = [0, 128], sizes = [8, 128], strides = [1, 1]} : vector<8x384xf32> to vector<8x128xf32>
    %158 = vector.extract_strided_slice %152 {offsets = [0, 256], sizes = [8, 128], strides = [1, 1]} : vector<8x384xf32> to vector<8x128xf32>
    %159 = arith.addf %153, %156 : vector<8x128xf32>
    %160 = arith.negf %159 : vector<8x128xf32>
    %161 = math.exp %160 : vector<8x128xf32>
    %cst_43 = arith.constant 1.000000e+00 : f32
    %162 = vector.broadcast %cst_43 : f32 to vector<8x128xf32>
    %163 = arith.addf %162, %161 : vector<8x128xf32>
    %164 = arith.divf %162, %163 : vector<8x128xf32>
    %165 = arith.addf %154, %157 : vector<8x128xf32>
    %166 = arith.negf %165 : vector<8x128xf32>
    %167 = math.exp %166 : vector<8x128xf32>
    %cst_44 = arith.constant 1.000000e+00 : f32
    %168 = vector.broadcast %cst_44 : f32 to vector<8x128xf32>
    %169 = arith.addf %168, %167 : vector<8x128xf32>
    %170 = arith.divf %168, %169 : vector<8x128xf32>
    %171 = arith.mulf %164, %158 : vector<8x128xf32>
    %172 = arith.addf %155, %171 : vector<8x128xf32>
    %173 = math.tanh %172 : vector<8x128xf32>
    %cst_45 = arith.constant 1.000000e+00 : f32
    %174 = vector.broadcast %cst_45 : f32 to vector<8x128xf32>
    %175 = arith.subf %174, %170 : vector<8x128xf32>
    %176 = arith.mulf %175, %173 : vector<8x128xf32>
    %177 = arith.mulf %170, %136 : vector<8x128xf32>
    %178 = arith.addf %176, %177 : vector<8x128xf32>
    %179 = vector.broadcast %145 : i32 to vector<8x128xi32>
    %180 = arith.cmpi slt, %6, %179 : vector<8x128xi32>
    %181 = arith.select %180, %178, %136 : vector<8x128xi1>, vector<8x128xf32>
    %cst_46 = arith.constant 0.000000e+00 : f32
    %182 = vector.broadcast %cst_46 : f32 to vector<8x128xf32>
    %183 = arith.select %180, %178, %182 : vector<8x128xi1>, vector<8x128xf32>
    %c3_47 = arith.constant 3 : index
    %c0_48 = arith.constant 0 : index
    %c0_49 = arith.constant 0 : index
    %184 = vector.load %arg5[%c3_47, %c0_48, %c0_49] : memref<16x8x128xf32, #tpu.memory_space<vmem>>, vector<1x8x128xf32>
    %185 = vector.shape_cast %184 : vector<1x8x128xf32> to vector<8x128xf32>
    %186 = vector.shape_cast %183 : vector<8x128xf32> to vector<1x8x128xf32>
    tpu.vector_store %arg5[%c3_47, %c0_48, %c0_49], %186 {strides = array<i32>} : memref<16x8x128xf32, #tpu.memory_space<vmem>>, vector<1x8x128xf32>,
    %c16_i32_50 = arith.constant 16 : i32
    %187 = arith.muli %arg0, %c16_i32_50 : i32
    %c4_i32 = arith.constant 4 : i32
    %188 = arith.addi %187, %c4_i32 : i32
    %189 = arith.index_cast %188 : i32 to index
    %190 = memref.load %arg1[%189] : memref<16xi32, #tpu.memory_space<smem>>
    %c4 = arith.constant 4 : index
    %c0_51 = arith.constant 0 : index
    %c0_52 = arith.constant 0 : index
    %191 = vector.load %arg2[%c4, %c0_51, %c0_52] : memref<16x8x384xbf16, #tpu.memory_space<vmem>>, vector<1x8x384xbf16>
    %192 = vector.shape_cast %191 : vector<1x8x384xbf16> to vector<8x384xbf16>
    %193 = arith.extf %192 : vector<8x384xbf16> to vector<8x384xf32>
    %194 = arith.truncf %181 : vector<8x128xf32> to vector<8x128xbf16>
    %cst_53 = arith.constant dense<0.000000e+00> : vector<8x384xf32>
    %195 = tpu.matmul %194, %4, %cst_53 {dimension_numbers = #tpu.dot_dimension_numbers<[1], [0], [0], [1], [0, 0, 1, 1], [], []>} : vector<8x128xbf16>, vector<128x384xbf16>, vector<8x384xf32> -> vector<8x384xf32>
    %196 = vector.broadcast %5 : vector<1x384xf32> to vector<8x384xf32>
    %197 = arith.addf %195, %196 : vector<8x384xf32>
    %198 = vector.extract_strided_slice %193 {offsets = [0, 0], sizes = [8, 128], strides = [1, 1]} : vector<8x384xf32> to vector<8x128xf32>
    %199 = vector.extract_strided_slice %193 {offsets = [0, 128], sizes = [8, 128], strides = [1, 1]} : vector<8x384xf32> to vector<8x128xf32>
    %200 = vector.extract_strided_slice %193 {offsets = [0, 256], sizes = [8, 128], strides = [1, 1]} : vector<8x384xf32> to vector<8x128xf32>
    %201 = vector.extract_strided_slice %197 {offsets = [0, 0], sizes = [8, 128], strides = [1, 1]} : vector<8x384xf32> to vector<8x128xf32>
    %202 = vector.extract_strided_slice %197 {offsets = [0, 128], sizes = [8, 128], strides = [1, 1]} : vector<8x384xf32> to vector<8x128xf32>
    %203 = vector.extract_strided_slice %197 {offsets = [0, 256], sizes = [8, 128], strides = [1, 1]} : vector<8x384xf32> to vector<8x128xf32>
    %204 = arith.addf %198, %201 : vector<8x128xf32>
    %205 = arith.negf %204 : vector<8x128xf32>
    %206 = math.exp %205 : vector<8x128xf32>
    %cst_54 = arith.constant 1.000000e+00 : f32
    %207 = vector.broadcast %cst_54 : f32 to vector<8x128xf32>
    %208 = arith.addf %207, %206 : vector<8x128xf32>
    %209 = arith.divf %207, %208 : vector<8x128xf32>
    %210 = arith.addf %199, %202 : vector<8x128xf32>
    %211 = arith.negf %210 : vector<8x128xf32>
    %212 = math.exp %211 : vector<8x128xf32>
    %cst_55 = arith.constant 1.000000e+00 : f32
    %213 = vector.broadcast %cst_55 : f32 to vector<8x128xf32>
    %214 = arith.addf %213, %212 : vector<8x128xf32>
    %215 = arith.divf %213, %214 : vector<8x128xf32>
    %216 = arith.mulf %209, %203 : vector<8x128xf32>
    %217 = arith.addf %200, %216 : vector<8x128xf32>
    %218 = math.tanh %217 : vector<8x128xf32>
    %cst_56 = arith.constant 1.000000e+00 : f32
    %219 = vector.broadcast %cst_56 : f32 to vector<8x128xf32>
    %220 = arith.subf %219, %215 : vector<8x128xf32>
    %221 = arith.mulf %220, %218 : vector<8x128xf32>
    %222 = arith.mulf %215, %181 : vector<8x128xf32>
    %223 = arith.addf %221, %222 : vector<8x128xf32>
    %224 = vector.broadcast %190 : i32 to vector<8x128xi32>
    %225 = arith.cmpi slt, %6, %224 : vector<8x128xi32>
    %226 = arith.select %225, %223, %181 : vector<8x128xi1>, vector<8x128xf32>
    %cst_57 = arith.constant 0.000000e+00 : f32
    %227 = vector.broadcast %cst_57 : f32 to vector<8x128xf32>
    %228 = arith.select %225, %223, %227 : vector<8x128xi1>, vector<8x128xf32>
    %c4_58 = arith.constant 4 : index
    %c0_59 = arith.constant 0 : index
    %c0_60 = arith.constant 0 : index
    %229 = vector.load %arg5[%c4_58, %c0_59, %c0_60] : memref<16x8x128xf32, #tpu.memory_space<vmem>>, vector<1x8x128xf32>
    %230 = vector.shape_cast %229 : vector<1x8x128xf32> to vector<8x128xf32>
    %231 = vector.shape_cast %228 : vector<8x128xf32> to vector<1x8x128xf32>
    tpu.vector_store %arg5[%c4_58, %c0_59, %c0_60], %231 {strides = array<i32>} : memref<16x8x128xf32, #tpu.memory_space<vmem>>, vector<1x8x128xf32>,
    %c16_i32_61 = arith.constant 16 : i32
    %232 = arith.muli %arg0, %c16_i32_61 : i32
    %c5_i32 = arith.constant 5 : i32
    %233 = arith.addi %232, %c5_i32 : i32
    %234 = arith.index_cast %233 : i32 to index
    %235 = memref.load %arg1[%234] : memref<16xi32, #tpu.memory_space<smem>>
    %c5 = arith.constant 5 : index
    %c0_62 = arith.constant 0 : index
    %c0_63 = arith.constant 0 : index
    %236 = vector.load %arg2[%c5, %c0_62, %c0_63] : memref<16x8x384xbf16, #tpu.memory_space<vmem>>, vector<1x8x384xbf16>
    %237 = vector.shape_cast %236 : vector<1x8x384xbf16> to vector<8x384xbf16>
    %238 = arith.extf %237 : vector<8x384xbf16> to vector<8x384xf32>
    %239 = arith.truncf %226 : vector<8x128xf32> to vector<8x128xbf16>
    %cst_64 = arith.constant dense<0.000000e+00> : vector<8x384xf32>
    %240 = tpu.matmul %239, %4, %cst_64 {dimension_numbers = #tpu.dot_dimension_numbers<[1], [0], [0], [1], [0, 0, 1, 1], [], []>} : vector<8x128xbf16>, vector<128x384xbf16>, vector<8x384xf32> -> vector<8x384xf32>
    %241 = vector.broadcast %5 : vector<1x384xf32> to vector<8x384xf32>
    %242 = arith.addf %240, %241 : vector<8x384xf32>
    %243 = vector.extract_strided_slice %238 {offsets = [0, 0], sizes = [8, 128], strides = [1, 1]} : vector<8x384xf32> to vector<8x128xf32>
    %244 = vector.extract_strided_slice %238 {offsets = [0, 128], sizes = [8, 128], strides = [1, 1]} : vector<8x384xf32> to vector<8x128xf32>
    %245 = vector.extract_strided_slice %238 {offsets = [0, 256], sizes = [8, 128], strides = [1, 1]} : vector<8x384xf32> to vector<8x128xf32>
    %246 = vector.extract_strided_slice %242 {offsets = [0, 0], sizes = [8, 128], strides = [1, 1]} : vector<8x384xf32> to vector<8x128xf32>
    %247 = vector.extract_strided_slice %242 {offsets = [0, 128], sizes = [8, 128], strides = [1, 1]} : vector<8x384xf32> to vector<8x128xf32>
    %248 = vector.extract_strided_slice %242 {offsets = [0, 256], sizes = [8, 128], strides = [1, 1]} : vector<8x384xf32> to vector<8x128xf32>
    %249 = arith.addf %243, %246 : vector<8x128xf32>
    %250 = arith.negf %249 : vector<8x128xf32>
    %251 = math.exp %250 : vector<8x128xf32>
    %cst_65 = arith.constant 1.000000e+00 : f32
    %252 = vector.broadcast %cst_65 : f32 to vector<8x128xf32>
    %253 = arith.addf %252, %251 : vector<8x128xf32>
    %254 = arith.divf %252, %253 : vector<8x128xf32>
    %255 = arith.addf %244, %247 : vector<8x128xf32>
    %256 = arith.negf %255 : vector<8x128xf32>
    %257 = math.exp %256 : vector<8x128xf32>
    %cst_66 = arith.constant 1.000000e+00 : f32
    %258 = vector.broadcast %cst_66 : f32 to vector<8x128xf32>
    %259 = arith.addf %258, %257 : vector<8x128xf32>
    %260 = arith.divf %258, %259 : vector<8x128xf32>
    %261 = arith.mulf %254, %248 : vector<8x128xf32>
    %262 = arith.addf %245, %261 : vector<8x128xf32>
    %263 = math.tanh %262 : vector<8x128xf32>
    %cst_67 = arith.constant 1.000000e+00 : f32
    %264 = vector.broadcast %cst_67 : f32 to vector<8x128xf32>
    %265 = arith.subf %264, %260 : vector<8x128xf32>
    %266 = arith.mulf %265, %263 : vector<8x128xf32>
    %267 = arith.mulf %260, %226 : vector<8x128xf32>
    %268 = arith.addf %266, %267 : vector<8x128xf32>
    %269 = vector.broadcast %235 : i32 to vector<8x128xi32>
    %270 = arith.cmpi slt, %6, %269 : vector<8x128xi32>
    %271 = arith.select %270, %268, %226 : vector<8x128xi1>, vector<8x128xf32>
    %cst_68 = arith.constant 0.000000e+00 : f32
    %272 = vector.broadcast %cst_68 : f32 to vector<8x128xf32>
    %273 = arith.select %270, %268, %272 : vector<8x128xi1>, vector<8x128xf32>
    %c5_69 = arith.constant 5 : index
    %c0_70 = arith.constant 0 : index
    %c0_71 = arith.constant 0 : index
    %274 = vector.load %arg5[%c5_69, %c0_70, %c0_71] : memref<16x8x128xf32, #tpu.memory_space<vmem>>, vector<1x8x128xf32>
    %275 = vector.shape_cast %274 : vector<1x8x128xf32> to vector<8x128xf32>
    %276 = vector.shape_cast %273 : vector<8x128xf32> to vector<1x8x128xf32>
    tpu.vector_store %arg5[%c5_69, %c0_70, %c0_71], %276 {strides = array<i32>} : memref<16x8x128xf32, #tpu.memory_space<vmem>>, vector<1x8x128xf32>,
    %c16_i32_72 = arith.constant 16 : i32
    %277 = arith.muli %arg0, %c16_i32_72 : i32
    %c6_i32 = arith.constant 6 : i32
    %278 = arith.addi %277, %c6_i32 : i32
    %279 = arith.index_cast %278 : i32 to index
    %280 = memref.load %arg1[%279] : memref<16xi32, #tpu.memory_space<smem>>
    %c6 = arith.constant 6 : index
    %c0_73 = arith.constant 0 : index
    %c0_74 = arith.constant 0 : index
    %281 = vector.load %arg2[%c6, %c0_73, %c0_74] : memref<16x8x384xbf16, #tpu.memory_space<vmem>>, vector<1x8x384xbf16>
    %282 = vector.shape_cast %281 : vector<1x8x384xbf16> to vector<8x384xbf16>
    %283 = arith.extf %282 : vector<8x384xbf16> to vector<8x384xf32>
    %284 = arith.truncf %271 : vector<8x128xf32> to vector<8x128xbf16>
    %cst_75 = arith.constant dense<0.000000e+00> : vector<8x384xf32>
    %285 = tpu.matmul %284, %4, %cst_75 {dimension_numbers = #tpu.dot_dimension_numbers<[1], [0], [0], [1], [0, 0, 1, 1], [], []>} : vector<8x128xbf16>, vector<128x384xbf16>, vector<8x384xf32> -> vector<8x384xf32>
    %286 = vector.broadcast %5 : vector<1x384xf32> to vector<8x384xf32>
    %287 = arith.addf %285, %286 : vector<8x384xf32>
    %288 = vector.extract_strided_slice %283 {offsets = [0, 0], sizes = [8, 128], strides = [1, 1]} : vector<8x384xf32> to vector<8x128xf32>
    %289 = vector.extract_strided_slice %283 {offsets = [0, 128], sizes = [8, 128], strides = [1, 1]} : vector<8x384xf32> to vector<8x128xf32>
    %290 = vector.extract_strided_slice %283 {offsets = [0, 256], sizes = [8, 128], strides = [1, 1]} : vector<8x384xf32> to vector<8x128xf32>
    %291 = vector.extract_strided_slice %287 {offsets = [0, 0], sizes = [8, 128], strides = [1, 1]} : vector<8x384xf32> to vector<8x128xf32>
    %292 = vector.extract_strided_slice %287 {offsets = [0, 128], sizes = [8, 128], strides = [1, 1]} : vector<8x384xf32> to vector<8x128xf32>
    %293 = vector.extract_strided_slice %287 {offsets = [0, 256], sizes = [8, 128], strides = [1, 1]} : vector<8x384xf32> to vector<8x128xf32>
    %294 = arith.addf %288, %291 : vector<8x128xf32>
    %295 = arith.negf %294 : vector<8x128xf32>
    %296 = math.exp %295 : vector<8x128xf32>
    %cst_76 = arith.constant 1.000000e+00 : f32
    %297 = vector.broadcast %cst_76 : f32 to vector<8x128xf32>
    %298 = arith.addf %297, %296 : vector<8x128xf32>
    %299 = arith.divf %297, %298 : vector<8x128xf32>
    %300 = arith.addf %289, %292 : vector<8x128xf32>
    %301 = arith.negf %300 : vector<8x128xf32>
    %302 = math.exp %301 : vector<8x128xf32>
    %cst_77 = arith.constant 1.000000e+00 : f32
    %303 = vector.broadcast %cst_77 : f32 to vector<8x128xf32>
    %304 = arith.addf %303, %302 : vector<8x128xf32>
    %305 = arith.divf %303, %304 : vector<8x128xf32>
    %306 = arith.mulf %299, %293 : vector<8x128xf32>
    %307 = arith.addf %290, %306 : vector<8x128xf32>
    %308 = math.tanh %307 : vector<8x128xf32>
    %cst_78 = arith.constant 1.000000e+00 : f32
    %309 = vector.broadcast %cst_78 : f32 to vector<8x128xf32>
    %310 = arith.subf %309, %305 : vector<8x128xf32>
    %311 = arith.mulf %310, %308 : vector<8x128xf32>
    %312 = arith.mulf %305, %271 : vector<8x128xf32>
    %313 = arith.addf %311, %312 : vector<8x128xf32>
    %314 = vector.broadcast %280 : i32 to vector<8x128xi32>
    %315 = arith.cmpi slt, %6, %314 : vector<8x128xi32>
    %316 = arith.select %315, %313, %271 : vector<8x128xi1>, vector<8x128xf32>
    %cst_79 = arith.constant 0.000000e+00 : f32
    %317 = vector.broadcast %cst_79 : f32 to vector<8x128xf32>
    %318 = arith.select %315, %313, %317 : vector<8x128xi1>, vector<8x128xf32>
    %c6_80 = arith.constant 6 : index
    %c0_81 = arith.constant 0 : index
    %c0_82 = arith.constant 0 : index
    %319 = vector.load %arg5[%c6_80, %c0_81, %c0_82] : memref<16x8x128xf32, #tpu.memory_space<vmem>>, vector<1x8x128xf32>
    %320 = vector.shape_cast %319 : vector<1x8x128xf32> to vector<8x128xf32>
    %321 = vector.shape_cast %318 : vector<8x128xf32> to vector<1x8x128xf32>
    tpu.vector_store %arg5[%c6_80, %c0_81, %c0_82], %321 {strides = array<i32>} : memref<16x8x128xf32, #tpu.memory_space<vmem>>, vector<1x8x128xf32>,
    %c16_i32_83 = arith.constant 16 : i32
    %322 = arith.muli %arg0, %c16_i32_83 : i32
    %c7_i32 = arith.constant 7 : i32
    %323 = arith.addi %322, %c7_i32 : i32
    %324 = arith.index_cast %323 : i32 to index
    %325 = memref.load %arg1[%324] : memref<16xi32, #tpu.memory_space<smem>>
    %c7 = arith.constant 7 : index
    %c0_84 = arith.constant 0 : index
    %c0_85 = arith.constant 0 : index
    %326 = vector.load %arg2[%c7, %c0_84, %c0_85] : memref<16x8x384xbf16, #tpu.memory_space<vmem>>, vector<1x8x384xbf16>
    %327 = vector.shape_cast %326 : vector<1x8x384xbf16> to vector<8x384xbf16>
    %328 = arith.extf %327 : vector<8x384xbf16> to vector<8x384xf32>
    %329 = arith.truncf %316 : vector<8x128xf32> to vector<8x128xbf16>
    %cst_86 = arith.constant dense<0.000000e+00> : vector<8x384xf32>
    %330 = tpu.matmul %329, %4, %cst_86 {dimension_numbers = #tpu.dot_dimension_numbers<[1], [0], [0], [1], [0, 0, 1, 1], [], []>} : vector<8x128xbf16>, vector<128x384xbf16>, vector<8x384xf32> -> vector<8x384xf32>
    %331 = vector.broadcast %5 : vector<1x384xf32> to vector<8x384xf32>
    %332 = arith.addf %330, %331 : vector<8x384xf32>
    %333 = vector.extract_strided_slice %328 {offsets = [0, 0], sizes = [8, 128], strides = [1, 1]} : vector<8x384xf32> to vector<8x128xf32>
    %334 = vector.extract_strided_slice %328 {offsets = [0, 128], sizes = [8, 128], strides = [1, 1]} : vector<8x384xf32> to vector<8x128xf32>
    %335 = vector.extract_strided_slice %328 {offsets = [0, 256], sizes = [8, 128], strides = [1, 1]} : vector<8x384xf32> to vector<8x128xf32>
    %336 = vector.extract_strided_slice %332 {offsets = [0, 0], sizes = [8, 128], strides = [1, 1]} : vector<8x384xf32> to vector<8x128xf32>
    %337 = vector.extract_strided_slice %332 {offsets = [0, 128], sizes = [8, 128], strides = [1, 1]} : vector<8x384xf32> to vector<8x128xf32>
    %338 = vector.extract_strided_slice %332 {offsets = [0, 256], sizes = [8, 128], strides = [1, 1]} : vector<8x384xf32> to vector<8x128xf32>
    %339 = arith.addf %333, %336 : vector<8x128xf32>
    %340 = arith.negf %339 : vector<8x128xf32>
    %341 = math.exp %340 : vector<8x128xf32>
    %cst_87 = arith.constant 1.000000e+00 : f32
    %342 = vector.broadcast %cst_87 : f32 to vector<8x128xf32>
    %343 = arith.addf %342, %341 : vector<8x128xf32>
    %344 = arith.divf %342, %343 : vector<8x128xf32>
    %345 = arith.addf %334, %337 : vector<8x128xf32>
    %346 = arith.negf %345 : vector<8x128xf32>
    %347 = math.exp %346 : vector<8x128xf32>
    %cst_88 = arith.constant 1.000000e+00 : f32
    %348 = vector.broadcast %cst_88 : f32 to vector<8x128xf32>
    %349 = arith.addf %348, %347 : vector<8x128xf32>
    %350 = arith.divf %348, %349 : vector<8x128xf32>
    %351 = arith.mulf %344, %338 : vector<8x128xf32>
    %352 = arith.addf %335, %351 : vector<8x128xf32>
    %353 = math.tanh %352 : vector<8x128xf32>
    %cst_89 = arith.constant 1.000000e+00 : f32
    %354 = vector.broadcast %cst_89 : f32 to vector<8x128xf32>
    %355 = arith.subf %354, %350 : vector<8x128xf32>
    %356 = arith.mulf %355, %353 : vector<8x128xf32>
    %357 = arith.mulf %350, %316 : vector<8x128xf32>
    %358 = arith.addf %356, %357 : vector<8x128xf32>
    %359 = vector.broadcast %325 : i32 to vector<8x128xi32>
    %360 = arith.cmpi slt, %6, %359 : vector<8x128xi32>
    %361 = arith.select %360, %358, %316 : vector<8x128xi1>, vector<8x128xf32>
    %cst_90 = arith.constant 0.000000e+00 : f32
    %362 = vector.broadcast %cst_90 : f32 to vector<8x128xf32>
    %363 = arith.select %360, %358, %362 : vector<8x128xi1>, vector<8x128xf32>
    %c7_91 = arith.constant 7 : index
    %c0_92 = arith.constant 0 : index
    %c0_93 = arith.constant 0 : index
    %364 = vector.load %arg5[%c7_91, %c0_92, %c0_93] : memref<16x8x128xf32, #tpu.memory_space<vmem>>, vector<1x8x128xf32>
    %365 = vector.shape_cast %364 : vector<1x8x128xf32> to vector<8x128xf32>
    %366 = vector.shape_cast %363 : vector<8x128xf32> to vector<1x8x128xf32>
    tpu.vector_store %arg5[%c7_91, %c0_92, %c0_93], %366 {strides = array<i32>} : memref<16x8x128xf32, #tpu.memory_space<vmem>>, vector<1x8x128xf32>,
    %c16_i32_94 = arith.constant 16 : i32
    %367 = arith.muli %arg0, %c16_i32_94 : i32
    %c8_i32 = arith.constant 8 : i32
    %368 = arith.addi %367, %c8_i32 : i32
    %369 = arith.index_cast %368 : i32 to index
    %370 = memref.load %arg1[%369] : memref<16xi32, #tpu.memory_space<smem>>
    %c8 = arith.constant 8 : index
    %c0_95 = arith.constant 0 : index
    %c0_96 = arith.constant 0 : index
    %371 = vector.load %arg2[%c8, %c0_95, %c0_96] : memref<16x8x384xbf16, #tpu.memory_space<vmem>>, vector<1x8x384xbf16>
    %372 = vector.shape_cast %371 : vector<1x8x384xbf16> to vector<8x384xbf16>
    %373 = arith.extf %372 : vector<8x384xbf16> to vector<8x384xf32>
    %374 = arith.truncf %361 : vector<8x128xf32> to vector<8x128xbf16>
    %cst_97 = arith.constant dense<0.000000e+00> : vector<8x384xf32>
    %375 = tpu.matmul %374, %4, %cst_97 {dimension_numbers = #tpu.dot_dimension_numbers<[1], [0], [0], [1], [0, 0, 1, 1], [], []>} : vector<8x128xbf16>, vector<128x384xbf16>, vector<8x384xf32> -> vector<8x384xf32>
    %376 = vector.broadcast %5 : vector<1x384xf32> to vector<8x384xf32>
    %377 = arith.addf %375, %376 : vector<8x384xf32>
    %378 = vector.extract_strided_slice %373 {offsets = [0, 0], sizes = [8, 128], strides = [1, 1]} : vector<8x384xf32> to vector<8x128xf32>
    %379 = vector.extract_strided_slice %373 {offsets = [0, 128], sizes = [8, 128], strides = [1, 1]} : vector<8x384xf32> to vector<8x128xf32>
    %380 = vector.extract_strided_slice %373 {offsets = [0, 256], sizes = [8, 128], strides = [1, 1]} : vector<8x384xf32> to vector<8x128xf32>
    %381 = vector.extract_strided_slice %377 {offsets = [0, 0], sizes = [8, 128], strides = [1, 1]} : vector<8x384xf32> to vector<8x128xf32>
    %382 = vector.extract_strided_slice %377 {offsets = [0, 128], sizes = [8, 128], strides = [1, 1]} : vector<8x384xf32> to vector<8x128xf32>
    %383 = vector.extract_strided_slice %377 {offsets = [0, 256], sizes = [8, 128], strides = [1, 1]} : vector<8x384xf32> to vector<8x128xf32>
    %384 = arith.addf %378, %381 : vector<8x128xf32>
    %385 = arith.negf %384 : vector<8x128xf32>
    %386 = math.exp %385 : vector<8x128xf32>
    %cst_98 = arith.constant 1.000000e+00 : f32
    %387 = vector.broadcast %cst_98 : f32 to vector<8x128xf32>
    %388 = arith.addf %387, %386 : vector<8x128xf32>
    %389 = arith.divf %387, %388 : vector<8x128xf32>
    %390 = arith.addf %379, %382 : vector<8x128xf32>
    %391 = arith.negf %390 : vector<8x128xf32>
    %392 = math.exp %391 : vector<8x128xf32>
    %cst_99 = arith.constant 1.000000e+00 : f32
    %393 = vector.broadcast %cst_99 : f32 to vector<8x128xf32>
    %394 = arith.addf %393, %392 : vector<8x128xf32>
    %395 = arith.divf %393, %394 : vector<8x128xf32>
    %396 = arith.mulf %389, %383 : vector<8x128xf32>
    %397 = arith.addf %380, %396 : vector<8x128xf32>
    %398 = math.tanh %397 : vector<8x128xf32>
    %cst_100 = arith.constant 1.000000e+00 : f32
    %399 = vector.broadcast %cst_100 : f32 to vector<8x128xf32>
    %400 = arith.subf %399, %395 : vector<8x128xf32>
    %401 = arith.mulf %400, %398 : vector<8x128xf32>
    %402 = arith.mulf %395, %361 : vector<8x128xf32>
    %403 = arith.addf %401, %402 : vector<8x128xf32>
    %404 = vector.broadcast %370 : i32 to vector<8x128xi32>
    %405 = arith.cmpi slt, %6, %404 : vector<8x128xi32>
    %406 = arith.select %405, %403, %361 : vector<8x128xi1>, vector<8x128xf32>
    %cst_101 = arith.constant 0.000000e+00 : f32
    %407 = vector.broadcast %cst_101 : f32 to vector<8x128xf32>
    %408 = arith.select %405, %403, %407 : vector<8x128xi1>, vector<8x128xf32>
    %c8_102 = arith.constant 8 : index
    %c0_103 = arith.constant 0 : index
    %c0_104 = arith.constant 0 : index
    %409 = vector.load %arg5[%c8_102, %c0_103, %c0_104] : memref<16x8x128xf32, #tpu.memory_space<vmem>>, vector<1x8x128xf32>
    %410 = vector.shape_cast %409 : vector<1x8x128xf32> to vector<8x128xf32>
    %411 = vector.shape_cast %408 : vector<8x128xf32> to vector<1x8x128xf32>
    tpu.vector_store %arg5[%c8_102, %c0_103, %c0_104], %411 {strides = array<i32>} : memref<16x8x128xf32, #tpu.memory_space<vmem>>, vector<1x8x128xf32>,
    %c16_i32_105 = arith.constant 16 : i32
    %412 = arith.muli %arg0, %c16_i32_105 : i32
    %c9_i32 = arith.constant 9 : i32
    %413 = arith.addi %412, %c9_i32 : i32
    %414 = arith.index_cast %413 : i32 to index
    %415 = memref.load %arg1[%414] : memref<16xi32, #tpu.memory_space<smem>>
    %c9 = arith.constant 9 : index
    %c0_106 = arith.constant 0 : index
    %c0_107 = arith.constant 0 : index
    %416 = vector.load %arg2[%c9, %c0_106, %c0_107] : memref<16x8x384xbf16, #tpu.memory_space<vmem>>, vector<1x8x384xbf16>
    %417 = vector.shape_cast %416 : vector<1x8x384xbf16> to vector<8x384xbf16>
    %418 = arith.extf %417 : vector<8x384xbf16> to vector<8x384xf32>
    %419 = arith.truncf %406 : vector<8x128xf32> to vector<8x128xbf16>
    %cst_108 = arith.constant dense<0.000000e+00> : vector<8x384xf32>
    %420 = tpu.matmul %419, %4, %cst_108 {dimension_numbers = #tpu.dot_dimension_numbers<[1], [0], [0], [1], [0, 0, 1, 1], [], []>} : vector<8x128xbf16>, vector<128x384xbf16>, vector<8x384xf32> -> vector<8x384xf32>
    %421 = vector.broadcast %5 : vector<1x384xf32> to vector<8x384xf32>
    %422 = arith.addf %420, %421 : vector<8x384xf32>
    %423 = vector.extract_strided_slice %418 {offsets = [0, 0], sizes = [8, 128], strides = [1, 1]} : vector<8x384xf32> to vector<8x128xf32>
    %424 = vector.extract_strided_slice %418 {offsets = [0, 128], sizes = [8, 128], strides = [1, 1]} : vector<8x384xf32> to vector<8x128xf32>
    %425 = vector.extract_strided_slice %418 {offsets = [0, 256], sizes = [8, 128], strides = [1, 1]} : vector<8x384xf32> to vector<8x128xf32>
    %426 = vector.extract_strided_slice %422 {offsets = [0, 0], sizes = [8, 128], strides = [1, 1]} : vector<8x384xf32> to vector<8x128xf32>
    %427 = vector.extract_strided_slice %422 {offsets = [0, 128], sizes = [8, 128], strides = [1, 1]} : vector<8x384xf32> to vector<8x128xf32>
    %428 = vector.extract_strided_slice %422 {offsets = [0, 256], sizes = [8, 128], strides = [1, 1]} : vector<8x384xf32> to vector<8x128xf32>
    %429 = arith.addf %423, %426 : vector<8x128xf32>
    %430 = arith.negf %429 : vector<8x128xf32>
    %431 = math.exp %430 : vector<8x128xf32>
    %cst_109 = arith.constant 1.000000e+00 : f32
    %432 = vector.broadcast %cst_109 : f32 to vector<8x128xf32>
    %433 = arith.addf %432, %431 : vector<8x128xf32>
    %434 = arith.divf %432, %433 : vector<8x128xf32>
    %435 = arith.addf %424, %427 : vector<8x128xf32>
    %436 = arith.negf %435 : vector<8x128xf32>
    %437 = math.exp %436 : vector<8x128xf32>
    %cst_110 = arith.constant 1.000000e+00 : f32
    %438 = vector.broadcast %cst_110 : f32 to vector<8x128xf32>
    %439 = arith.addf %438, %437 : vector<8x128xf32>
    %440 = arith.divf %438, %439 : vector<8x128xf32>
    %441 = arith.mulf %434, %428 : vector<8x128xf32>
    %442 = arith.addf %425, %441 : vector<8x128xf32>
    %443 = math.tanh %442 : vector<8x128xf32>
    %cst_111 = arith.constant 1.000000e+00 : f32
    %444 = vector.broadcast %cst_111 : f32 to vector<8x128xf32>
    %445 = arith.subf %444, %440 : vector<8x128xf32>
    %446 = arith.mulf %445, %443 : vector<8x128xf32>
    %447 = arith.mulf %440, %406 : vector<8x128xf32>
    %448 = arith.addf %446, %447 : vector<8x128xf32>
    %449 = vector.broadcast %415 : i32 to vector<8x128xi32>
    %450 = arith.cmpi slt, %6, %449 : vector<8x128xi32>
    %451 = arith.select %450, %448, %406 : vector<8x128xi1>, vector<8x128xf32>
    %cst_112 = arith.constant 0.000000e+00 : f32
    %452 = vector.broadcast %cst_112 : f32 to vector<8x128xf32>
    %453 = arith.select %450, %448, %452 : vector<8x128xi1>, vector<8x128xf32>
    %c9_113 = arith.constant 9 : index
    %c0_114 = arith.constant 0 : index
    %c0_115 = arith.constant 0 : index
    %454 = vector.load %arg5[%c9_113, %c0_114, %c0_115] : memref<16x8x128xf32, #tpu.memory_space<vmem>>, vector<1x8x128xf32>
    %455 = vector.shape_cast %454 : vector<1x8x128xf32> to vector<8x128xf32>
    %456 = vector.shape_cast %453 : vector<8x128xf32> to vector<1x8x128xf32>
    tpu.vector_store %arg5[%c9_113, %c0_114, %c0_115], %456 {strides = array<i32>} : memref<16x8x128xf32, #tpu.memory_space<vmem>>, vector<1x8x128xf32>,
    %c16_i32_116 = arith.constant 16 : i32
    %457 = arith.muli %arg0, %c16_i32_116 : i32
    %c10_i32 = arith.constant 10 : i32
    %458 = arith.addi %457, %c10_i32 : i32
    %459 = arith.index_cast %458 : i32 to index
    %460 = memref.load %arg1[%459] : memref<16xi32, #tpu.memory_space<smem>>
    %c10 = arith.constant 10 : index
    %c0_117 = arith.constant 0 : index
    %c0_118 = arith.constant 0 : index
    %461 = vector.load %arg2[%c10, %c0_117, %c0_118] : memref<16x8x384xbf16, #tpu.memory_space<vmem>>, vector<1x8x384xbf16>
    %462 = vector.shape_cast %461 : vector<1x8x384xbf16> to vector<8x384xbf16>
    %463 = arith.extf %462 : vector<8x384xbf16> to vector<8x384xf32>
    %464 = arith.truncf %451 : vector<8x128xf32> to vector<8x128xbf16>
    %cst_119 = arith.constant dense<0.000000e+00> : vector<8x384xf32>
    %465 = tpu.matmul %464, %4, %cst_119 {dimension_numbers = #tpu.dot_dimension_numbers<[1], [0], [0], [1], [0, 0, 1, 1], [], []>} : vector<8x128xbf16>, vector<128x384xbf16>, vector<8x384xf32> -> vector<8x384xf32>
    %466 = vector.broadcast %5 : vector<1x384xf32> to vector<8x384xf32>
    %467 = arith.addf %465, %466 : vector<8x384xf32>
    %468 = vector.extract_strided_slice %463 {offsets = [0, 0], sizes = [8, 128], strides = [1, 1]} : vector<8x384xf32> to vector<8x128xf32>
    %469 = vector.extract_strided_slice %463 {offsets = [0, 128], sizes = [8, 128], strides = [1, 1]} : vector<8x384xf32> to vector<8x128xf32>
    %470 = vector.extract_strided_slice %463 {offsets = [0, 256], sizes = [8, 128], strides = [1, 1]} : vector<8x384xf32> to vector<8x128xf32>
    %471 = vector.extract_strided_slice %467 {offsets = [0, 0], sizes = [8, 128], strides = [1, 1]} : vector<8x384xf32> to vector<8x128xf32>
    %472 = vector.extract_strided_slice %467 {offsets = [0, 128], sizes = [8, 128], strides = [1, 1]} : vector<8x384xf32> to vector<8x128xf32>
    %473 = vector.extract_strided_slice %467 {offsets = [0, 256], sizes = [8, 128], strides = [1, 1]} : vector<8x384xf32> to vector<8x128xf32>
    %474 = arith.addf %468, %471 : vector<8x128xf32>
    %475 = arith.negf %474 : vector<8x128xf32>
    %476 = math.exp %475 : vector<8x128xf32>
    %cst_120 = arith.constant 1.000000e+00 : f32
    %477 = vector.broadcast %cst_120 : f32 to vector<8x128xf32>
    %478 = arith.addf %477, %476 : vector<8x128xf32>
    %479 = arith.divf %477, %478 : vector<8x128xf32>
    %480 = arith.addf %469, %472 : vector<8x128xf32>
    %481 = arith.negf %480 : vector<8x128xf32>
    %482 = math.exp %481 : vector<8x128xf32>
    %cst_121 = arith.constant 1.000000e+00 : f32
    %483 = vector.broadcast %cst_121 : f32 to vector<8x128xf32>
    %484 = arith.addf %483, %482 : vector<8x128xf32>
    %485 = arith.divf %483, %484 : vector<8x128xf32>
    %486 = arith.mulf %479, %473 : vector<8x128xf32>
    %487 = arith.addf %470, %486 : vector<8x128xf32>
    %488 = math.tanh %487 : vector<8x128xf32>
    %cst_122 = arith.constant 1.000000e+00 : f32
    %489 = vector.broadcast %cst_122 : f32 to vector<8x128xf32>
    %490 = arith.subf %489, %485 : vector<8x128xf32>
    %491 = arith.mulf %490, %488 : vector<8x128xf32>
    %492 = arith.mulf %485, %451 : vector<8x128xf32>
    %493 = arith.addf %491, %492 : vector<8x128xf32>
    %494 = vector.broadcast %460 : i32 to vector<8x128xi32>
    %495 = arith.cmpi slt, %6, %494 : vector<8x128xi32>
    %496 = arith.select %495, %493, %451 : vector<8x128xi1>, vector<8x128xf32>
    %cst_123 = arith.constant 0.000000e+00 : f32
    %497 = vector.broadcast %cst_123 : f32 to vector<8x128xf32>
    %498 = arith.select %495, %493, %497 : vector<8x128xi1>, vector<8x128xf32>
    %c10_124 = arith.constant 10 : index
    %c0_125 = arith.constant 0 : index
    %c0_126 = arith.constant 0 : index
    %499 = vector.load %arg5[%c10_124, %c0_125, %c0_126] : memref<16x8x128xf32, #tpu.memory_space<vmem>>, vector<1x8x128xf32>
    %500 = vector.shape_cast %499 : vector<1x8x128xf32> to vector<8x128xf32>
    %501 = vector.shape_cast %498 : vector<8x128xf32> to vector<1x8x128xf32>
    tpu.vector_store %arg5[%c10_124, %c0_125, %c0_126], %501 {strides = array<i32>} : memref<16x8x128xf32, #tpu.memory_space<vmem>>, vector<1x8x128xf32>,
    %c16_i32_127 = arith.constant 16 : i32
    %502 = arith.muli %arg0, %c16_i32_127 : i32
    %c11_i32 = arith.constant 11 : i32
    %503 = arith.addi %502, %c11_i32 : i32
    %504 = arith.index_cast %503 : i32 to index
    %505 = memref.load %arg1[%504] : memref<16xi32, #tpu.memory_space<smem>>
    %c11 = arith.constant 11 : index
    %c0_128 = arith.constant 0 : index
    %c0_129 = arith.constant 0 : index
    %506 = vector.load %arg2[%c11, %c0_128, %c0_129] : memref<16x8x384xbf16, #tpu.memory_space<vmem>>, vector<1x8x384xbf16>
    %507 = vector.shape_cast %506 : vector<1x8x384xbf16> to vector<8x384xbf16>
    %508 = arith.extf %507 : vector<8x384xbf16> to vector<8x384xf32>
    %509 = arith.truncf %496 : vector<8x128xf32> to vector<8x128xbf16>
    %cst_130 = arith.constant dense<0.000000e+00> : vector<8x384xf32>
    %510 = tpu.matmul %509, %4, %cst_130 {dimension_numbers = #tpu.dot_dimension_numbers<[1], [0], [0], [1], [0, 0, 1, 1], [], []>} : vector<8x128xbf16>, vector<128x384xbf16>, vector<8x384xf32> -> vector<8x384xf32>
    %511 = vector.broadcast %5 : vector<1x384xf32> to vector<8x384xf32>
    %512 = arith.addf %510, %511 : vector<8x384xf32>
    %513 = vector.extract_strided_slice %508 {offsets = [0, 0], sizes = [8, 128], strides = [1, 1]} : vector<8x384xf32> to vector<8x128xf32>
    %514 = vector.extract_strided_slice %508 {offsets = [0, 128], sizes = [8, 128], strides = [1, 1]} : vector<8x384xf32> to vector<8x128xf32>
    %515 = vector.extract_strided_slice %508 {offsets = [0, 256], sizes = [8, 128], strides = [1, 1]} : vector<8x384xf32> to vector<8x128xf32>
    %516 = vector.extract_strided_slice %512 {offsets = [0, 0], sizes = [8, 128], strides = [1, 1]} : vector<8x384xf32> to vector<8x128xf32>
    %517 = vector.extract_strided_slice %512 {offsets = [0, 128], sizes = [8, 128], strides = [1, 1]} : vector<8x384xf32> to vector<8x128xf32>
    %518 = vector.extract_strided_slice %512 {offsets = [0, 256], sizes = [8, 128], strides = [1, 1]} : vector<8x384xf32> to vector<8x128xf32>
    %519 = arith.addf %513, %516 : vector<8x128xf32>
    %520 = arith.negf %519 : vector<8x128xf32>
    %521 = math.exp %520 : vector<8x128xf32>
    %cst_131 = arith.constant 1.000000e+00 : f32
    %522 = vector.broadcast %cst_131 : f32 to vector<8x128xf32>
    %523 = arith.addf %522, %521 : vector<8x128xf32>
    %524 = arith.divf %522, %523 : vector<8x128xf32>
    %525 = arith.addf %514, %517 : vector<8x128xf32>
    %526 = arith.negf %525 : vector<8x128xf32>
    %527 = math.exp %526 : vector<8x128xf32>
    %cst_132 = arith.constant 1.000000e+00 : f32
    %528 = vector.broadcast %cst_132 : f32 to vector<8x128xf32>
    %529 = arith.addf %528, %527 : vector<8x128xf32>
    %530 = arith.divf %528, %529 : vector<8x128xf32>
    %531 = arith.mulf %524, %518 : vector<8x128xf32>
    %532 = arith.addf %515, %531 : vector<8x128xf32>
    %533 = math.tanh %532 : vector<8x128xf32>
    %cst_133 = arith.constant 1.000000e+00 : f32
    %534 = vector.broadcast %cst_133 : f32 to vector<8x128xf32>
    %535 = arith.subf %534, %530 : vector<8x128xf32>
    %536 = arith.mulf %535, %533 : vector<8x128xf32>
    %537 = arith.mulf %530, %496 : vector<8x128xf32>
    %538 = arith.addf %536, %537 : vector<8x128xf32>
    %539 = vector.broadcast %505 : i32 to vector<8x128xi32>
    %540 = arith.cmpi slt, %6, %539 : vector<8x128xi32>
    %541 = arith.select %540, %538, %496 : vector<8x128xi1>, vector<8x128xf32>
    %cst_134 = arith.constant 0.000000e+00 : f32
    %542 = vector.broadcast %cst_134 : f32 to vector<8x128xf32>
    %543 = arith.select %540, %538, %542 : vector<8x128xi1>, vector<8x128xf32>
    %c11_135 = arith.constant 11 : index
    %c0_136 = arith.constant 0 : index
    %c0_137 = arith.constant 0 : index
    %544 = vector.load %arg5[%c11_135, %c0_136, %c0_137] : memref<16x8x128xf32, #tpu.memory_space<vmem>>, vector<1x8x128xf32>
    %545 = vector.shape_cast %544 : vector<1x8x128xf32> to vector<8x128xf32>
    %546 = vector.shape_cast %543 : vector<8x128xf32> to vector<1x8x128xf32>
    tpu.vector_store %arg5[%c11_135, %c0_136, %c0_137], %546 {strides = array<i32>} : memref<16x8x128xf32, #tpu.memory_space<vmem>>, vector<1x8x128xf32>,
    %c16_i32_138 = arith.constant 16 : i32
    %547 = arith.muli %arg0, %c16_i32_138 : i32
    %c12_i32 = arith.constant 12 : i32
    %548 = arith.addi %547, %c12_i32 : i32
    %549 = arith.index_cast %548 : i32 to index
    %550 = memref.load %arg1[%549] : memref<16xi32, #tpu.memory_space<smem>>
    %c12 = arith.constant 12 : index
    %c0_139 = arith.constant 0 : index
    %c0_140 = arith.constant 0 : index
    %551 = vector.load %arg2[%c12, %c0_139, %c0_140] : memref<16x8x384xbf16, #tpu.memory_space<vmem>>, vector<1x8x384xbf16>
    %552 = vector.shape_cast %551 : vector<1x8x384xbf16> to vector<8x384xbf16>
    %553 = arith.extf %552 : vector<8x384xbf16> to vector<8x384xf32>
    %554 = arith.truncf %541 : vector<8x128xf32> to vector<8x128xbf16>
    %cst_141 = arith.constant dense<0.000000e+00> : vector<8x384xf32>
    %555 = tpu.matmul %554, %4, %cst_141 {dimension_numbers = #tpu.dot_dimension_numbers<[1], [0], [0], [1], [0, 0, 1, 1], [], []>} : vector<8x128xbf16>, vector<128x384xbf16>, vector<8x384xf32> -> vector<8x384xf32>
    %556 = vector.broadcast %5 : vector<1x384xf32> to vector<8x384xf32>
    %557 = arith.addf %555, %556 : vector<8x384xf32>
    %558 = vector.extract_strided_slice %553 {offsets = [0, 0], sizes = [8, 128], strides = [1, 1]} : vector<8x384xf32> to vector<8x128xf32>
    %559 = vector.extract_strided_slice %553 {offsets = [0, 128], sizes = [8, 128], strides = [1, 1]} : vector<8x384xf32> to vector<8x128xf32>
    %560 = vector.extract_strided_slice %553 {offsets = [0, 256], sizes = [8, 128], strides = [1, 1]} : vector<8x384xf32> to vector<8x128xf32>
    %561 = vector.extract_strided_slice %557 {offsets = [0, 0], sizes = [8, 128], strides = [1, 1]} : vector<8x384xf32> to vector<8x128xf32>
    %562 = vector.extract_strided_slice %557 {offsets = [0, 128], sizes = [8, 128], strides = [1, 1]} : vector<8x384xf32> to vector<8x128xf32>
    %563 = vector.extract_strided_slice %557 {offsets = [0, 256], sizes = [8, 128], strides = [1, 1]} : vector<8x384xf32> to vector<8x128xf32>
    %564 = arith.addf %558, %561 : vector<8x128xf32>
    %565 = arith.negf %564 : vector<8x128xf32>
    %566 = math.exp %565 : vector<8x128xf32>
    %cst_142 = arith.constant 1.000000e+00 : f32
    %567 = vector.broadcast %cst_142 : f32 to vector<8x128xf32>
    %568 = arith.addf %567, %566 : vector<8x128xf32>
    %569 = arith.divf %567, %568 : vector<8x128xf32>
    %570 = arith.addf %559, %562 : vector<8x128xf32>
    %571 = arith.negf %570 : vector<8x128xf32>
    %572 = math.exp %571 : vector<8x128xf32>
    %cst_143 = arith.constant 1.000000e+00 : f32
    %573 = vector.broadcast %cst_143 : f32 to vector<8x128xf32>
    %574 = arith.addf %573, %572 : vector<8x128xf32>
    %575 = arith.divf %573, %574 : vector<8x128xf32>
    %576 = arith.mulf %569, %563 : vector<8x128xf32>
    %577 = arith.addf %560, %576 : vector<8x128xf32>
    %578 = math.tanh %577 : vector<8x128xf32>
    %cst_144 = arith.constant 1.000000e+00 : f32
    %579 = vector.broadcast %cst_144 : f32 to vector<8x128xf32>
    %580 = arith.subf %579, %575 : vector<8x128xf32>
    %581 = arith.mulf %580, %578 : vector<8x128xf32>
    %582 = arith.mulf %575, %541 : vector<8x128xf32>
    %583 = arith.addf %581, %582 : vector<8x128xf32>
    %584 = vector.broadcast %550 : i32 to vector<8x128xi32>
    %585 = arith.cmpi slt, %6, %584 : vector<8x128xi32>
    %586 = arith.select %585, %583, %541 : vector<8x128xi1>, vector<8x128xf32>
    %cst_145 = arith.constant 0.000000e+00 : f32
    %587 = vector.broadcast %cst_145 : f32 to vector<8x128xf32>
    %588 = arith.select %585, %583, %587 : vector<8x128xi1>, vector<8x128xf32>
    %c12_146 = arith.constant 12 : index
    %c0_147 = arith.constant 0 : index
    %c0_148 = arith.constant 0 : index
    %589 = vector.load %arg5[%c12_146, %c0_147, %c0_148] : memref<16x8x128xf32, #tpu.memory_space<vmem>>, vector<1x8x128xf32>
    %590 = vector.shape_cast %589 : vector<1x8x128xf32> to vector<8x128xf32>
    %591 = vector.shape_cast %588 : vector<8x128xf32> to vector<1x8x128xf32>
    tpu.vector_store %arg5[%c12_146, %c0_147, %c0_148], %591 {strides = array<i32>} : memref<16x8x128xf32, #tpu.memory_space<vmem>>, vector<1x8x128xf32>,
    %c16_i32_149 = arith.constant 16 : i32
    %592 = arith.muli %arg0, %c16_i32_149 : i32
    %c13_i32 = arith.constant 13 : i32
    %593 = arith.addi %592, %c13_i32 : i32
    %594 = arith.index_cast %593 : i32 to index
    %595 = memref.load %arg1[%594] : memref<16xi32, #tpu.memory_space<smem>>
    %c13 = arith.constant 13 : index
    %c0_150 = arith.constant 0 : index
    %c0_151 = arith.constant 0 : index
    %596 = vector.load %arg2[%c13, %c0_150, %c0_151] : memref<16x8x384xbf16, #tpu.memory_space<vmem>>, vector<1x8x384xbf16>
    %597 = vector.shape_cast %596 : vector<1x8x384xbf16> to vector<8x384xbf16>
    %598 = arith.extf %597 : vector<8x384xbf16> to vector<8x384xf32>
    %599 = arith.truncf %586 : vector<8x128xf32> to vector<8x128xbf16>
    %cst_152 = arith.constant dense<0.000000e+00> : vector<8x384xf32>
    %600 = tpu.matmul %599, %4, %cst_152 {dimension_numbers = #tpu.dot_dimension_numbers<[1], [0], [0], [1], [0, 0, 1, 1], [], []>} : vector<8x128xbf16>, vector<128x384xbf16>, vector<8x384xf32> -> vector<8x384xf32>
    %601 = vector.broadcast %5 : vector<1x384xf32> to vector<8x384xf32>
    %602 = arith.addf %600, %601 : vector<8x384xf32>
    %603 = vector.extract_strided_slice %598 {offsets = [0, 0], sizes = [8, 128], strides = [1, 1]} : vector<8x384xf32> to vector<8x128xf32>
    %604 = vector.extract_strided_slice %598 {offsets = [0, 128], sizes = [8, 128], strides = [1, 1]} : vector<8x384xf32> to vector<8x128xf32>
    %605 = vector.extract_strided_slice %598 {offsets = [0, 256], sizes = [8, 128], strides = [1, 1]} : vector<8x384xf32> to vector<8x128xf32>
    %606 = vector.extract_strided_slice %602 {offsets = [0, 0], sizes = [8, 128], strides = [1, 1]} : vector<8x384xf32> to vector<8x128xf32>
    %607 = vector.extract_strided_slice %602 {offsets = [0, 128], sizes = [8, 128], strides = [1, 1]} : vector<8x384xf32> to vector<8x128xf32>
    %608 = vector.extract_strided_slice %602 {offsets = [0, 256], sizes = [8, 128], strides = [1, 1]} : vector<8x384xf32> to vector<8x128xf32>
    %609 = arith.addf %603, %606 : vector<8x128xf32>
    %610 = arith.negf %609 : vector<8x128xf32>
    %611 = math.exp %610 : vector<8x128xf32>
    %cst_153 = arith.constant 1.000000e+00 : f32
    %612 = vector.broadcast %cst_153 : f32 to vector<8x128xf32>
    %613 = arith.addf %612, %611 : vector<8x128xf32>
    %614 = arith.divf %612, %613 : vector<8x128xf32>
    %615 = arith.addf %604, %607 : vector<8x128xf32>
    %616 = arith.negf %615 : vector<8x128xf32>
    %617 = math.exp %616 : vector<8x128xf32>
    %cst_154 = arith.constant 1.000000e+00 : f32
    %618 = vector.broadcast %cst_154 : f32 to vector<8x128xf32>
    %619 = arith.addf %618, %617 : vector<8x128xf32>
    %620 = arith.divf %618, %619 : vector<8x128xf32>
    %621 = arith.mulf %614, %608 : vector<8x128xf32>
    %622 = arith.addf %605, %621 : vector<8x128xf32>
    %623 = math.tanh %622 : vector<8x128xf32>
    %cst_155 = arith.constant 1.000000e+00 : f32
    %624 = vector.broadcast %cst_155 : f32 to vector<8x128xf32>
    %625 = arith.subf %624, %620 : vector<8x128xf32>
    %626 = arith.mulf %625, %623 : vector<8x128xf32>
    %627 = arith.mulf %620, %586 : vector<8x128xf32>
    %628 = arith.addf %626, %627 : vector<8x128xf32>
    %629 = vector.broadcast %595 : i32 to vector<8x128xi32>
    %630 = arith.cmpi slt, %6, %629 : vector<8x128xi32>
    %631 = arith.select %630, %628, %586 : vector<8x128xi1>, vector<8x128xf32>
    %cst_156 = arith.constant 0.000000e+00 : f32
    %632 = vector.broadcast %cst_156 : f32 to vector<8x128xf32>
    %633 = arith.select %630, %628, %632 : vector<8x128xi1>, vector<8x128xf32>
    %c13_157 = arith.constant 13 : index
    %c0_158 = arith.constant 0 : index
    %c0_159 = arith.constant 0 : index
    %634 = vector.load %arg5[%c13_157, %c0_158, %c0_159] : memref<16x8x128xf32, #tpu.memory_space<vmem>>, vector<1x8x128xf32>
    %635 = vector.shape_cast %634 : vector<1x8x128xf32> to vector<8x128xf32>
    %636 = vector.shape_cast %633 : vector<8x128xf32> to vector<1x8x128xf32>
    tpu.vector_store %arg5[%c13_157, %c0_158, %c0_159], %636 {strides = array<i32>} : memref<16x8x128xf32, #tpu.memory_space<vmem>>, vector<1x8x128xf32>,
    %c16_i32_160 = arith.constant 16 : i32
    %637 = arith.muli %arg0, %c16_i32_160 : i32
    %c14_i32 = arith.constant 14 : i32
    %638 = arith.addi %637, %c14_i32 : i32
    %639 = arith.index_cast %638 : i32 to index
    %640 = memref.load %arg1[%639] : memref<16xi32, #tpu.memory_space<smem>>
    %c14 = arith.constant 14 : index
    %c0_161 = arith.constant 0 : index
    %c0_162 = arith.constant 0 : index
    %641 = vector.load %arg2[%c14, %c0_161, %c0_162] : memref<16x8x384xbf16, #tpu.memory_space<vmem>>, vector<1x8x384xbf16>
    %642 = vector.shape_cast %641 : vector<1x8x384xbf16> to vector<8x384xbf16>
    %643 = arith.extf %642 : vector<8x384xbf16> to vector<8x384xf32>
    %644 = arith.truncf %631 : vector<8x128xf32> to vector<8x128xbf16>
    %cst_163 = arith.constant dense<0.000000e+00> : vector<8x384xf32>
    %645 = tpu.matmul %644, %4, %cst_163 {dimension_numbers = #tpu.dot_dimension_numbers<[1], [0], [0], [1], [0, 0, 1, 1], [], []>} : vector<8x128xbf16>, vector<128x384xbf16>, vector<8x384xf32> -> vector<8x384xf32>
    %646 = vector.broadcast %5 : vector<1x384xf32> to vector<8x384xf32>
    %647 = arith.addf %645, %646 : vector<8x384xf32>
    %648 = vector.extract_strided_slice %643 {offsets = [0, 0], sizes = [8, 128], strides = [1, 1]} : vector<8x384xf32> to vector<8x128xf32>
    %649 = vector.extract_strided_slice %643 {offsets = [0, 128], sizes = [8, 128], strides = [1, 1]} : vector<8x384xf32> to vector<8x128xf32>
    %650 = vector.extract_strided_slice %643 {offsets = [0, 256], sizes = [8, 128], strides = [1, 1]} : vector<8x384xf32> to vector<8x128xf32>
    %651 = vector.extract_strided_slice %647 {offsets = [0, 0], sizes = [8, 128], strides = [1, 1]} : vector<8x384xf32> to vector<8x128xf32>
    %652 = vector.extract_strided_slice %647 {offsets = [0, 128], sizes = [8, 128], strides = [1, 1]} : vector<8x384xf32> to vector<8x128xf32>
    %653 = vector.extract_strided_slice %647 {offsets = [0, 256], sizes = [8, 128], strides = [1, 1]} : vector<8x384xf32> to vector<8x128xf32>
    %654 = arith.addf %648, %651 : vector<8x128xf32>
    %655 = arith.negf %654 : vector<8x128xf32>
    %656 = math.exp %655 : vector<8x128xf32>
    %cst_164 = arith.constant 1.000000e+00 : f32
    %657 = vector.broadcast %cst_164 : f32 to vector<8x128xf32>
    %658 = arith.addf %657, %656 : vector<8x128xf32>
    %659 = arith.divf %657, %658 : vector<8x128xf32>
    %660 = arith.addf %649, %652 : vector<8x128xf32>
    %661 = arith.negf %660 : vector<8x128xf32>
    %662 = math.exp %661 : vector<8x128xf32>
    %cst_165 = arith.constant 1.000000e+00 : f32
    %663 = vector.broadcast %cst_165 : f32 to vector<8x128xf32>
    %664 = arith.addf %663, %662 : vector<8x128xf32>
    %665 = arith.divf %663, %664 : vector<8x128xf32>
    %666 = arith.mulf %659, %653 : vector<8x128xf32>
    %667 = arith.addf %650, %666 : vector<8x128xf32>
    %668 = math.tanh %667 : vector<8x128xf32>
    %cst_166 = arith.constant 1.000000e+00 : f32
    %669 = vector.broadcast %cst_166 : f32 to vector<8x128xf32>
    %670 = arith.subf %669, %665 : vector<8x128xf32>
    %671 = arith.mulf %670, %668 : vector<8x128xf32>
    %672 = arith.mulf %665, %631 : vector<8x128xf32>
    %673 = arith.addf %671, %672 : vector<8x128xf32>
    %674 = vector.broadcast %640 : i32 to vector<8x128xi32>
    %675 = arith.cmpi slt, %6, %674 : vector<8x128xi32>
    %676 = arith.select %675, %673, %631 : vector<8x128xi1>, vector<8x128xf32>
    %cst_167 = arith.constant 0.000000e+00 : f32
    %677 = vector.broadcast %cst_167 : f32 to vector<8x128xf32>
    %678 = arith.select %675, %673, %677 : vector<8x128xi1>, vector<8x128xf32>
    %c14_168 = arith.constant 14 : index
    %c0_169 = arith.constant 0 : index
    %c0_170 = arith.constant 0 : index
    %679 = vector.load %arg5[%c14_168, %c0_169, %c0_170] : memref<16x8x128xf32, #tpu.memory_space<vmem>>, vector<1x8x128xf32>
    %680 = vector.shape_cast %679 : vector<1x8x128xf32> to vector<8x128xf32>
    %681 = vector.shape_cast %678 : vector<8x128xf32> to vector<1x8x128xf32>
    tpu.vector_store %arg5[%c14_168, %c0_169, %c0_170], %681 {strides = array<i32>} : memref<16x8x128xf32, #tpu.memory_space<vmem>>, vector<1x8x128xf32>,
    %c16_i32_171 = arith.constant 16 : i32
    %682 = arith.muli %arg0, %c16_i32_171 : i32
    %c15_i32 = arith.constant 15 : i32
    %683 = arith.addi %682, %c15_i32 : i32
    %684 = arith.index_cast %683 : i32 to index
    %685 = memref.load %arg1[%684] : memref<16xi32, #tpu.memory_space<smem>>
    %c15 = arith.constant 15 : index
    %c0_172 = arith.constant 0 : index
    %c0_173 = arith.constant 0 : index
    %686 = vector.load %arg2[%c15, %c0_172, %c0_173] : memref<16x8x384xbf16, #tpu.memory_space<vmem>>, vector<1x8x384xbf16>
    %687 = vector.shape_cast %686 : vector<1x8x384xbf16> to vector<8x384xbf16>
    %688 = arith.extf %687 : vector<8x384xbf16> to vector<8x384xf32>
    %689 = arith.truncf %676 : vector<8x128xf32> to vector<8x128xbf16>
    %cst_174 = arith.constant dense<0.000000e+00> : vector<8x384xf32>
    %690 = tpu.matmul %689, %4, %cst_174 {dimension_numbers = #tpu.dot_dimension_numbers<[1], [0], [0], [1], [0, 0, 1, 1], [], []>} : vector<8x128xbf16>, vector<128x384xbf16>, vector<8x384xf32> -> vector<8x384xf32>
    %691 = vector.broadcast %5 : vector<1x384xf32> to vector<8x384xf32>
    %692 = arith.addf %690, %691 : vector<8x384xf32>
    %693 = vector.extract_strided_slice %688 {offsets = [0, 0], sizes = [8, 128], strides = [1, 1]} : vector<8x384xf32> to vector<8x128xf32>
    %694 = vector.extract_strided_slice %688 {offsets = [0, 128], sizes = [8, 128], strides = [1, 1]} : vector<8x384xf32> to vector<8x128xf32>
    %695 = vector.extract_strided_slice %688 {offsets = [0, 256], sizes = [8, 128], strides = [1, 1]} : vector<8x384xf32> to vector<8x128xf32>
    %696 = vector.extract_strided_slice %692 {offsets = [0, 0], sizes = [8, 128], strides = [1, 1]} : vector<8x384xf32> to vector<8x128xf32>
    %697 = vector.extract_strided_slice %692 {offsets = [0, 128], sizes = [8, 128], strides = [1, 1]} : vector<8x384xf32> to vector<8x128xf32>
    %698 = vector.extract_strided_slice %692 {offsets = [0, 256], sizes = [8, 128], strides = [1, 1]} : vector<8x384xf32> to vector<8x128xf32>
    %699 = arith.addf %693, %696 : vector<8x128xf32>
    %700 = arith.negf %699 : vector<8x128xf32>
    %701 = math.exp %700 : vector<8x128xf32>
    %cst_175 = arith.constant 1.000000e+00 : f32
    %702 = vector.broadcast %cst_175 : f32 to vector<8x128xf32>
    %703 = arith.addf %702, %701 : vector<8x128xf32>
    %704 = arith.divf %702, %703 : vector<8x128xf32>
    %705 = arith.addf %694, %697 : vector<8x128xf32>
    %706 = arith.negf %705 : vector<8x128xf32>
    %707 = math.exp %706 : vector<8x128xf32>
    %cst_176 = arith.constant 1.000000e+00 : f32
    %708 = vector.broadcast %cst_176 : f32 to vector<8x128xf32>
    %709 = arith.addf %708, %707 : vector<8x128xf32>
    %710 = arith.divf %708, %709 : vector<8x128xf32>
    %711 = arith.mulf %704, %698 : vector<8x128xf32>
    %712 = arith.addf %695, %711 : vector<8x128xf32>
    %713 = math.tanh %712 : vector<8x128xf32>
    %cst_177 = arith.constant 1.000000e+00 : f32
    %714 = vector.broadcast %cst_177 : f32 to vector<8x128xf32>
    %715 = arith.subf %714, %710 : vector<8x128xf32>
    %716 = arith.mulf %715, %713 : vector<8x128xf32>
    %717 = arith.mulf %710, %676 : vector<8x128xf32>
    %718 = arith.addf %716, %717 : vector<8x128xf32>
    %719 = vector.broadcast %685 : i32 to vector<8x128xi32>
    %720 = arith.cmpi slt, %6, %719 : vector<8x128xi32>
    %721 = arith.select %720, %718, %676 : vector<8x128xi1>, vector<8x128xf32>
    %cst_178 = arith.constant 0.000000e+00 : f32
    %722 = vector.broadcast %cst_178 : f32 to vector<8x128xf32>
    %723 = arith.select %720, %718, %722 : vector<8x128xi1>, vector<8x128xf32>
    %c15_179 = arith.constant 15 : index
    %c0_180 = arith.constant 0 : index
    %c0_181 = arith.constant 0 : index
    %724 = vector.load %arg5[%c15_179, %c0_180, %c0_181] : memref<16x8x128xf32, #tpu.memory_space<vmem>>, vector<1x8x128xf32>
    %725 = vector.shape_cast %724 : vector<1x8x128xf32> to vector<8x128xf32>
    %726 = vector.shape_cast %723 : vector<8x128xf32> to vector<1x8x128xf32>
    tpu.vector_store %arg5[%c15_179, %c0_180, %c0_181], %726 {strides = array<i32>} : memref<16x8x128xf32, #tpu.memory_space<vmem>>, vector<1x8x128xf32>,
    %c0_182 = arith.constant 0 : index
    %c0_183 = arith.constant 0 : index
    %727 = vector.load %arg7[%c0_182, %c0_183] : memref<8x128xf32, #tpu.memory_space<vmem>>, vector<8x128xf32>
    tpu.vector_store %arg7[%c0_182, %c0_183], %721 {strides = array<i32>} : memref<8x128xf32, #tpu.memory_space<vmem>>, vector<8x128xf32>,
    %c0_i32_184 = arith.constant 0 : i32
    %728 = arith.cmpi eq, %arg0, %c0_i32_184 : i32
    %729 = arith.extui %728 : i1 to i32
    %c0_i32_185 = arith.constant 0 : i32
    %730 = arith.cmpi ne, %729, %c0_i32_185 : i32
    scf.if %730 {
      %c0_186 = arith.constant 0 : index
      %c0_187 = arith.constant 0 : index
      %731 = vector.load %arg6[%c0_186, %c0_187] : memref<8x128xf32, #tpu.memory_space<vmem>>, vector<8x128xf32>
      tpu.vector_store %arg6[%c0_186, %c0_187], %721 {strides = array<i32>} : memref<8x128xf32, #tpu.memory_space<vmem>>, vector<8x128xf32>,
    } else {
    }
    return
  }
  func.func @transform_0(%arg0: i32, %arg1: memref<16xi32, #tpu.memory_space<smem>>) -> (i32, i32, i32) {
    %c0_i32 = arith.constant 0 : i32
    %c0_i32_0 = arith.constant 0 : i32
    %c0_i32_1 = arith.constant 0 : i32
    return %arg0, %c0_i32, %c0_i32_0 : i32, i32, i32
  }
  func.func @transform_1(%arg0: i32, %arg1: memref<16xi32, #tpu.memory_space<smem>>) -> (i32, i32) {
    %c0_i32 = arith.constant 0 : i32
    %c0_i32_0 = arith.constant 0 : i32
    %c0_i32_1 = arith.constant 0 : i32
    return %c0_i32, %c0_i32_0 : i32, i32
  }
  func.func @transform_2(%arg0: i32, %arg1: memref<16xi32, #tpu.memory_space<smem>>) -> (i32, i32) {
    %c0_i32 = arith.constant 0 : i32
    %c0_i32_0 = arith.constant 0 : i32
    %c0_i32_1 = arith.constant 0 : i32
    return %c0_i32, %c0_i32_0 : i32, i32
  }
  func.func @transform_3(%arg0: i32, %arg1: memref<16xi32, #tpu.memory_space<smem>>) -> (i32, i32, i32) {
    %c0_i32 = arith.constant 0 : i32
    %c0_i32_0 = arith.constant 0 : i32
    %c0_i32_1 = arith.constant 0 : i32
    return %arg0, %c0_i32, %c0_i32_0 : i32, i32, i32
  }
  func.func @transform_4(%arg0: i32, %arg1: memref<16xi32, #tpu.memory_space<smem>>) -> (i32, i32) {
    %c0_i32 = arith.constant 0 : i32
    %c0_i32_0 = arith.constant 0 : i32
    %c0_i32_1 = arith.constant 0 : i32
    return %c0_i32, %c0_i32_0 : i32, i32
  }
}

</mosaic_0001>

<bundles_post_ra>
// kernel: _encoder_forward.1
= control target key start
LH: loop header
LB: loop body
LE: loop exit
PB: predicated region body
PF: predicated region fallthrough
CT: control target
= control target key end

     0   :  { %s4223_s0 = inlined_call_operand.vmem [shape: s32[16], index: 0, kind: input, shape index: {}]   ;;  %s4224_s1 = inlined_call_operand.vmem [shape: bf16[16,8,384], index: 1, kind: input, shape index: {}]   ;;  %s4225_s2 = inlined_call_operand.vmem [shape: bf16[128,384], index: 2, kind: input, shape index: {}]   ;;  %s4226_s3 = inlined_call_operand.vmem [shape: f32[1,384], index: 3, kind: input, shape index: {}]   ;;  %s4227_s4 = inlined_call_operand.hbm [shape: f32[16,8,128], index: 4, kind: output, shape index: {0}]   ;;  %s4228_s5 = inlined_call_operand.hbm [shape: f32[8,128], index: 5, kind: output, shape index: {1}]  }
   0x1   :  { %s11_s20 = sshll.u32 %s4223_s0, 4  ;;  %s12_s20 = int_to_ptr.vmem [resolvable:$true] %s11_s20 }
   0x2   :  { %s2936_s21 = scalar_lea.vmem %s12_s20, 16  ;;  %p2941_p1 = scmp.lt.s32.totalorder %s12_s20, %s12_s20 }
   0x3   :  { %p2937_p0 = scmp.ne.s32.totalorder %s12_s20, %s2936_s21  ;;  %p2942_p2 = scmp.lt.s32.totalorder %s2936_s21, %s2936_s21 }
   0x5   :  { %p2943_p3 = por %p2942_p2, %p2941_p1 }
   0x7   :  { %p2944_p4 = pnand %p2943_p3, %p2937_p0 }
   0x9   :  { %2947 = shalt.err (!%p2944_p4)  }
   0xa   :  { %s2994_s22 = smov [#allocation4]  }
   0xb   :  { %14 = dma.vmem_to_smem %s12_s20, 16, %s2994_s22, [#allocation3] }
   0xc   :  { %2988 = dma.done.wait [#allocation3], 16 }
   0xd   :  { %2989 = vsyncadd [#allocation3], 4294967280 }
   0xe   :  { %16 = sfence }
   0xf   :  { %17 = vsyncpa [#allocation6], 0  ;;  %v3039_v0 = vld [vmem:[%s4225_s2 + $0xac] ss:$12 sps:$4 sm:$0xff]   ;;  %v3044_v1 = vld [vmem:[%s4225_s2 + $0xa8] ss:$12 sps:$4 sm:$0xff]  }
  0x10   :  { %v2995_v2 = vmov 0.0   ;;  %v2996_v3 = vmov 0   ;;  %219 = vmatprep.subr.bf16.mxu0 %v3039_v0  ;;  %v3052_v4 = vld [vmem:[%s4225_s2 + $0x94] ss:$12 sps:$4 sm:$0xff]   ;;  %vm2997_vm0 = vmmov 0  }
  0x11   :  { %2367 = vmatprep.subr.bf16.mxu1 %v2995_v2  ;;  %251 = vmatprep.mubr.bf16.mxu0 %v2996_v3  ;;  %v3060_v5 = vld [vmem:[%s4225_s2 + $0x90] ss:$12 sps:$4 sm:$0xff]   ;;  %v3072_v7 = vld [vmem:[%s4225_s2 + $0x78] ss:$12 sps:$4 sm:$0xff]   ;;  %v3083_v9 = vld [vmem:[%s4225_s2 + $0x60] ss:$12 sps:$4 sm:$0xff]  }
  0x12   :  { %2383 = vmatprep.mubr.msk.bf16.mxu1 %vm2997_vm0, %v2995_v2  ;;  %220 = vmatpush1.bf16.msra.mxu0 %v3044_v1  ;;  %v3066_v6 = vld [vmem:[%s4225_s2 + $0x7c] ss:$12 sps:$4 sm:$0xff]   ;;  %v3078_v8 = vld [vmem:[%s4225_s2 + $0x64] ss:$12 sps:$4 sm:$0xff]   ;;  %v3095_v11 = vld [vmem:[%s4225_s2 + $0x4c] ss:$12 sps:$4 sm:$0xff]  }
  0x13   :  { %221 = vmatprep.subr.bf16.mxu0 %v3052_v4  ;;  %v3089_v10 = vld [vmem:[%s4225_s2 + $0xb0] ss:$12 sps:$4 sm:$0xff]   ;;  %v3101_v12 = vld [vmem:[%s4225_s2 + $0x98] ss:$12 sps:$4 sm:$0xff]   ;;  %v3108_v13 = vld [vmem:[%s4225_s2 + $0x48] ss:$12 sps:$4 sm:$0xff]  }
  0x14   :  { %2368 = vmatpush3.bf16.msra.mxu1 %v3089_v10  ;;  %v3114_v14 = vld [vmem:[%s4225_s2 + $0x34] ss:$12 sps:$4 sm:$0xff]   ;;  %v3127_v16 = vld [vmem:[%s4225_s2 + $0x30] ss:$12 sps:$4 sm:$0xff]  }
  0x15   :  { %2369 = vmatprep.subr.bf16.mxu1 %v2995_v2  ;;  %v3120_v15 = vld [vmem:[%s4225_s2 + $0x80] ss:$12 sps:$4 sm:$0xff]  }
  0x16   :  { %222 = vmatpush1.bf16.msra.mxu0 %v3060_v5 }
  0x17   :  { %223 = vmatprep.subr.bf16.mxu0 %v3066_v6 }
  0x18   :  { %2370 = vmatpush3.bf16.msra.mxu1 %v3101_v12 }
  0x19   :  { %2371 = vmatprep.subr.bf16.mxu1 %v2995_v2 }
  0x1a   :  { %224 = vmatpush1.bf16.msra.mxu0 %v3072_v7 }
  0x1b   :  { %225 = vmatprep.subr.bf16.mxu0 %v3078_v8 }
  0x1e   :  { %226 = vmatpush1.bf16.msra.mxu0 %v3083_v9 }
  0x1f   :  { %227 = vmatprep.subr.bf16.mxu0 %v3095_v11 }
  0x22   :  { %228 = vmatpush1.bf16.msra.mxu0 %v3108_v13 }
  0x23   :  { %18 = vsyncpa [#allocation8], 0  ;;  %229 = vmatprep.subr.bf16.mxu0 %v3114_v14  ;;  %v3133_v17 = vld [vmem:[%s4225_s2 + $0x1c] ss:$12 sps:$4 sm:$0xff]   ;;  %2372 = vmatpush3.bf16.msra.mxu1 %v3120_v15  ;;  %v3146_v19 = vld [vmem:[%s4225_s2 + $0x18] ss:$12 sps:$4 sm:$0xff]   ;;  %v65_v27 = vlaneseq }
  0x24   :  { %v3139_v18 = vld [vmem:[%s4225_s2 + $0x68] ss:$12 sps:$4 sm:$0xff]   ;;  %2373 = vmatprep.subr.bf16.mxu1 %v2995_v2  ;;  %v3152_v20 = vld [vmem:[%s4225_s2 + $0x4] ss:$12 sps:$4 sm:$0xff]   ;;  %v3165_v22 = vld [vmem:[%s4225_s2] ss:$12 sps:$4 sm:$0xff]  }
  0x25   :  { %v3158_v21 = vld [vmem:[%s4225_s2 + $0x50] ss:$12 sps:$4 sm:$0xff]   ;;  %v3172_v23 = vld [vmem:[%s4225_s2 + $0x38] ss:$12 sps:$4 sm:$0xff]   ;;  %v3181_v24 = vld [vmem:[%s4225_s2 + $0x20] ss:$12 sps:$4 sm:$0xff]  }
  0x26   :  { %230 = vmatpush1.bf16.msra.mxu0 %v3127_v16  ;;  %v2998_v25 = vmov 0.0|0.0   ;;  %v3191_v26 = vld [vmem:[%s4225_s2 + $0x8] ss:$12 sps:$4 sm:$0xff]   ;;  %v3228_v28 = vshrl.u32 %v65_v27, 7  ;;  %v64_v30 = vld [vmem:[%s4226_s3] sm:$0x7] }
  0x27   :  { %231 = vmatprep.subr.bf16.mxu0 %v3133_v17  ;;  %2374 = vmatpush3.bf16.msra.mxu1 %v3139_v18  ;;  %v69_v31 = vld [vmem:[%s4224_s1] sm:$0xff]  ;;  %v3250_v56 = vld [vmem:[%s4224_s1 + $0x8] ss:$12 sps:$4 sm:$0xff]   ;;  %s68_s24 = sld [smem:[#allocation4]]  ;;  %s2999_s17 = smov [#allocation5]  }
  0x28   :  { %2375 = vmatprep.subr.bf16.mxu1 %v2995_v2  ;;  %v78_v29 = vsub.s32 0, %v3228_v28  ;;  %v82_v33 = vsub.s32 1, %v3228_v28  ;;  %v71_v34 = vunpack.c.l.bf16 %v69_v31  ;;  %v72_v42 = vunpack.c.h.bf16 %v69_v31  ;;  %s2142_s26 = sld [smem:[#allocation4 + $0x1]]  ;;  %s2091_s18 = sshll.u32 %s2999_s17, 4  ;;  %s2092_s18 = int_to_ptr.vmem [resolvable:$true] %s2091_s18 }
  0x29   :  { %v86_v53 = vsub.s32 2, %v3228_v28  ;;  %v73_v59 = vunpack.c.l.bf16 %v3250_v56  ;;  %s2147_s6 = sld [smem:[#allocation4 + $0x2]]  ;;  %s2948_s21 = scalar_lea.vmem %s2092_s18, 2048 }
  0x2a   :  { %232 = vmatpush1.bf16.msra.mxu0 %v3146_v19  ;;  %v3237_v32 = vrot.slane %v64_v30, %v78_v29  ;;  %v3241_v37 = vrot.slane %v64_v30, %v82_v33  ;;  %s2152_s9 = sld [smem:[#allocation4 + $0x3]]  ;;  %p2949_p5 = scmp.ne.s32.totalorder %s2092_s18, %s2948_s21 }
  0x2b   :  { %233 = vmatprep.subr.bf16.mxu0 %v3152_v20  ;;  %2376 = vmatpush3.bf16.msra.mxu1 %v3158_v21  ;;  %v3245_v54 = vrot.slane %v64_v30, %v86_v53  ;;  %s2157_s14 = sld [smem:[#allocation4 + $0x4]]  ;;  %p2953_p6 = scmp.lt.s32.totalorder %s2092_s18, %s2092_s18 }
  0x2c   :  { %2377 = vmatprep.subr.bf16.mxu1 %v2995_v2  ;;  %s2162_s19 = sld [smem:[#allocation4 + $0x5]]  ;;  %p2954_p7 = scmp.lt.s32.totalorder %s2948_s21, %s2948_s21 }
  0x2d   :  { %s2167_s16 = sld [smem:[#allocation4 + $0x6]] }
  0x2e   :  { %234 = vmatpush1.bf16.msra.mxu0 %v3165_v22  ;;  %s2177_s23 = sld [smem:[#allocation4 + $0x8]]  ;;  %p2955_p8 = por %p2954_p7, %p2953_p6 }
  0x2f   :  { %335 = vmatprep.subr.bf16.mxu0 %v3039_v0  ;;  %2378 = vmatpush3.bf16.msra.mxu1 %v3172_v23  ;;  %s2182_s25 = sld [smem:[#allocation4 + $0x9]] }
  0x30   :  { %2379 = vmatprep.subr.bf16.mxu1 %v2995_v2  ;;  %s2187_s30 = sld [smem:[#allocation4 + $0xa]]  ;;  %p2956_p9 = pnand %p2955_p8, %p2949_p5 }
  0x31   :  { %252 = vmatmul.mubr.bf16.vlgmr.msra.gmra.mxu0 %v2998_v25  ;;  %s2192_s8 = sld [smem:[#allocation4 + $0xb]] }
  0x32   :  { %336 = vmatpush1.bf16.msra.mxu0 %v3044_v1  ;;  %367 = vmatprep.mubr.bf16.mxu0 %v2996_v3  ;;  %s2197_s15 = sld [smem:[#allocation4 + $0xc]] }
  0x33   :  { %337 = vmatprep.subr.bf16.mxu0 %v3052_v4  ;;  %2380 = vmatpush3.bf16.msra.mxu1 %v3181_v24 }
  0x34   :  { %2381 = vmatprep.subr.bf16.mxu1 %v2995_v2 }
  0x36   :  { %338 = vmatpush1.bf16.msra.mxu0 %v3060_v5 }
  0x37   :  { %339 = vmatprep.subr.bf16.mxu0 %v3066_v6  ;;  %2382 = vmatpush3.bf16.msra.mxu1 %v3191_v26 }
  0x38   :  { %2387 = vmatprep.subr.bf16.mxu1 %v2995_v2 }
  0x3a   :  { %340 = vmatpush1.bf16.msra.mxu0 %v3072_v7  ;;  %2384 = vmatmul.mubr.bf16.vlgmr.msra.gmra.mxu1 %v2998_v25  ;;  %v321_v25 = vstv %s68_s24 }
  0x3b   :  { %341 = vmatprep.subr.bf16.mxu0 %v3078_v8  ;;  %2388 = vmatpush3.bf16.msra.mxu1 %v3089_v10  ;;  %vm322_vm1 = vcmp.lt.s32.totalorder %v3228_v28, %v321_v25 }
  0x3c   :  { %2403 = vmatprep.mubr.msk.bf16.mxu1 %vm2997_vm0, %v2995_v2  ;;  %2389 = vmatprep.subr.bf16.mxu1 %v2995_v2  ;;  %vm2217_vm2 = vmpackc.low %vm322_vm1, %vm322_vm1 }
  0x3e   :  { %342 = vmatpush1.bf16.msra.mxu0 %v3083_v9 }
  0x3f   :  { %343 = vmatprep.subr.bf16.mxu0 %v3095_v11  ;;  %2390 = vmatpush3.bf16.msra.mxu1 %v3101_v12 }
  0x40   :  { %2391 = vmatprep.subr.bf16.mxu1 %v2995_v2 }
  0x42   :  { %344 = vmatpush1.bf16.msra.mxu0 %v3108_v13 }
  0x43   :  { %345 = vmatprep.subr.bf16.mxu0 %v3114_v14  ;;  %2392 = vmatpush3.bf16.msra.mxu1 %v3120_v15 }
  0x44   :  { %2393 = vmatprep.subr.bf16.mxu1 %v2995_v2 }
  0x46   :  { %346 = vmatpush1.bf16.msra.mxu0 %v3127_v16 }
  0x47   :  { %347 = vmatprep.subr.bf16.mxu0 %v3133_v17  ;;  %2394 = vmatpush3.bf16.msra.mxu1 %v3139_v18 }
  0x48   :  { %2395 = vmatprep.subr.bf16.mxu1 %v2995_v2 }
  0x4a   :  { %348 = vmatpush1.bf16.msra.mxu0 %v3146_v19 }
  0x4b   :  { %349 = vmatprep.subr.bf16.mxu0 %v3152_v20  ;;  %2396 = vmatpush3.bf16.msra.mxu1 %v3158_v21 }
  0x4c   :  { %2397 = vmatprep.subr.bf16.mxu1 %v2995_v2 }
  0x4e   :  { %350 = vmatpush1.bf16.msra.mxu0 %v3165_v22 }
  0x4f   :  { %452 = vmatprep.subr.bf16.mxu0 %v3039_v0  ;;  %2398 = vmatpush3.bf16.msra.mxu1 %v3172_v23 }
  0x50   :  { %2399 = vmatprep.subr.bf16.mxu1 %v2995_v2 }
  0x53   :  { %2400 = vmatpush3.bf16.msra.mxu1 %v3181_v24 }
  0x54   :  { %2401 = vmatprep.subr.bf16.mxu1 %v2995_v2 }
  0x57   :  { %2402 = vmatpush3.bf16.msra.mxu1 %v3191_v26 }
  0x58   :  { %2407 = vmatprep.subr.bf16.mxu1 %v2995_v2 }
  0xf1   :  { %v253_v35 = vpop.f32.mrf.mxu0 }
  0xf2   :  { %v254_v36 = vadd.f32 %v253_v35, %v3237_v32 }
  0xf3   :  { %v255_v38 = vpop.f32.mrf.mxu0 }
  0xf4   :  { %v300_v39 = vadd.f32 %v254_v36, %v71_v34  ;;  %v256_v43 = vadd.f32 %v255_v38, %v3241_v37  ;;  %v2143_v36 = vld [vmem:[%s4224_s1 + $0xc] sm:$0xff] }
  0xf5   :  { %v257_v40 = vpop.f32.mrf.mxu0  ;;  %v331_v38 = vunpack.c.l.bf16 %v2143_v36 }
  0xf6   :  { %v2140_v41 = vmul.f32 -1.442695, %v300_v39  ;;  %v307_v45 = vadd.f32 %v256_v43, %v72_v42 }
  0xf7   :  { %v258_v44 = vpop.f32.mrf.mxu0 }
  0xf8   :  { %2728 = vpow2.f32 %v2140_v41  ;;  %v2141_v48 = vmul.f32 -1.442695, %v307_v45 }
  0xfa   :  { %v294_v46 = vpop.f32.mrf.mxu1  ;;  %2730 = vpow2.f32 %v2141_v48  ;;  %v332_v48 = vunpack.c.h.bf16 %v2143_v36 }
  0xfb   :  { %v295_v58 = vadd.f32 %v294_v46, %v3245_v54 }
  0xfc   :  { %v2385_v47 = vpop.f32.mrf.mxu1 }
  0xfe   :  { %v297_v49 = vpop.f32.mrf.mxu1 }
 0x100   :  { %v2386_v50 = vpop.f32.mrf.mxu1 }
 0x105   :  { %v2729_v51 = vpop.eup %2728 }
 0x106   :  { %v304_v52 = vadd.f32 1.0, %v2729_v51 }
 0x107   :  { %v2731_v55 = vpop.eup %2730 }
 0x108   :  { %2732 = vrcp.f32 %v304_v52  ;;  %v311_v57 = vadd.f32 1.0, %v2731_v55 }
 0x10a   :  { %2734 = vrcp.f32 %v311_v57 }
 0x115   :  { %v2733_v60 = vpop.eup %2732 }
 0x116   :  { %v314_v61 = vmul.f32 %v2733_v60, %v295_v58  ;;  %v333_v60 = vunpack.c.h.bf16 %v3250_v56 }
 0x117   :  { %v2735_v63 = vpop.eup %2734 }
 0x118   :  { %v315_v62 = vadd.f32 %v314_v61, %v73_v59  ;;  %v317_v27 = vsub.f32 1.0, %v2735_v63  ;;  %v319_v31 = vmul.f32 0.0, %v2735_v63 }
 0x11a   :  { %2736 = vtanh.f32 %v315_v62 }
 0x127   :  { %v2737_v29 = vpop.eup %2736 }
 0x128   :  { %v318_v30 = vmul.f32 %v2737_v29, %v317_v27 }
 0x12a   :  { %v320_v33 = vadd.f32 %v319_v31, %v318_v30  ;;  %v437_v30 = vstv %s2142_s26 }
 0x12b   :  { %vm438_vm3 = vcmp.lt.s32.totalorder %v3228_v28, %v437_v30 }
 0x12c   :  { %v3255_v34 = vsel %vm322_vm1, %v320_v33, 0.0  ;;  %v2218_v35 = vpack.c.bf16 %v320_v33, %v320_v33 }
 0x12d   :  { %325 = vst [vmem:[#allocation5] sm:$0xff] %v3255_v34 }
 0x12e   :  { %2219 = vmatmul.mubr.msk.bf16.vlgmr.msra.gmra.mxu0 %vm2217_vm2, %v2218_v35  ;;  %2404 = vmatmul.mubr.msk.bf16.vlgmr.msra.gmra.mxu1 %vm2217_vm2, %v2218_v35 }
 0x12f   :  { %453 = vmatpush1.bf16.msra.mxu0 %v3044_v1  ;;  %2408 = vmatpush3.bf16.msra.mxu1 %v3089_v10 }
 0x130   :  { %454 = vmatprep.subr.bf16.mxu0 %v3052_v4  ;;  %2409 = vmatprep.subr.bf16.mxu1 %v2995_v2 }
 0x131   :  { %484 = vmatprep.mubr.bf16.mxu0 %v2996_v3  ;;  %2423 = vmatprep.mubr.msk.bf16.mxu1 %vm2997_vm0, %v2995_v2 }
 0x133   :  { %455 = vmatpush1.bf16.msra.mxu0 %v3060_v5  ;;  %2410 = vmatpush3.bf16.msra.mxu1 %v3101_v12 }
 0x134   :  { %456 = vmatprep.subr.bf16.mxu0 %v3066_v6  ;;  %2411 = vmatprep.subr.bf16.mxu1 %v2995_v2 }
 0x137   :  { %457 = vmatpush1.bf16.msra.mxu0 %v3072_v7  ;;  %2412 = vmatpush3.bf16.msra.mxu1 %v3120_v15 }
 0x138   :  { %458 = vmatprep.subr.bf16.mxu0 %v3078_v8  ;;  %2413 = vmatprep.subr.bf16.mxu1 %v2995_v2 }
 0x13b   :  { %459 = vmatpush1.bf16.msra.mxu0 %v3083_v9  ;;  %2414 = vmatpush3.bf16.msra.mxu1 %v3139_v18 }
 0x13c   :  { %460 = vmatprep.subr.bf16.mxu0 %v3095_v11  ;;  %2415 = vmatprep.subr.bf16.mxu1 %v2995_v2 }
 0x13f   :  { %461 = vmatpush1.bf16.msra.mxu0 %v3108_v13  ;;  %2416 = vmatpush3.bf16.msra.mxu1 %v3158_v21 }
 0x140   :  { %462 = vmatprep.subr.bf16.mxu0 %v3114_v14  ;;  %2417 = vmatprep.subr.bf16.mxu1 %v2995_v2 }
 0x143   :  { %463 = vmatpush1.bf16.msra.mxu0 %v3127_v16  ;;  %2418 = vmatpush3.bf16.msra.mxu1 %v3172_v23 }
 0x144   :  { %464 = vmatprep.subr.bf16.mxu0 %v3133_v17  ;;  %2419 = vmatprep.subr.bf16.mxu1 %v2995_v2 }
 0x147   :  { %465 = vmatpush1.bf16.msra.mxu0 %v3146_v19  ;;  %2420 = vmatpush3.bf16.msra.mxu1 %v3181_v24 }
 0x148   :  { %466 = vmatprep.subr.bf16.mxu0 %v3152_v20  ;;  %2421 = vmatprep.subr.bf16.mxu1 %v2995_v2 }
 0x14b   :  { %467 = vmatpush1.bf16.msra.mxu0 %v3165_v22  ;;  %2422 = vmatpush3.bf16.msra.mxu1 %v3191_v26 }
 0x14c   :  { %569 = vmatprep.subr.bf16.mxu0 %v3039_v0  ;;  %2427 = vmatprep.subr.bf16.mxu1 %v2995_v2 }
 0x1ee   :  { %v369_v39 = vpop.f32.mrf.mxu0  ;;  %v410_v40 = vpop.f32.mrf.mxu1 }
 0x1ef   :  { %v370_v41 = vadd.f32 %v369_v39, %v3237_v32  ;;  %v411_v61 = vadd.f32 %v410_v40, %v3245_v54 }
 0x1f0   :  { %v371_v42 = vpop.f32.mrf.mxu0  ;;  %v2405_v43 = vpop.f32.mrf.mxu1 }
 0x1f1   :  { %v416_v44 = vadd.f32 %v370_v41, %v331_v38  ;;  %v372_v49 = vadd.f32 %v371_v42, %v3241_v37 }
 0x1f2   :  { %v373_v45 = vpop.f32.mrf.mxu0  ;;  %v413_v46 = vpop.f32.mrf.mxu1 }
 0x1f3   :  { %v2145_v47 = vmul.f32 -1.442695, %v416_v44  ;;  %v423_v52 = vadd.f32 %v372_v49, %v332_v48 }
 0x1f4   :  { %v374_v50 = vpop.f32.mrf.mxu0  ;;  %v2406_v51 = vpop.f32.mrf.mxu1 }
 0x1f5   :  { %2738 = vpow2.f32 %v2145_v47  ;;  %v2146_v53 = vmul.f32 -1.442695, %v423_v52 }
 0x1f7   :  { %2740 = vpow2.f32 %v2146_v53 }
 0x202   :  { %v2739_v55 = vpop.eup %2738 }
 0x203   :  { %v420_v57 = vadd.f32 1.0, %v2739_v55 }
 0x204   :  { %v2741_v58 = vpop.eup %2740 }
 0x205   :  { %2742 = vrcp.f32 %v420_v57  ;;  %v427_v59 = vadd.f32 1.0, %v2741_v58 }
 0x207   :  { %2744 = vrcp.f32 %v427_v59 }
 0x212   :  { %v2743_v62 = vpop.eup %2742 }
 0x213   :  { %v430_v63 = vmul.f32 %v2743_v62, %v411_v61  ;;  %v3350_v61 = vld [vmem:[%s4224_s1 + $0x20] ss:$12 sps:$4 sm:$0xff]  }
 0x214   :  { %v2745_v27 = vpop.eup %2744 }
 0x215   :  { %v431_v25 = vadd.f32 %v430_v63, %v333_v60  ;;  %v433_v29 = vsub.f32 1.0, %v2745_v27  ;;  %v435_v35 = vmul.f32 %v2745_v27, %v3255_v34  ;;  %v450_v63 = vunpack.c.l.bf16 %v3350_v61 }
 0x217   :  { %2746 = vtanh.f32 %v431_v25 }
 0x224   :  { %v2747_v31 = vpop.eup %2746 }
 0x225   :  { %v434_v33 = vmul.f32 %v2747_v31, %v433_v29 }
 0x227   :  { %v436_v36 = vadd.f32 %v435_v35, %v434_v33  ;;  %v554_v35 = vstv %s2147_s6 }
 0x228   :  { %vm555_vm4 = vcmp.lt.s32.totalorder %v3228_v28, %v554_v35 }
 0x229   :  { %v3303_v56 = vsel %vm438_vm3, %v436_v36, %v3255_v34  ;;  %v440_v38 = vsel %vm438_vm3, %v436_v36, 0.0  ;;  %v2148_v34 = vld [vmem:[%s4224_s1 + $0x18] sm:$0xff] }
 0x22a   :  { %442 = vst [vmem:[#allocation5 + $0x8] sm:$0xff] %v440_v38  ;;  %v451_v39 = vpack.c.bf16 %v3303_v56, %v3303_v56  ;;  %v448_v40 = vunpack.c.l.bf16 %v2148_v34  ;;  %v449_v50 = vunpack.c.h.bf16 %v2148_v34 }
 0x22c   :  { %485 = vmatmul.mubr.bf16.vlgmr.msra.gmra.mxu0 %v451_v39  ;;  %2424 = vmatmul.mubr.bf16.vlgmr.msra.gmra.mxu1 %v451_v39 }
 0x22d   :  { %570 = vmatpush1.bf16.msra.mxu0 %v3044_v1  ;;  %2428 = vmatpush3.bf16.msra.mxu1 %v3089_v10 }
 0x22e   :  { %571 = vmatprep.subr.bf16.mxu0 %v3052_v4  ;;  %2429 = vmatprep.subr.bf16.mxu1 %v2995_v2 }
 0x22f   :  { %601 = vmatprep.mubr.bf16.mxu0 %v2996_v3  ;;  %2443 = vmatprep.mubr.msk.bf16.mxu1 %vm2997_vm0, %v2995_v2 }
 0x231   :  { %572 = vmatpush1.bf16.msra.mxu0 %v3060_v5  ;;  %2430 = vmatpush3.bf16.msra.mxu1 %v3101_v12 }
 0x232   :  { %573 = vmatprep.subr.bf16.mxu0 %v3066_v6  ;;  %2431 = vmatprep.subr.bf16.mxu1 %v2995_v2 }
 0x235   :  { %574 = vmatpush1.bf16.msra.mxu0 %v3072_v7  ;;  %2432 = vmatpush3.bf16.msra.mxu1 %v3120_v15 }
 0x236   :  { %575 = vmatprep.subr.bf16.mxu0 %v3078_v8  ;;  %2433 = vmatprep.subr.bf16.mxu1 %v2995_v2 }
 0x239   :  { %576 = vmatpush1.bf16.msra.mxu0 %v3083_v9  ;;  %2434 = vmatpush3.bf16.msra.mxu1 %v3139_v18 }
 0x23a   :  { %577 = vmatprep.subr.bf16.mxu0 %v3095_v11  ;;  %2435 = vmatprep.subr.bf16.mxu1 %v2995_v2 }
 0x23d   :  { %578 = vmatpush1.bf16.msra.mxu0 %v3108_v13  ;;  %2436 = vmatpush3.bf16.msra.mxu1 %v3158_v21 }
 0x23e   :  { %579 = vmatprep.subr.bf16.mxu0 %v3114_v14  ;;  %2437 = vmatprep.subr.bf16.mxu1 %v2995_v2 }
 0x241   :  { %580 = vmatpush1.bf16.msra.mxu0 %v3127_v16  ;;  %2438 = vmatpush3.bf16.msra.mxu1 %v3172_v23 }
 0x242   :  { %581 = vmatprep.subr.bf16.mxu0 %v3133_v17  ;;  %2439 = vmatprep.subr.bf16.mxu1 %v2995_v2 }
 0x245   :  { %582 = vmatpush1.bf16.msra.mxu0 %v3146_v19  ;;  %2440 = vmatpush3.bf16.msra.mxu1 %v3181_v24 }
 0x246   :  { %583 = vmatprep.subr.bf16.mxu0 %v3152_v20  ;;  %2441 = vmatprep.subr.bf16.mxu1 %v2995_v2 }
 0x249   :  { %584 = vmatpush1.bf16.msra.mxu0 %v3165_v22  ;;  %2442 = vmatpush3.bf16.msra.mxu1 %v3191_v26 }
 0x24a   :  { %686 = vmatprep.subr.bf16.mxu0 %v3039_v0  ;;  %2447 = vmatprep.subr.bf16.mxu1 %v2995_v2 }
 0x2ec   :  { %v486_v41 = vpop.f32.mrf.mxu0  ;;  %v527_v42 = vpop.f32.mrf.mxu1 }
 0x2ed   :  { %v487_v43 = vadd.f32 %v486_v41, %v3237_v32  ;;  %v528_v25 = vadd.f32 %v527_v42, %v3245_v54 }
 0x2ee   :  { %v488_v44 = vpop.f32.mrf.mxu0  ;;  %v2425_v45 = vpop.f32.mrf.mxu1 }
 0x2ef   :  { %v533_v46 = vadd.f32 %v487_v43, %v448_v40  ;;  %v489_v51 = vadd.f32 %v488_v44, %v3241_v37 }
 0x2f0   :  { %v490_v47 = vpop.f32.mrf.mxu0  ;;  %v530_v48 = vpop.f32.mrf.mxu1 }
 0x2f1   :  { %v2150_v49 = vmul.f32 -1.442695, %v533_v46  ;;  %v540_v55 = vadd.f32 %v489_v51, %v449_v50 }
 0x2f2   :  { %v491_v52 = vpop.f32.mrf.mxu0  ;;  %v2426_v53 = vpop.f32.mrf.mxu1 }
 0x2f3   :  { %2748 = vpow2.f32 %v2150_v49  ;;  %v2151_v57 = vmul.f32 -1.442695, %v540_v55 }
 0x2f5   :  { %2750 = vpow2.f32 %v2151_v57 }
 0x300   :  { %v2749_v58 = vpop.eup %2748 }
 0x301   :  { %v537_v59 = vadd.f32 1.0, %v2749_v58 }
 0x302   :  { %v2751_v60 = vpop.eup %2750 }
 0x303   :  { %2752 = vrcp.f32 %v537_v59  ;;  %v544_v62 = vadd.f32 1.0, %v2751_v60 }
 0x305   :  { %2754 = vrcp.f32 %v544_v62 }
 0x310   :  { %v2753_v27 = vpop.eup %2752 }
 0x311   :  { %v547_v29 = vmul.f32 %v2753_v27, %v528_v25 }
 0x312   :  { %v2755_v31 = vpop.eup %2754 }
 0x313   :  { %v548_v30 = vadd.f32 %v547_v29, %v450_v63  ;;  %v550_v33 = vsub.f32 1.0, %v2755_v31  ;;  %v552_v39 = vmul.f32 %v2755_v31, %v3303_v56  ;;  %v567_v29 = vunpack.c.h.bf16 %v3350_v61 }
 0x315   :  { %2756 = vtanh.f32 %v548_v30 }
 0x322   :  { %v2757_v36 = vpop.eup %2756 }
 0x323   :  { %v551_v38 = vmul.f32 %v2757_v36, %v550_v33 }
 0x325   :  { %v553_v34 = vadd.f32 %v552_v39, %v551_v38  ;;  %v671_v39 = vstv %s2152_s9 }
 0x326   :  { %vm672_vm5 = vcmp.lt.s32.totalorder %v3228_v28, %v671_v39 }
 0x327   :  { %v3357_v40 = vsel %vm555_vm4, %v553_v34, %v3303_v56  ;;  %v557_v41 = vsel %vm555_vm4, %v553_v34, 0.0  ;;  %v2153_v56 = vld [vmem:[%s4224_s1 + $0x24] sm:$0xff] }
 0x328   :  { %559 = vst [vmem:[#allocation5 + $0x10] sm:$0xff] %v557_v41  ;;  %v568_v42 = vpack.c.bf16 %v3357_v40, %v3357_v40  ;;  %v565_v43 = vunpack.c.l.bf16 %v2153_v56  ;;  %v566_v53 = vunpack.c.h.bf16 %v2153_v56 }
 0x32a   :  { %602 = vmatmul.mubr.bf16.vlgmr.msra.gmra.mxu0 %v568_v42  ;;  %2444 = vmatmul.mubr.bf16.vlgmr.msra.gmra.mxu1 %v568_v42 }
 0x32b   :  { %687 = vmatpush1.bf16.msra.mxu0 %v3044_v1  ;;  %2448 = vmatpush3.bf16.msra.mxu1 %v3089_v10 }
 0x32c   :  { %688 = vmatprep.subr.bf16.mxu0 %v3052_v4  ;;  %2449 = vmatprep.subr.bf16.mxu1 %v2995_v2 }
 0x32d   :  { %718 = vmatprep.mubr.bf16.mxu0 %v2996_v3  ;;  %2463 = vmatprep.mubr.msk.bf16.mxu1 %vm2997_vm0, %v2995_v2 }
 0x32f   :  { %689 = vmatpush1.bf16.msra.mxu0 %v3060_v5  ;;  %2450 = vmatpush3.bf16.msra.mxu1 %v3101_v12 }
 0x330   :  { %690 = vmatprep.subr.bf16.mxu0 %v3066_v6  ;;  %2451 = vmatprep.subr.bf16.mxu1 %v2995_v2 }
 0x333   :  { %691 = vmatpush1.bf16.msra.mxu0 %v3072_v7  ;;  %2452 = vmatpush3.bf16.msra.mxu1 %v3120_v15 }
 0x334   :  { %692 = vmatprep.subr.bf16.mxu0 %v3078_v8  ;;  %2453 = vmatprep.subr.bf16.mxu1 %v2995_v2 }
 0x337   :  { %693 = vmatpush1.bf16.msra.mxu0 %v3083_v9  ;;  %2454 = vmatpush3.bf16.msra.mxu1 %v3139_v18 }
 0x338   :  { %694 = vmatprep.subr.bf16.mxu0 %v3095_v11  ;;  %2455 = vmatprep.subr.bf16.mxu1 %v2995_v2 }
 0x33b   :  { %695 = vmatpush1.bf16.msra.mxu0 %v3108_v13  ;;  %2456 = vmatpush3.bf16.msra.mxu1 %v3158_v21 }
 0x33c   :  { %696 = vmatprep.subr.bf16.mxu0 %v3114_v14  ;;  %2457 = vmatprep.subr.bf16.mxu1 %v2995_v2 }
 0x33f   :  { %697 = vmatpush1.bf16.msra.mxu0 %v3127_v16  ;;  %2458 = vmatpush3.bf16.msra.mxu1 %v3172_v23 }
 0x340   :  { %698 = vmatprep.subr.bf16.mxu0 %v3133_v17  ;;  %2459 = vmatprep.subr.bf16.mxu1 %v2995_v2 }
 0x343   :  { %699 = vmatpush1.bf16.msra.mxu0 %v3146_v19  ;;  %2460 = vmatpush3.bf16.msra.mxu1 %v3181_v24 }
 0x344   :  { %700 = vmatprep.subr.bf16.mxu0 %v3152_v20  ;;  %2461 = vmatprep.subr.bf16.mxu1 %v2995_v2 }
 0x347   :  { %701 = vmatpush1.bf16.msra.mxu0 %v3165_v22  ;;  %2462 = vmatpush3.bf16.msra.mxu1 %v3191_v26 }
 0x348   :  { %803 = vmatprep.subr.bf16.mxu0 %v3039_v0  ;;  %2467 = vmatprep.subr.bf16.mxu1 %v2995_v2 }
 0x3ea   :  { %v603_v44 = vpop.f32.mrf.mxu0  ;;  %v644_v45 = vpop.f32.mrf.mxu1 }
 0x3eb   :  { %v604_v46 = vadd.f32 %v603_v44, %v3237_v32  ;;  %v645_v30 = vadd.f32 %v644_v45, %v3245_v54 }
 0x3ec   :  { %v605_v47 = vpop.f32.mrf.mxu0  ;;  %v2445_v48 = vpop.f32.mrf.mxu1 }
 0x3ed   :  { %v650_v49 = vadd.f32 %v604_v46, %v565_v43  ;;  %v606_v55 = vadd.f32 %v605_v47, %v3241_v37 }
 0x3ee   :  { %v607_v50 = vpop.f32.mrf.mxu0  ;;  %v647_v51 = vpop.f32.mrf.mxu1 }
 0x3ef   :  { %v2155_v52 = vmul.f32 -1.442695, %v650_v49  ;;  %v657_v59 = vadd.f32 %v606_v55, %v566_v53 }
 0x3f0   :  { %v608_v57 = vpop.f32.mrf.mxu0  ;;  %v2446_v58 = vpop.f32.mrf.mxu1 }
 0x3f1   :  { %2758 = vpow2.f32 %v2155_v52  ;;  %v2156_v60 = vmul.f32 -1.442695, %v657_v59 }
 0x3f3   :  { %2760 = vpow2.f32 %v2156_v60 }
 0x3fe   :  { %v2759_v62 = vpop.eup %2758 }
 0x3ff   :  { %v654_v63 = vadd.f32 1.0, %v2759_v62 }
 0x400   :  { %v2761_v25 = vpop.eup %2760 }
 0x401   :  { %2762 = vrcp.f32 %v654_v63  ;;  %v661_v27 = vadd.f32 1.0, %v2761_v25 }
 0x403   :  { %2764 = vrcp.f32 %v661_v27 }
 0x40e   :  { %v2763_v31 = vpop.eup %2762 }
 0x40f   :  { %v664_v33 = vmul.f32 %v2763_v31, %v645_v30 }
 0x410   :  { %v2765_v36 = vpop.eup %2764 }
 0x411   :  { %v665_v35 = vadd.f32 %v664_v33, %v567_v29  ;;  %v667_v38 = vsub.f32 1.0, %v2765_v36  ;;  %v669_v42 = vmul.f32 %v2765_v36, %v3357_v40  ;;  %v3453_v29 = vld [vmem:[%s4224_s1 + $0x38] ss:$12 sps:$4 sm:$0xff]  }
 0x412   :  { %v684_v31 = vunpack.c.l.bf16 %v3453_v29 }
 0x413   :  { %2766 = vtanh.f32 %v665_v35 }
 0x420   :  { %v2767_v34 = vpop.eup %2766 }
 0x421   :  { %v668_v41 = vmul.f32 %v2767_v34, %v667_v38 }
 0x423   :  { %v670_v56 = vadd.f32 %v669_v42, %v668_v41  ;;  %v788_v41 = vstv %s2157_s14  ;;  %s2207_s14 = sld [smem:[#allocation4 + $0xe]] }
 0x424   :  { %vm789_vm6 = vcmp.lt.s32.totalorder %v3228_v28, %v788_v41  ;;  %v3606_v41 = vld [vmem:[%s4225_s2 + $0x50] ss:$12 sps:$4 sm:$0xff]  }
 0x425   :  { %v3406_v61 = vsel %vm672_vm5, %v670_v56, %v3357_v40  ;;  %v674_v43 = vsel %vm672_vm5, %v670_v56, 0.0  ;;  %v2158_v40 = vld [vmem:[%s4224_s1 + $0x30] sm:$0xff] }
 0x426   :  { %676 = vst [vmem:[#allocation5 + $0x18] sm:$0xff] %v674_v43  ;;  %v685_v44 = vpack.c.bf16 %v3406_v61, %v3406_v61  ;;  %v682_v45 = vunpack.c.l.bf16 %v2158_v40  ;;  %v683_v57 = vunpack.c.h.bf16 %v2158_v40 }
 0x428   :  { %719 = vmatmul.mubr.bf16.vlgmr.msra.gmra.mxu0 %v685_v44  ;;  %2464 = vmatmul.mubr.bf16.vlgmr.msra.gmra.mxu1 %v685_v44 }
 0x429   :  { %804 = vmatpush1.bf16.msra.mxu0 %v3044_v1  ;;  %2468 = vmatpush3.bf16.msra.mxu1 %v3089_v10 }
 0x42a   :  { %805 = vmatprep.subr.bf16.mxu0 %v3052_v4  ;;  %2469 = vmatprep.subr.bf16.mxu1 %v2995_v2 }
 0x42b   :  { %835 = vmatprep.mubr.bf16.mxu0 %v2996_v3  ;;  %2483 = vmatprep.mubr.msk.bf16.mxu1 %vm2997_vm0, %v2995_v2 }
 0x42d   :  { %806 = vmatpush1.bf16.msra.mxu0 %v3060_v5  ;;  %2470 = vmatpush3.bf16.msra.mxu1 %v3101_v12 }
 0x42e   :  { %807 = vmatprep.subr.bf16.mxu0 %v3066_v6  ;;  %2471 = vmatprep.subr.bf16.mxu1 %v2995_v2 }
 0x431   :  { %808 = vmatpush1.bf16.msra.mxu0 %v3072_v7  ;;  %2472 = vmatpush3.bf16.msra.mxu1 %v3120_v15 }
 0x432   :  { %809 = vmatprep.subr.bf16.mxu0 %v3078_v8  ;;  %2473 = vmatprep.subr.bf16.mxu1 %v2995_v2 }
 0x435   :  { %810 = vmatpush1.bf16.msra.mxu0 %v3083_v9  ;;  %2474 = vmatpush3.bf16.msra.mxu1 %v3139_v18 }
 0x436   :  { %811 = vmatprep.subr.bf16.mxu0 %v3095_v11  ;;  %2475 = vmatprep.subr.bf16.mxu1 %v2995_v2 }
 0x439   :  { %812 = vmatpush1.bf16.msra.mxu0 %v3108_v13  ;;  %2476 = vmatpush3.bf16.msra.mxu1 %v3158_v21 }
 0x43a   :  { %813 = vmatprep.subr.bf16.mxu0 %v3114_v14  ;;  %2477 = vmatprep.subr.bf16.mxu1 %v2995_v2 }
 0x43d   :  { %814 = vmatpush1.bf16.msra.mxu0 %v3127_v16  ;;  %2478 = vmatpush3.bf16.msra.mxu1 %v3172_v23 }
 0x43e   :  { %815 = vmatprep.subr.bf16.mxu0 %v3133_v17  ;;  %2479 = vmatprep.subr.bf16.mxu1 %v2995_v2 }
 0x441   :  { %816 = vmatpush1.bf16.msra.mxu0 %v3146_v19  ;;  %2480 = vmatpush3.bf16.msra.mxu1 %v3181_v24 }
 0x442   :  { %817 = vmatprep.subr.bf16.mxu0 %v3152_v20  ;;  %2481 = vmatprep.subr.bf16.mxu1 %v2995_v2 }
 0x445   :  { %818 = vmatpush1.bf16.msra.mxu0 %v3165_v22  ;;  %2482 = vmatpush3.bf16.msra.mxu1 %v3191_v26 }
 0x446   :  { %920 = vmatprep.subr.bf16.mxu0 %v3039_v0  ;;  %2487 = vmatprep.subr.bf16.mxu1 %v2995_v2 }
 0x4e8   :  { %v720_v46 = vpop.f32.mrf.mxu0  ;;  %v761_v47 = vpop.f32.mrf.mxu1 }
 0x4e9   :  { %v721_v48 = vadd.f32 %v720_v46, %v3237_v32  ;;  %v762_v33 = vadd.f32 %v761_v47, %v3245_v54 }
 0x4ea   :  { %v722_v49 = vpop.f32.mrf.mxu0  ;;  %v2465_v50 = vpop.f32.mrf.mxu1 }
 0x4eb   :  { %v767_v51 = vadd.f32 %v721_v48, %v682_v45  ;;  %v723_v0 = vadd.f32 %v722_v49, %v3241_v37 }
 0x4ec   :  { %v724_v52 = vpop.f32.mrf.mxu0  ;;  %v764_v53 = vpop.f32.mrf.mxu1 }
 0x4ed   :  { %v2160_v55 = vmul.f32 -1.442695, %v767_v51  ;;  %v774_v60 = vadd.f32 %v723_v0, %v683_v57  ;;  %v905_v52 = vstv %s2162_s19  ;;  %s2172_s19 = sld [smem:[#allocation4 + $0x7]] }
 0x4ee   :  { %v725_v58 = vpop.f32.mrf.mxu0  ;;  %v2466_v59 = vpop.f32.mrf.mxu1  ;;  %vm906_vm7 = vcmp.lt.s32.totalorder %v3228_v28, %v905_v52 }
 0x4ef   :  { %2768 = vpow2.f32 %v2160_v55  ;;  %v2161_v62 = vmul.f32 -1.442695, %v774_v60 }
 0x4f1   :  { %2770 = vpow2.f32 %v2161_v62  ;;  %v3521_v62 = vld [vmem:[%s4225_s2 + $0xa8] ss:$12 sps:$4 sm:$0xff]  }
 0x4fc   :  { %v2769_v63 = vpop.eup %2768 }
 0x4fd   :  { %v771_v25 = vadd.f32 1.0, %v2769_v63  ;;  %v3527_v63 = vld [vmem:[%s4225_s2 + $0xb0] ss:$12 sps:$4 sm:$0xff]  }
 0x4fe   :  { %v2771_v27 = vpop.eup %2770 }
 0x4ff   :  { %2772 = vrcp.f32 %v771_v25  ;;  %v778_v30 = vadd.f32 1.0, %v2771_v27  ;;  %v3533_v25 = vld [vmem:[%s4225_s2 + $0x94] ss:$12 sps:$4 sm:$0xff]   ;;  %v3543_v27 = vld [vmem:[%s4225_s2 + $0x90] ss:$12 sps:$4 sm:$0xff]  }
 0x501   :  { %2774 = vrcp.f32 %v778_v30  ;;  %v3555_v30 = vld [vmem:[%s4225_s2 + $0x7c] ss:$12 sps:$4 sm:$0xff]  }
 0x50c   :  { %v2773_v35 = vpop.eup %2772 }
 0x50d   :  { %v781_v36 = vmul.f32 %v2773_v35, %v762_v33  ;;  %v3568_v33 = vld [vmem:[%s4225_s2 + $0x80] ss:$12 sps:$4 sm:$0xff]   ;;  %v3574_v35 = vld [vmem:[%s4225_s2 + $0x64] ss:$12 sps:$4 sm:$0xff]  }
 0x50e   :  { %v2775_v39 = vpop.eup %2774 }
 0x50f   :  { %v782_v38 = vadd.f32 %v781_v36, %v684_v31  ;;  %v784_v34 = vsub.f32 1.0, %v2775_v39  ;;  %v786_v43 = vmul.f32 %v2775_v39, %v3406_v61  ;;  %v3562_v31 = vld [vmem:[%s4225_s2 + $0x78] ss:$12 sps:$4 sm:$0xff]   ;;  %v3581_v36 = vld [vmem:[%s4225_s2 + $0x60] ss:$12 sps:$4 sm:$0xff]  }
 0x510   :  { %v3593_v39 = vld [vmem:[%s4225_s2 + $0x4c] ss:$12 sps:$4 sm:$0xff]  }
 0x511   :  { %2776 = vtanh.f32 %v782_v38  ;;  %v3587_v38 = vld [vmem:[%s4225_s2 + $0x68] ss:$12 sps:$4 sm:$0xff]  }
 0x51e   :  { %v2777_v42 = vpop.eup %2776 }
 0x51f   :  { %v785_v56 = vmul.f32 %v2777_v42, %v784_v34  ;;  %v3600_v34 = vld [vmem:[%s4225_s2 + $0x48] ss:$12 sps:$4 sm:$0xff]  }
 0x520   :  { %v3612_v42 = vld [vmem:[%s4225_s2 + $0x34] ss:$12 sps:$4 sm:$0xff]  }
 0x521   :  { %v787_v44 = vadd.f32 %v786_v43, %v785_v56  ;;  %v3619_v56 = vld [vmem:[%s4225_s2 + $0x30] ss:$12 sps:$4 sm:$0xff]   ;;  %v3625_v43 = vld [vmem:[%s4225_s2 + $0x38] ss:$12 sps:$4 sm:$0xff]  }
 0x523   :  { %v3460_v40 = vsel %vm789_vm6, %v787_v44, %v3406_v61  ;;  %v791_v45 = vsel %vm789_vm6, %v787_v44, 0.0  ;;  %v3631_v44 = vld [vmem:[%s4225_s2 + $0x1c] ss:$12 sps:$4 sm:$0xff]  }
 0x524   :  { %793 = vst [vmem:[#allocation5 + $0x20] sm:$0xff] %v791_v45  ;;  %v802_v46 = vpack.c.bf16 %v3460_v40, %v3460_v40  ;;  %v3644_v45 = vld [vmem:[%s4225_s2 + $0x20] ss:$12 sps:$4 sm:$0xff]  }
 0x526   :  { %836 = vmatmul.mubr.bf16.vlgmr.msra.gmra.mxu0 %v802_v46  ;;  %2484 = vmatmul.mubr.bf16.vlgmr.msra.gmra.mxu1 %v802_v46  ;;  %v3650_v46 = vld [vmem:[%s4225_s2 + $0x4] ss:$12 sps:$4 sm:$0xff]  }
 0x527   :  { %921 = vmatpush1.bf16.msra.mxu0 %v3044_v1  ;;  %2488 = vmatpush3.bf16.msra.mxu1 %v3089_v10  ;;  %v3500_v1 = vld [vmem:[%s4225_s2 + $0xac] ss:$12 sps:$4 sm:$0xff]  }
 0x528   :  { %922 = vmatprep.subr.bf16.mxu0 %v3052_v4  ;;  %2489 = vmatprep.subr.bf16.mxu1 %v2995_v2  ;;  %v2163_v4 = vld [vmem:[%s4224_s1 + $0x3c] sm:$0xff] }
 0x529   :  { %952 = vmatprep.mubr.bf16.mxu0 %v2996_v3  ;;  %2503 = vmatprep.mubr.msk.bf16.mxu1 %vm2997_vm0, %v2995_v2 }
 0x52b   :  { %923 = vmatpush1.bf16.msra.mxu0 %v3060_v5  ;;  %2490 = vmatpush3.bf16.msra.mxu1 %v3101_v12  ;;  %v799_v5 = vunpack.c.l.bf16 %v2163_v4 }
 0x52c   :  { %924 = vmatprep.subr.bf16.mxu0 %v3066_v6  ;;  %2491 = vmatprep.subr.bf16.mxu1 %v2995_v2 }
 0x52f   :  { %925 = vmatpush1.bf16.msra.mxu0 %v3072_v7  ;;  %2492 = vmatpush3.bf16.msra.mxu1 %v3120_v15  ;;  %v800_v15 = vunpack.c.h.bf16 %v2163_v4  ;;  %v3657_v4 = vld [vmem:[%s4225_s2] ss:$12 sps:$4 sm:$0xff]  }
 0x530   :  { %926 = vmatprep.subr.bf16.mxu0 %v3078_v8  ;;  %2493 = vmatprep.subr.bf16.mxu1 %v2995_v2 }
 0x533   :  { %927 = vmatpush1.bf16.msra.mxu0 %v3083_v9  ;;  %2494 = vmatpush3.bf16.msra.mxu1 %v3139_v18 }
 0x534   :  { %928 = vmatprep.subr.bf16.mxu0 %v3095_v11  ;;  %2495 = vmatprep.subr.bf16.mxu1 %v2995_v2 }
 0x537   :  { %929 = vmatpush1.bf16.msra.mxu0 %v3108_v13  ;;  %2496 = vmatpush3.bf16.msra.mxu1 %v3158_v21 }
 0x538   :  { %930 = vmatprep.subr.bf16.mxu0 %v3114_v14  ;;  %2497 = vmatprep.subr.bf16.mxu1 %v2995_v2 }
 0x53b   :  { %931 = vmatpush1.bf16.msra.mxu0 %v3127_v16  ;;  %2498 = vmatpush3.bf16.msra.mxu1 %v3172_v23 }
 0x53c   :  { %932 = vmatprep.subr.bf16.mxu0 %v3133_v17  ;;  %2499 = vmatprep.subr.bf16.mxu1 %v2995_v2 }
 0x53f   :  { %933 = vmatpush1.bf16.msra.mxu0 %v3146_v19  ;;  %2500 = vmatpush3.bf16.msra.mxu1 %v3181_v24 }
 0x540   :  { %934 = vmatprep.subr.bf16.mxu0 %v3152_v20  ;;  %2501 = vmatprep.subr.bf16.mxu1 %v2995_v2 }
 0x543   :  { %935 = vmatpush1.bf16.msra.mxu0 %v3165_v22  ;;  %2502 = vmatpush3.bf16.msra.mxu1 %v3191_v26  ;;  %v801_v26 = vunpack.c.h.bf16 %v3453_v29  ;;  %v3549_v29 = vld [vmem:[%s4225_s2 + $0x98] ss:$12 sps:$4 sm:$0xff]  }
 0x544   :  { %1037 = vmatprep.subr.bf16.mxu0 %v3500_v1  ;;  %2507 = vmatprep.subr.bf16.mxu1 %v2995_v2 }
 0x5e6   :  { %v837_v6 = vpop.f32.mrf.mxu0  ;;  %v878_v7 = vpop.f32.mrf.mxu1 }
 0x5e7   :  { %v838_v8 = vadd.f32 %v837_v6, %v3237_v32  ;;  %v879_v61 = vadd.f32 %v878_v7, %v3245_v54  ;;  %v2168_v6 = vld [vmem:[%s4224_s1 + $0x48] sm:$0xff] }
 0x5e8   :  { %v839_v9 = vpop.f32.mrf.mxu0  ;;  %v2485_v10 = vpop.f32.mrf.mxu1  ;;  %v916_v7 = vunpack.c.l.bf16 %v2168_v6 }
 0x5e9   :  { %v884_v11 = vadd.f32 %v838_v8, %v799_v5  ;;  %v840_v16 = vadd.f32 %v839_v9, %v3241_v37  ;;  %v3663_v5 = vld [vmem:[%s4225_s2 + $0x8] ss:$12 sps:$4 sm:$0xff]  }
 0x5ea   :  { %v841_v12 = vpop.f32.mrf.mxu0  ;;  %v881_v13 = vpop.f32.mrf.mxu1 }
 0x5eb   :  { %v2165_v14 = vmul.f32 -1.442695, %v884_v11  ;;  %v891_v19 = vadd.f32 %v840_v16, %v800_v15 }
 0x5ec   :  { %v842_v17 = vpop.f32.mrf.mxu0  ;;  %v2486_v18 = vpop.f32.mrf.mxu1 }
 0x5ed   :  { %2778 = vpow2.f32 %v2165_v14  ;;  %v2166_v20 = vmul.f32 -1.442695, %v891_v19  ;;  %v917_v17 = vunpack.c.h.bf16 %v2168_v6 }
 0x5ef   :  { %2780 = vpow2.f32 %v2166_v20 }
 0x5fa   :  { %v2779_v21 = vpop.eup %2778 }
 0x5fb   :  { %v888_v22 = vadd.f32 1.0, %v2779_v21 }
 0x5fc   :  { %v2781_v23 = vpop.eup %2780 }
 0x5fd   :  { %2782 = vrcp.f32 %v888_v22  ;;  %v895_v24 = vadd.f32 1.0, %v2781_v23 }
 0x5ff   :  { %2784 = vrcp.f32 %v895_v24 }
 0x60a   :  { %v2783_v47 = vpop.eup %2782 }
 0x60b   :  { %v898_v48 = vmul.f32 %v2783_v47, %v879_v61  ;;  %v3676_v61 = vld [vmem:[%s4224_s1 + $0x50] ss:$12 sps:$4 sm:$0xff]  }
 0x60c   :  { %v2785_v50 = vpop.eup %2784 }
 0x60d   :  { %v899_v49 = vadd.f32 %v898_v48, %v801_v26  ;;  %v901_v51 = vsub.f32 1.0, %v2785_v50  ;;  %v903_v57 = vmul.f32 %v2785_v50, %v3460_v40  ;;  %v918_v48 = vunpack.c.l.bf16 %v3676_v61 }
 0x60f   :  { %2786 = vtanh.f32 %v899_v49 }
 0x61c   :  { %v2787_v53 = vpop.eup %2786 }
 0x61d   :  { %v902_v55 = vmul.f32 %v2787_v53, %v901_v51 }
 0x61f   :  { %v904_v0 = vadd.f32 %v903_v57, %v902_v55  ;;  %v1022_v57 = vstv %s2167_s16 }
 0x620   :  { %vm1023_vm8 = vcmp.lt.s32.totalorder %v3228_v28, %v1022_v57 }
 0x621   :  { %v3514_v58 = vsel %vm906_vm7, %v904_v0, %v3460_v40  ;;  %v908_v59 = vsel %vm906_vm7, %v904_v0, 0.0  ;;  %v3638_v40 = vld [vmem:[%s4225_s2 + $0x18] ss:$12 sps:$4 sm:$0xff]  }
 0x622   :  { %910 = vst [vmem:[#allocation5 + $0x28] sm:$0xff] %v908_v59  ;;  %v919_v60 = vpack.c.bf16 %v3514_v58, %v3514_v58 }
 0x624   :  { %953 = vmatmul.mubr.bf16.vlgmr.msra.gmra.mxu0 %v919_v60  ;;  %2504 = vmatmul.mubr.bf16.vlgmr.msra.gmra.mxu1 %v919_v60 }
 0x625   :  { %1038 = vmatpush1.bf16.msra.mxu0 %v3521_v62  ;;  %2508 = vmatpush3.bf16.msra.mxu1 %v3527_v63 }
 0x626   :  { %1039 = vmatprep.subr.bf16.mxu0 %v3533_v25  ;;  %2509 = vmatprep.subr.bf16.mxu1 %v2995_v2 }
 0x627   :  { %1069 = vmatprep.mubr.bf16.mxu0 %v2996_v3  ;;  %2523 = vmatprep.mubr.msk.bf16.mxu1 %vm2997_vm0, %v2995_v2 }
 0x629   :  { %1040 = vmatpush1.bf16.msra.mxu0 %v3543_v27  ;;  %2510 = vmatpush3.bf16.msra.mxu1 %v3549_v29 }
 0x62a   :  { %1041 = vmatprep.subr.bf16.mxu0 %v3555_v30  ;;  %2511 = vmatprep.subr.bf16.mxu1 %v2995_v2 }
 0x62d   :  { %1042 = vmatpush1.bf16.msra.mxu0 %v3562_v31  ;;  %2512 = vmatpush3.bf16.msra.mxu1 %v3568_v33 }
 0x62e   :  { %1043 = vmatprep.subr.bf16.mxu0 %v3574_v35  ;;  %2513 = vmatprep.subr.bf16.mxu1 %v2995_v2 }
 0x631   :  { %1044 = vmatpush1.bf16.msra.mxu0 %v3581_v36  ;;  %2514 = vmatpush3.bf16.msra.mxu1 %v3587_v38 }
 0x632   :  { %1045 = vmatprep.subr.bf16.mxu0 %v3593_v39  ;;  %2515 = vmatprep.subr.bf16.mxu1 %v2995_v2 }
 0x635   :  { %1046 = vmatpush1.bf16.msra.mxu0 %v3600_v34  ;;  %2516 = vmatpush3.bf16.msra.mxu1 %v3606_v41 }
 0x636   :  { %1047 = vmatprep.subr.bf16.mxu0 %v3612_v42  ;;  %2517 = vmatprep.subr.bf16.mxu1 %v2995_v2 }
 0x639   :  { %1048 = vmatpush1.bf16.msra.mxu0 %v3619_v56  ;;  %2518 = vmatpush3.bf16.msra.mxu1 %v3625_v43 }
 0x63a   :  { %1049 = vmatprep.subr.bf16.mxu0 %v3631_v44  ;;  %2519 = vmatprep.subr.bf16.mxu1 %v2995_v2 }
 0x63d   :  { %1050 = vmatpush1.bf16.msra.mxu0 %v3638_v40  ;;  %2520 = vmatpush3.bf16.msra.mxu1 %v3644_v45 }
 0x63e   :  { %1051 = vmatprep.subr.bf16.mxu0 %v3650_v46  ;;  %2521 = vmatprep.subr.bf16.mxu1 %v2995_v2 }
 0x641   :  { %1052 = vmatpush1.bf16.msra.mxu0 %v3657_v4  ;;  %2522 = vmatpush3.bf16.msra.mxu1 %v3663_v5 }
 0x642   :  { %1154 = vmatprep.subr.bf16.mxu0 %v3500_v1  ;;  %2527 = vmatprep.subr.bf16.mxu1 %v2995_v2 }
 0x6e4   :  { %v954_v8 = vpop.f32.mrf.mxu0  ;;  %v995_v9 = vpop.f32.mrf.mxu1 }
 0x6e5   :  { %v955_v10 = vadd.f32 %v954_v8, %v3237_v32  ;;  %v996_v49 = vadd.f32 %v995_v9, %v3245_v54 }
 0x6e6   :  { %v956_v11 = vpop.f32.mrf.mxu0  ;;  %v2505_v12 = vpop.f32.mrf.mxu1 }
 0x6e7   :  { %v1001_v13 = vadd.f32 %v955_v10, %v916_v7  ;;  %v957_v18 = vadd.f32 %v956_v11, %v3241_v37 }
 0x6e8   :  { %v958_v14 = vpop.f32.mrf.mxu0  ;;  %v998_v15 = vpop.f32.mrf.mxu1 }
 0x6e9   :  { %v2170_v16 = vmul.f32 -1.442695, %v1001_v13  ;;  %v1008_v21 = vadd.f32 %v957_v18, %v917_v17 }
 0x6ea   :  { %v959_v19 = vpop.f32.mrf.mxu0  ;;  %v2506_v20 = vpop.f32.mrf.mxu1 }
 0x6eb   :  { %2788 = vpow2.f32 %v2170_v16  ;;  %v2171_v22 = vmul.f32 -1.442695, %v1008_v21 }
 0x6ed   :  { %2790 = vpow2.f32 %v2171_v22 }
 0x6f8   :  { %v2789_v23 = vpop.eup %2788 }
 0x6f9   :  { %v1005_v24 = vadd.f32 1.0, %v2789_v23 }
 0x6fa   :  { %v2791_v26 = vpop.eup %2790 }
 0x6fb   :  { %2792 = vrcp.f32 %v1005_v24  ;;  %v1012_v47 = vadd.f32 1.0, %v2791_v26 }
 0x6fd   :  { %2794 = vrcp.f32 %v1012_v47 }
 0x708   :  { %v2793_v50 = vpop.eup %2792 }
 0x709   :  { %v1015_v51 = vmul.f32 %v2793_v50, %v996_v49 }
 0x70a   :  { %v2795_v53 = vpop.eup %2794 }
 0x70b   :  { %v1016_v52 = vadd.f32 %v1015_v51, %v918_v48  ;;  %v1018_v55 = vsub.f32 1.0, %v2795_v53  ;;  %v1020_v60 = vmul.f32 %v2795_v53, %v3514_v58  ;;  %v1035_v51 = vunpack.c.h.bf16 %v3676_v61 }
 0x70d   :  { %2796 = vtanh.f32 %v1016_v52 }
 0x71a   :  { %v2797_v0 = vpop.eup %2796 }
 0x71b   :  { %v1019_v59 = vmul.f32 %v2797_v0, %v1018_v55 }
 0x71d   :  { %v1021_v6 = vadd.f32 %v1020_v60, %v1019_v59  ;;  %v1139_v60 = vstv %s2172_s19  ;;  %s3000_s19 = smov [#allocation7]  }
 0x71e   :  { %vm1140_vm9 = vcmp.lt.s32.totalorder %v3228_v28, %v1139_v60  ;;  %s2104_s20 = sshll.u32 %s3000_s19, 4  ;;  %s2105_s20 = int_to_ptr.vmem [resolvable:$true] %s2104_s20 }
 0x71f   :  { %v3683_v7 = vsel %vm1023_vm8, %v1021_v6, %v3514_v58  ;;  %v1025_v8 = vsel %vm1023_vm8, %v1021_v6, 0.0  ;;  %v2173_v58 = vld [vmem:[%s4224_s1 + $0x54] sm:$0xff] }
 0x720   :  { %1027 = vst [vmem:[#allocation5 + $0x30] sm:$0xff] %v1025_v8  ;;  %v1036_v9 = vpack.c.bf16 %v3683_v7, %v3683_v7  ;;  %v1033_v10 = vunpack.c.l.bf16 %v2173_v58  ;;  %v1034_v20 = vunpack.c.h.bf16 %v2173_v58 }
 0x722   :  { %1070 = vmatmul.mubr.bf16.vlgmr.msra.gmra.mxu0 %v1036_v9  ;;  %2524 = vmatmul.mubr.bf16.vlgmr.msra.gmra.mxu1 %v1036_v9 }
 0x723   :  { %1155 = vmatpush1.bf16.msra.mxu0 %v3521_v62  ;;  %2528 = vmatpush3.bf16.msra.mxu1 %v3527_v63 }
 0x724   :  { %1156 = vmatprep.subr.bf16.mxu0 %v3533_v25  ;;  %2529 = vmatprep.subr.bf16.mxu1 %v2995_v2 }
 0x725   :  { %1186 = vmatprep.mubr.bf16.mxu0 %v2996_v3  ;;  %2543 = vmatprep.mubr.msk.bf16.mxu1 %vm2997_vm0, %v2995_v2 }
 0x727   :  { %1157 = vmatpush1.bf16.msra.mxu0 %v3543_v27  ;;  %2530 = vmatpush3.bf16.msra.mxu1 %v3549_v29 }
 0x728   :  { %1158 = vmatprep.subr.bf16.mxu0 %v3555_v30  ;;  %2531 = vmatprep.subr.bf16.mxu1 %v2995_v2 }
 0x72b   :  { %1159 = vmatpush1.bf16.msra.mxu0 %v3562_v31  ;;  %2532 = vmatpush3.bf16.msra.mxu1 %v3568_v33 }
 0x72c   :  { %1160 = vmatprep.subr.bf16.mxu0 %v3574_v35  ;;  %2533 = vmatprep.subr.bf16.mxu1 %v2995_v2 }
 0x72f   :  { %1161 = vmatpush1.bf16.msra.mxu0 %v3581_v36  ;;  %2534 = vmatpush3.bf16.msra.mxu1 %v3587_v38 }
 0x730   :  { %1162 = vmatprep.subr.bf16.mxu0 %v3593_v39  ;;  %2535 = vmatprep.subr.bf16.mxu1 %v2995_v2 }
 0x733   :  { %1163 = vmatpush1.bf16.msra.mxu0 %v3600_v34  ;;  %2536 = vmatpush3.bf16.msra.mxu1 %v3606_v41 }
 0x734   :  { %1164 = vmatprep.subr.bf16.mxu0 %v3612_v42  ;;  %2537 = vmatprep.subr.bf16.mxu1 %v2995_v2 }
 0x737   :  { %1165 = vmatpush1.bf16.msra.mxu0 %v3619_v56  ;;  %2538 = vmatpush3.bf16.msra.mxu1 %v3625_v43 }
 0x738   :  { %1166 = vmatprep.subr.bf16.mxu0 %v3631_v44  ;;  %2539 = vmatprep.subr.bf16.mxu1 %v2995_v2 }
 0x73b   :  { %1167 = vmatpush1.bf16.msra.mxu0 %v3638_v40  ;;  %2540 = vmatpush3.bf16.msra.mxu1 %v3644_v45 }
 0x73c   :  { %1168 = vmatprep.subr.bf16.mxu0 %v3650_v46  ;;  %2541 = vmatprep.subr.bf16.mxu1 %v2995_v2 }
 0x73f   :  { %1169 = vmatpush1.bf16.msra.mxu0 %v3657_v4  ;;  %2542 = vmatpush3.bf16.msra.mxu1 %v3663_v5 }
 0x740   :  { %1271 = vmatprep.subr.bf16.mxu0 %v3500_v1  ;;  %2547 = vmatprep.subr.bf16.mxu1 %v2995_v2 }
 0x7e2   :  { %v1071_v11 = vpop.f32.mrf.mxu0  ;;  %v1112_v12 = vpop.f32.mrf.mxu1 }
 0x7e3   :  { %v1072_v13 = vadd.f32 %v1071_v11, %v3237_v32  ;;  %v1113_v52 = vadd.f32 %v1112_v12, %v3245_v54 }
 0x7e4   :  { %v1073_v14 = vpop.f32.mrf.mxu0  ;;  %v2525_v15 = vpop.f32.mrf.mxu1 }
 0x7e5   :  { %v1118_v16 = vadd.f32 %v1072_v13, %v1033_v10  ;;  %v1074_v21 = vadd.f32 %v1073_v14, %v3241_v37 }
 0x7e6   :  { %v1075_v17 = vpop.f32.mrf.mxu0  ;;  %v1115_v18 = vpop.f32.mrf.mxu1 }
 0x7e7   :  { %v2175_v19 = vmul.f32 -1.442695, %v1118_v16  ;;  %v1125_v24 = vadd.f32 %v1074_v21, %v1034_v20 }
 0x7e8   :  { %v1076_v22 = vpop.f32.mrf.mxu0  ;;  %v2526_v23 = vpop.f32.mrf.mxu1 }
 0x7e9   :  { %2798 = vpow2.f32 %v2175_v19  ;;  %v2176_v26 = vmul.f32 -1.442695, %v1125_v24 }
 0x7eb   :  { %2800 = vpow2.f32 %v2176_v26 }
 0x7f6   :  { %v2799_v47 = vpop.eup %2798 }
 0x7f7   :  { %v1122_v48 = vadd.f32 1.0, %v2799_v47 }
 0x7f8   :  { %v2801_v49 = vpop.eup %2800 }
 0x7f9   :  { %2802 = vrcp.f32 %v1122_v48  ;;  %v1129_v50 = vadd.f32 1.0, %v2801_v49 }
 0x7fb   :  { %2804 = vrcp.f32 %v1129_v50 }
 0x806   :  { %v2803_v53 = vpop.eup %2802 }
 0x807   :  { %v1132_v55 = vmul.f32 %v2803_v53, %v1113_v52  ;;  %v3779_v52 = vld [vmem:[%s4224_s1 + $0x68] ss:$12 sps:$4 sm:$0xff]  }
 0x808   :  { %v2805_v0 = vpop.eup %2804 }
 0x809   :  { %v1133_v57 = vadd.f32 %v1132_v55, %v1035_v51  ;;  %v1135_v59 = vsub.f32 1.0, %v2805_v0  ;;  %v1137_v9 = vmul.f32 %v2805_v0, %v3683_v7  ;;  %v1152_v55 = vunpack.c.l.bf16 %v3779_v52 }
 0x80b   :  { %2806 = vtanh.f32 %v1133_v57 }
 0x818   :  { %v2807_v6 = vpop.eup %2806 }
 0x819   :  { %v1136_v8 = vmul.f32 %v2807_v6, %v1135_v59 }
 0x81b   :  { %v1138_v58 = vadd.f32 %v1137_v9, %v1136_v8  ;;  %v1256_v9 = vstv %s2177_s23 }
 0x81c   :  { %vm1257_vm10 = vcmp.lt.s32.totalorder %v3228_v28, %v1256_v9 }
 0x81d   :  { %v3732_v61 = vsel %vm1140_vm9, %v1138_v58, %v3683_v7  ;;  %v1142_v10 = vsel %vm1140_vm9, %v1138_v58, 0.0  ;;  %v2178_v7 = vld [vmem:[%s4224_s1 + $0x60] sm:$0xff] }
 0x81e   :  { %1144 = vst [vmem:[#allocation5 + $0x38] sm:$0xff] %v1142_v10  ;;  %v1153_v11 = vpack.c.bf16 %v3732_v61, %v3732_v61  ;;  %v1150_v12 = vunpack.c.l.bf16 %v2178_v7  ;;  %v1151_v22 = vunpack.c.h.bf16 %v2178_v7 }
 0x820   :  { %1187 = vmatmul.mubr.bf16.vlgmr.msra.gmra.mxu0 %v1153_v11  ;;  %2544 = vmatmul.mubr.bf16.vlgmr.msra.gmra.mxu1 %v1153_v11 }
 0x821   :  { %1272 = vmatpush1.bf16.msra.mxu0 %v3521_v62  ;;  %2548 = vmatpush3.bf16.msra.mxu1 %v3527_v63 }
 0x822   :  { %1273 = vmatprep.subr.bf16.mxu0 %v3533_v25  ;;  %2549 = vmatprep.subr.bf16.mxu1 %v2995_v2 }
 0x823   :  { %1303 = vmatprep.mubr.bf16.mxu0 %v2996_v3  ;;  %2563 = vmatprep.mubr.msk.bf16.mxu1 %vm2997_vm0, %v2995_v2 }
 0x825   :  { %1274 = vmatpush1.bf16.msra.mxu0 %v3543_v27  ;;  %2550 = vmatpush3.bf16.msra.mxu1 %v3549_v29 }
 0x826   :  { %1275 = vmatprep.subr.bf16.mxu0 %v3555_v30  ;;  %2551 = vmatprep.subr.bf16.mxu1 %v2995_v2 }
 0x829   :  { %1276 = vmatpush1.bf16.msra.mxu0 %v3562_v31  ;;  %2552 = vmatpush3.bf16.msra.mxu1 %v3568_v33 }
 0x82a   :  { %1277 = vmatprep.subr.bf16.mxu0 %v3574_v35  ;;  %2553 = vmatprep.subr.bf16.mxu1 %v2995_v2 }
 0x82d   :  { %1278 = vmatpush1.bf16.msra.mxu0 %v3581_v36  ;;  %2554 = vmatpush3.bf16.msra.mxu1 %v3587_v38 }
 0x82e   :  { %1279 = vmatprep.subr.bf16.mxu0 %v3593_v39  ;;  %2555 = vmatprep.subr.bf16.mxu1 %v2995_v2 }
 0x831   :  { %1280 = vmatpush1.bf16.msra.mxu0 %v3600_v34  ;;  %2556 = vmatpush3.bf16.msra.mxu1 %v3606_v41 }
 0x832   :  { %1281 = vmatprep.subr.bf16.mxu0 %v3612_v42  ;;  %2557 = vmatprep.subr.bf16.mxu1 %v2995_v2 }
 0x835   :  { %1282 = vmatpush1.bf16.msra.mxu0 %v3619_v56  ;;  %2558 = vmatpush3.bf16.msra.mxu1 %v3625_v43 }
 0x836   :  { %1283 = vmatprep.subr.bf16.mxu0 %v3631_v44  ;;  %2559 = vmatprep.subr.bf16.mxu1 %v2995_v2 }
 0x839   :  { %1284 = vmatpush1.bf16.msra.mxu0 %v3638_v40  ;;  %2560 = vmatpush3.bf16.msra.mxu1 %v3644_v45 }
 0x83a   :  { %1285 = vmatprep.subr.bf16.mxu0 %v3650_v46  ;;  %2561 = vmatprep.subr.bf16.mxu1 %v2995_v2 }
 0x83d   :  { %1286 = vmatpush1.bf16.msra.mxu0 %v3657_v4  ;;  %2562 = vmatpush3.bf16.msra.mxu1 %v3663_v5 }
 0x83e   :  { %1388 = vmatprep.subr.bf16.mxu0 %v3500_v1  ;;  %2567 = vmatprep.subr.bf16.mxu1 %v2995_v2 }
 0x8e0   :  { %v1188_v13 = vpop.f32.mrf.mxu0  ;;  %v1229_v14 = vpop.f32.mrf.mxu1 }
 0x8e1   :  { %v1189_v15 = vadd.f32 %v1188_v13, %v3237_v32  ;;  %v1230_v57 = vadd.f32 %v1229_v14, %v3245_v54 }
 0x8e2   :  { %v1190_v16 = vpop.f32.mrf.mxu0  ;;  %v2545_v17 = vpop.f32.mrf.mxu1 }
 0x8e3   :  { %v1235_v18 = vadd.f32 %v1189_v15, %v1150_v12  ;;  %v1191_v23 = vadd.f32 %v1190_v16, %v3241_v37 }
 0x8e4   :  { %v1192_v19 = vpop.f32.mrf.mxu0  ;;  %v1232_v20 = vpop.f32.mrf.mxu1 }
 0x8e5   :  { %v2180_v21 = vmul.f32 -1.442695, %v1235_v18  ;;  %v1242_v47 = vadd.f32 %v1191_v23, %v1151_v22 }
 0x8e6   :  { %v1193_v24 = vpop.f32.mrf.mxu0  ;;  %v2546_v26 = vpop.f32.mrf.mxu1 }
 0x8e7   :  { %2808 = vpow2.f32 %v2180_v21  ;;  %v2181_v48 = vmul.f32 -1.442695, %v1242_v47 }
 0x8e9   :  { %2810 = vpow2.f32 %v2181_v48 }
 0x8f4   :  { %v2809_v49 = vpop.eup %2808 }
 0x8f5   :  { %v1239_v50 = vadd.f32 1.0, %v2809_v49 }
 0x8f6   :  { %v2811_v51 = vpop.eup %2810 }
 0x8f7   :  { %2812 = vrcp.f32 %v1239_v50  ;;  %v1246_v53 = vadd.f32 1.0, %v2811_v51 }
 0x8f9   :  { %2814 = vrcp.f32 %v1246_v53 }
 0x904   :  { %v2813_v0 = vpop.eup %2812 }
 0x905   :  { %v1249_v59 = vmul.f32 %v2813_v0, %v1230_v57 }
 0x906   :  { %v2815_v6 = vpop.eup %2814 }
 0x907   :  { %v1250_v60 = vadd.f32 %v1249_v59, %v1152_v55  ;;  %v1252_v8 = vsub.f32 1.0, %v2815_v6  ;;  %v1254_v11 = vmul.f32 %v2815_v6, %v3732_v61  ;;  %v1269_v59 = vunpack.c.h.bf16 %v3779_v52 }
 0x909   :  { %2816 = vtanh.f32 %v1250_v60 }
 0x916   :  { %v2817_v58 = vpop.eup %2816 }
 0x917   :  { %v1253_v10 = vmul.f32 %v2817_v58, %v1252_v8 }
 0x919   :  { %v1255_v7 = vadd.f32 %v1254_v11, %v1253_v10  ;;  %v1373_v11 = vstv %s2182_s25 }
 0x91a   :  { %vm1374_vm11 = vcmp.lt.s32.totalorder %v3228_v28, %v1373_v11 }
 0x91b   :  { %v3786_v12 = vsel %vm1257_vm10, %v1255_v7, %v3732_v61  ;;  %v1259_v13 = vsel %vm1257_vm10, %v1255_v7, 0.0  ;;  %v2183_v61 = vld [vmem:[%s4224_s1 + $0x6c] sm:$0xff] }
 0x91c   :  { %1261 = vst [vmem:[#allocation5 + $0x40] sm:$0xff] %v1259_v13  ;;  %v1270_v14 = vpack.c.bf16 %v3786_v12, %v3786_v12  ;;  %v1267_v15 = vunpack.c.l.bf16 %v2183_v61  ;;  %v1268_v26 = vunpack.c.h.bf16 %v2183_v61 }
 0x91e   :  { %1304 = vmatmul.mubr.bf16.vlgmr.msra.gmra.mxu0 %v1270_v14  ;;  %2564 = vmatmul.mubr.bf16.vlgmr.msra.gmra.mxu1 %v1270_v14 }
 0x91f   :  { %1389 = vmatpush1.bf16.msra.mxu0 %v3521_v62  ;;  %2568 = vmatpush3.bf16.msra.mxu1 %v3527_v63 }
 0x920   :  { %1390 = vmatprep.subr.bf16.mxu0 %v3533_v25  ;;  %2569 = vmatprep.subr.bf16.mxu1 %v2995_v2 }
 0x921   :  { %1420 = vmatprep.mubr.bf16.mxu0 %v2996_v3  ;;  %2583 = vmatprep.mubr.msk.bf16.mxu1 %vm2997_vm0, %v2995_v2 }
 0x923   :  { %1391 = vmatpush1.bf16.msra.mxu0 %v3543_v27  ;;  %2570 = vmatpush3.bf16.msra.mxu1 %v3549_v29 }
 0x924   :  { %1392 = vmatprep.subr.bf16.mxu0 %v3555_v30  ;;  %2571 = vmatprep.subr.bf16.mxu1 %v2995_v2 }
 0x927   :  { %1393 = vmatpush1.bf16.msra.mxu0 %v3562_v31  ;;  %2572 = vmatpush3.bf16.msra.mxu1 %v3568_v33 }
 0x928   :  { %1394 = vmatprep.subr.bf16.mxu0 %v3574_v35  ;;  %2573 = vmatprep.subr.bf16.mxu1 %v2995_v2 }
 0x92b   :  { %1395 = vmatpush1.bf16.msra.mxu0 %v3581_v36  ;;  %2574 = vmatpush3.bf16.msra.mxu1 %v3587_v38 }
 0x92c   :  { %1396 = vmatprep.subr.bf16.mxu0 %v3593_v39  ;;  %2575 = vmatprep.subr.bf16.mxu1 %v2995_v2 }
 0x92f   :  { %1397 = vmatpush1.bf16.msra.mxu0 %v3600_v34  ;;  %2576 = vmatpush3.bf16.msra.mxu1 %v3606_v41 }
 0x930   :  { %1398 = vmatprep.subr.bf16.mxu0 %v3612_v42  ;;  %2577 = vmatprep.subr.bf16.mxu1 %v2995_v2 }
 0x933   :  { %1399 = vmatpush1.bf16.msra.mxu0 %v3619_v56  ;;  %2578 = vmatpush3.bf16.msra.mxu1 %v3625_v43 }
 0x934   :  { %1400 = vmatprep.subr.bf16.mxu0 %v3631_v44  ;;  %2579 = vmatprep.subr.bf16.mxu1 %v2995_v2 }
 0x937   :  { %1401 = vmatpush1.bf16.msra.mxu0 %v3638_v40  ;;  %2580 = vmatpush3.bf16.msra.mxu1 %v3644_v45 }
 0x938   :  { %1402 = vmatprep.subr.bf16.mxu0 %v3650_v46  ;;  %2581 = vmatprep.subr.bf16.mxu1 %v2995_v2 }
 0x93b   :  { %1403 = vmatpush1.bf16.msra.mxu0 %v3657_v4  ;;  %2582 = vmatpush3.bf16.msra.mxu1 %v3663_v5 }
 0x93c   :  { %1505 = vmatprep.subr.bf16.mxu0 %v3500_v1  ;;  %2587 = vmatprep.subr.bf16.mxu1 %v2995_v2 }
 0x9de   :  { %v1305_v16 = vpop.f32.mrf.mxu0  ;;  %v1346_v17 = vpop.f32.mrf.mxu1 }
 0x9df   :  { %v1306_v18 = vadd.f32 %v1305_v16, %v3237_v32  ;;  %v1347_v60 = vadd.f32 %v1346_v17, %v3245_v54 }
 0x9e0   :  { %v1307_v19 = vpop.f32.mrf.mxu0  ;;  %v2565_v20 = vpop.f32.mrf.mxu1 }
 0x9e1   :  { %v1352_v21 = vadd.f32 %v1306_v18, %v1267_v15  ;;  %v1308_v47 = vadd.f32 %v1307_v19, %v3241_v37 }
 0x9e2   :  { %v1309_v22 = vpop.f32.mrf.mxu0  ;;  %v1349_v23 = vpop.f32.mrf.mxu1 }
 0x9e3   :  { %v2185_v24 = vmul.f32 -1.442695, %v1352_v21  ;;  %v1359_v50 = vadd.f32 %v1308_v47, %v1268_v26 }
 0x9e4   :  { %v1310_v48 = vpop.f32.mrf.mxu0  ;;  %v2566_v49 = vpop.f32.mrf.mxu1 }
 0x9e5   :  { %2818 = vpow2.f32 %v2185_v24  ;;  %v2186_v51 = vmul.f32 -1.442695, %v1359_v50 }
 0x9e7   :  { %2820 = vpow2.f32 %v2186_v51 }
 0x9f2   :  { %v2819_v53 = vpop.eup %2818 }
 0x9f3   :  { %v1356_v55 = vadd.f32 1.0, %v2819_v53 }
 0x9f4   :  { %v2821_v57 = vpop.eup %2820 }
 0x9f5   :  { %2822 = vrcp.f32 %v1356_v55  ;;  %v1363_v0 = vadd.f32 1.0, %v2821_v57 }
 0x9f7   :  { %2824 = vrcp.f32 %v1363_v0 }
 0xa02   :  { %v2823_v6 = vpop.eup %2822 }
 0xa03   :  { %v1366_v8 = vmul.f32 %v2823_v6, %v1347_v60  ;;  %v3882_v60 = vld [vmem:[%s4224_s1 + $0x80] ss:$12 sps:$4 sm:$0xff]  }
 0xa04   :  { %v2825_v58 = vpop.eup %2824 }
 0xa05   :  { %v1367_v9 = vadd.f32 %v1366_v8, %v1269_v59  ;;  %v1369_v10 = vsub.f32 1.0, %v2825_v58  ;;  %v1371_v14 = vmul.f32 %v2825_v58, %v3786_v12  ;;  %v1386_v8 = vunpack.c.l.bf16 %v3882_v60 }
 0xa07   :  { %2826 = vtanh.f32 %v1367_v9 }
 0xa14   :  { %v2827_v7 = vpop.eup %2826 }
 0xa15   :  { %v1370_v13 = vmul.f32 %v2827_v7, %v1369_v10 }
 0xa17   :  { %v1372_v61 = vadd.f32 %v1371_v14, %v1370_v13  ;;  %v1490_v14 = vstv %s2187_s30 }
 0xa18   :  { %vm1491_vm12 = vcmp.lt.s32.totalorder %v3228_v28, %v1490_v14 }
 0xa19   :  { %v3835_v52 = vsel %vm1374_vm11, %v1372_v61, %v3786_v12  ;;  %v1376_v15 = vsel %vm1374_vm11, %v1372_v61, 0.0  ;;  %v2188_v12 = vld [vmem:[%s4224_s1 + $0x78] sm:$0xff] }
 0xa1a   :  { %1378 = vst [vmem:[#allocation5 + $0x48] sm:$0xff] %v1376_v15  ;;  %v1387_v16 = vpack.c.bf16 %v3835_v52, %v3835_v52  ;;  %v1384_v17 = vunpack.c.l.bf16 %v2188_v12  ;;  %v1385_v48 = vunpack.c.h.bf16 %v2188_v12 }
 0xa1c   :  { %1421 = vmatmul.mubr.bf16.vlgmr.msra.gmra.mxu0 %v1387_v16  ;;  %2584 = vmatmul.mubr.bf16.vlgmr.msra.gmra.mxu1 %v1387_v16 }
 0xa1d   :  { %1506 = vmatpush1.bf16.msra.mxu0 %v3521_v62  ;;  %2588 = vmatpush3.bf16.msra.mxu1 %v3527_v63 }
 0xa1e   :  { %1507 = vmatprep.subr.bf16.mxu0 %v3533_v25  ;;  %2589 = vmatprep.subr.bf16.mxu1 %v2995_v2 }
 0xa1f   :  { %1537 = vmatprep.mubr.bf16.mxu0 %v2996_v3  ;;  %2603 = vmatprep.mubr.msk.bf16.mxu1 %vm2997_vm0, %v2995_v2 }
 0xa21   :  { %1508 = vmatpush1.bf16.msra.mxu0 %v3543_v27  ;;  %2590 = vmatpush3.bf16.msra.mxu1 %v3549_v29 }
 0xa22   :  { %1509 = vmatprep.subr.bf16.mxu0 %v3555_v30  ;;  %2591 = vmatprep.subr.bf16.mxu1 %v2995_v2 }
 0xa25   :  { %1510 = vmatpush1.bf16.msra.mxu0 %v3562_v31  ;;  %2592 = vmatpush3.bf16.msra.mxu1 %v3568_v33 }
 0xa26   :  { %1511 = vmatprep.subr.bf16.mxu0 %v3574_v35  ;;  %2593 = vmatprep.subr.bf16.mxu1 %v2995_v2 }
 0xa29   :  { %1512 = vmatpush1.bf16.msra.mxu0 %v3581_v36  ;;  %2594 = vmatpush3.bf16.msra.mxu1 %v3587_v38 }
 0xa2a   :  { %1513 = vmatprep.subr.bf16.mxu0 %v3593_v39  ;;  %2595 = vmatprep.subr.bf16.mxu1 %v2995_v2 }
 0xa2d   :  { %1514 = vmatpush1.bf16.msra.mxu0 %v3600_v34  ;;  %2596 = vmatpush3.bf16.msra.mxu1 %v3606_v41 }
 0xa2e   :  { %1515 = vmatprep.subr.bf16.mxu0 %v3612_v42  ;;  %2597 = vmatprep.subr.bf16.mxu1 %v2995_v2 }
 0xa31   :  { %1516 = vmatpush1.bf16.msra.mxu0 %v3619_v56  ;;  %2598 = vmatpush3.bf16.msra.mxu1 %v3625_v43 }
 0xa32   :  { %1517 = vmatprep.subr.bf16.mxu0 %v3631_v44  ;;  %2599 = vmatprep.subr.bf16.mxu1 %v2995_v2 }
 0xa35   :  { %1518 = vmatpush1.bf16.msra.mxu0 %v3638_v40  ;;  %2600 = vmatpush3.bf16.msra.mxu1 %v3644_v45 }
 0xa36   :  { %1519 = vmatprep.subr.bf16.mxu0 %v3650_v46  ;;  %2601 = vmatprep.subr.bf16.mxu1 %v2995_v2 }
 0xa39   :  { %1520 = vmatpush1.bf16.msra.mxu0 %v3657_v4  ;;  %2602 = vmatpush3.bf16.msra.mxu1 %v3663_v5 }
 0xa3a   :  { %1622 = vmatprep.subr.bf16.mxu0 %v3500_v1  ;;  %2607 = vmatprep.subr.bf16.mxu1 %v2995_v2 }
 0xadc   :  { %v1422_v18 = vpop.f32.mrf.mxu0  ;;  %v1463_v19 = vpop.f32.mrf.mxu1 }
 0xadd   :  { %v1423_v20 = vadd.f32 %v1422_v18, %v3237_v32  ;;  %v1464_v9 = vadd.f32 %v1463_v19, %v3245_v54 }
 0xade   :  { %v1424_v21 = vpop.f32.mrf.mxu0  ;;  %v2585_v22 = vpop.f32.mrf.mxu1 }
 0xadf   :  { %v1469_v23 = vadd.f32 %v1423_v20, %v1384_v17  ;;  %v1425_v49 = vadd.f32 %v1424_v21, %v3241_v37 }
 0xae0   :  { %v1426_v24 = vpop.f32.mrf.mxu0  ;;  %v1466_v26 = vpop.f32.mrf.mxu1 }
 0xae1   :  { %v2190_v47 = vmul.f32 -1.442695, %v1469_v23  ;;  %v1476_v53 = vadd.f32 %v1425_v49, %v1385_v48 }
 0xae2   :  { %v1427_v50 = vpop.f32.mrf.mxu0  ;;  %v2586_v51 = vpop.f32.mrf.mxu1 }
 0xae3   :  { %2828 = vpow2.f32 %v2190_v47  ;;  %v2191_v55 = vmul.f32 -1.442695, %v1476_v53 }
 0xae5   :  { %2830 = vpow2.f32 %v2191_v55 }
 0xaf0   :  { %v2829_v57 = vpop.eup %2828 }
 0xaf1   :  { %v1473_v0 = vadd.f32 1.0, %v2829_v57 }
 0xaf2   :  { %v2831_v59 = vpop.eup %2830 }
 0xaf3   :  { %2832 = vrcp.f32 %v1473_v0  ;;  %v1480_v6 = vadd.f32 1.0, %v2831_v59 }
 0xaf5   :  { %2834 = vrcp.f32 %v1480_v6 }
 0xb00   :  { %v2833_v58 = vpop.eup %2832 }
 0xb01   :  { %v1483_v10 = vmul.f32 %v2833_v58, %v1464_v9  ;;  %v1503_v58 = vunpack.c.h.bf16 %v3882_v60 }
 0xb02   :  { %v2835_v7 = vpop.eup %2834 }
 0xb03   :  { %v1484_v11 = vadd.f32 %v1483_v10, %v1386_v8  ;;  %v1486_v13 = vsub.f32 1.0, %v2835_v7  ;;  %v1488_v16 = vmul.f32 %v2835_v7, %v3835_v52 }
 0xb05   :  { %2836 = vtanh.f32 %v1484_v11 }
 0xb12   :  { %v2837_v61 = vpop.eup %2836 }
 0xb13   :  { %v1487_v15 = vmul.f32 %v2837_v61, %v1486_v13 }
 0xb15   :  { %v1489_v12 = vadd.f32 %v1488_v16, %v1487_v15  ;;  %v1607_v15 = vstv %s2192_s8 }
 0xb16   :  { %vm1608_vm13 = vcmp.lt.s32.totalorder %v3228_v28, %v1607_v15  ;;  %v4083_v15 = vld [vmem:[%s4225_s2 + $0x48] ss:$12 sps:$4 sm:$0xff]  }
 0xb17   :  { %v3889_v17 = vsel %vm1491_vm12, %v1489_v12, %v3835_v52  ;;  %v1493_v18 = vsel %vm1491_vm12, %v1489_v12, 0.0  ;;  %v2193_v52 = vld [vmem:[%s4224_s1 + $0x84] sm:$0xff] }
 0xb18   :  { %1495 = vst [vmem:[#allocation5 + $0x50] sm:$0xff] %v1493_v18  ;;  %v1504_v19 = vpack.c.bf16 %v3889_v17, %v3889_v17  ;;  %v1501_v20 = vunpack.c.l.bf16 %v2193_v52  ;;  %v1502_v51 = vunpack.c.h.bf16 %v2193_v52 }
 0xb1a   :  { %1538 = vmatmul.mubr.bf16.vlgmr.msra.gmra.mxu0 %v1504_v19  ;;  %2604 = vmatmul.mubr.bf16.vlgmr.msra.gmra.mxu1 %v1504_v19 }
 0xb1b   :  { %1623 = vmatpush1.bf16.msra.mxu0 %v3521_v62  ;;  %2608 = vmatpush3.bf16.msra.mxu1 %v3527_v63 }
 0xb1c   :  { %1624 = vmatprep.subr.bf16.mxu0 %v3533_v25  ;;  %2609 = vmatprep.subr.bf16.mxu1 %v2995_v2 }
 0xb1d   :  { %1654 = vmatprep.mubr.bf16.mxu0 %v2996_v3  ;;  %2623 = vmatprep.mubr.msk.bf16.mxu1 %vm2997_vm0, %v2995_v2 }
 0xb1f   :  { %1625 = vmatpush1.bf16.msra.mxu0 %v3543_v27  ;;  %2610 = vmatpush3.bf16.msra.mxu1 %v3549_v29 }
 0xb20   :  { %1626 = vmatprep.subr.bf16.mxu0 %v3555_v30  ;;  %2611 = vmatprep.subr.bf16.mxu1 %v2995_v2 }
 0xb23   :  { %1627 = vmatpush1.bf16.msra.mxu0 %v3562_v31  ;;  %2612 = vmatpush3.bf16.msra.mxu1 %v3568_v33 }
 0xb24   :  { %1628 = vmatprep.subr.bf16.mxu0 %v3574_v35  ;;  %2613 = vmatprep.subr.bf16.mxu1 %v2995_v2 }
 0xb27   :  { %1629 = vmatpush1.bf16.msra.mxu0 %v3581_v36  ;;  %2614 = vmatpush3.bf16.msra.mxu1 %v3587_v38 }
 0xb28   :  { %1630 = vmatprep.subr.bf16.mxu0 %v3593_v39  ;;  %2615 = vmatprep.subr.bf16.mxu1 %v2995_v2 }
 0xb2b   :  { %1631 = vmatpush1.bf16.msra.mxu0 %v3600_v34  ;;  %2616 = vmatpush3.bf16.msra.mxu1 %v3606_v41 }
 0xb2c   :  { %1632 = vmatprep.subr.bf16.mxu0 %v3612_v42  ;;  %2617 = vmatprep.subr.bf16.mxu1 %v2995_v2 }
 0xb2f   :  { %1633 = vmatpush1.bf16.msra.mxu0 %v3619_v56  ;;  %2618 = vmatpush3.bf16.msra.mxu1 %v3625_v43 }
 0xb30   :  { %1634 = vmatprep.subr.bf16.mxu0 %v3631_v44  ;;  %2619 = vmatprep.subr.bf16.mxu1 %v2995_v2 }
 0xb33   :  { %1635 = vmatpush1.bf16.msra.mxu0 %v3638_v40  ;;  %2620 = vmatpush3.bf16.msra.mxu1 %v3644_v45 }
 0xb34   :  { %1636 = vmatprep.subr.bf16.mxu0 %v3650_v46  ;;  %2621 = vmatprep.subr.bf16.mxu1 %v2995_v2 }
 0xb37   :  { %1637 = vmatpush1.bf16.msra.mxu0 %v3657_v4  ;;  %2622 = vmatpush3.bf16.msra.mxu1 %v3663_v5 }
 0xb38   :  { %1739 = vmatprep.subr.bf16.mxu0 %v3500_v1  ;;  %2627 = vmatprep.subr.bf16.mxu1 %v2995_v2 }
 0xbda   :  { %v1539_v21 = vpop.f32.mrf.mxu0  ;;  %v1580_v22 = vpop.f32.mrf.mxu1 }
 0xbdb   :  { %v1540_v23 = vadd.f32 %v1539_v21, %v3237_v32  ;;  %v1581_v10 = vadd.f32 %v1580_v22, %v3245_v54 }
 0xbdc   :  { %v1541_v24 = vpop.f32.mrf.mxu0  ;;  %v2605_v26 = vpop.f32.mrf.mxu1 }
 0xbdd   :  { %v1586_v47 = vadd.f32 %v1540_v23, %v1501_v20  ;;  %v1542_v1 = vadd.f32 %v1541_v24, %v3241_v37 }
 0xbde   :  { %v1543_v48 = vpop.f32.mrf.mxu0  ;;  %v1583_v49 = vpop.f32.mrf.mxu1 }
 0xbdf   :  { %v2195_v50 = vmul.f32 -1.442695, %v1586_v47  ;;  %v1593_v57 = vadd.f32 %v1542_v1, %v1502_v51  ;;  %v1724_v48 = vstv %s2197_s15 }
 0xbe0   :  { %v1544_v53 = vpop.f32.mrf.mxu0  ;;  %v2606_v55 = vpop.f32.mrf.mxu1  ;;  %vm1725_vm14 = vcmp.lt.s32.totalorder %v3228_v28, %v1724_v48 }
 0xbe1   :  { %2838 = vpow2.f32 %v2195_v50  ;;  %v2196_v0 = vmul.f32 -1.442695, %v1593_v57 }
 0xbe3   :  { %2840 = vpow2.f32 %v2196_v0  ;;  %v4004_v0 = vld [vmem:[%s4225_s2 + $0xa8] ss:$12 sps:$4 sm:$0xff]  }
 0xbee   :  { %v2839_v59 = vpop.eup %2838 }
 0xbef   :  { %v1590_v6 = vadd.f32 1.0, %v2839_v59  ;;  %v4010_v59 = vld [vmem:[%s4225_s2 + $0xb0] ss:$12 sps:$4 sm:$0xff]  }
 0xbf0   :  { %v2841_v8 = vpop.eup %2840 }
 0xbf1   :  { %2842 = vrcp.f32 %v1590_v6  ;;  %v1597_v9 = vadd.f32 1.0, %v2841_v8  ;;  %v4016_v6 = vld [vmem:[%s4225_s2 + $0x94] ss:$12 sps:$4 sm:$0xff]   ;;  %v4026_v8 = vld [vmem:[%s4225_s2 + $0x90] ss:$12 sps:$4 sm:$0xff]  }
 0xbf3   :  { %2844 = vrcp.f32 %v1597_v9  ;;  %v4032_v9 = vld [vmem:[%s4225_s2 + $0x98] ss:$12 sps:$4 sm:$0xff]  }
 0xbfe   :  { %v2843_v11 = vpop.eup %2842 }
 0xbff   :  { %v1600_v7 = vmul.f32 %v2843_v11, %v1581_v10  ;;  %v4045_v10 = vld [vmem:[%s4225_s2 + $0x78] ss:$12 sps:$4 sm:$0xff]   ;;  %v4051_v11 = vld [vmem:[%s4225_s2 + $0x80] ss:$12 sps:$4 sm:$0xff]  }
 0xc00   :  { %v2845_v14 = vpop.eup %2844 }
 0xc01   :  { %v1601_v13 = vadd.f32 %v1600_v7, %v1503_v58  ;;  %v1603_v61 = vsub.f32 1.0, %v2845_v14  ;;  %v1605_v18 = vmul.f32 %v2845_v14, %v3889_v17  ;;  %v4038_v58 = vld [vmem:[%s4225_s2 + $0x7c] ss:$12 sps:$4 sm:$0xff]   ;;  %v4057_v7 = vld [vmem:[%s4225_s2 + $0x64] ss:$12 sps:$4 sm:$0xff]  }
 0xc02   :  { %v4070_v14 = vld [vmem:[%s4225_s2 + $0x68] ss:$12 sps:$4 sm:$0xff]  }
 0xc03   :  { %2846 = vtanh.f32 %v1601_v13  ;;  %v4064_v13 = vld [vmem:[%s4225_s2 + $0x60] ss:$12 sps:$4 sm:$0xff]  }
 0xc10   :  { %v2847_v16 = vpop.eup %2846 }
 0xc11   :  { %v1604_v12 = vmul.f32 %v2847_v16, %v1603_v61  ;;  %v4076_v61 = vld [vmem:[%s4225_s2 + $0x4c] ss:$12 sps:$4 sm:$0xff]   ;;  %v4089_v16 = vld [vmem:[%s4225_s2 + $0x50] ss:$12 sps:$4 sm:$0xff]  }
 0xc13   :  { %v1606_v19 = vadd.f32 %v1605_v18, %v1604_v12  ;;  %v4095_v12 = vld [vmem:[%s4225_s2 + $0x34] ss:$12 sps:$4 sm:$0xff]   ;;  %v4102_v18 = vld [vmem:[%s4225_s2 + $0x30] ss:$12 sps:$4 sm:$0xff]  }
 0xc15   :  { %v3938_v60 = vsel %vm1608_vm13, %v1606_v19, %v3889_v17  ;;  %v1610_v52 = vsel %vm1608_vm13, %v1606_v19, 0.0  ;;  %v4108_v19 = vld [vmem:[%s4225_s2 + $0x38] ss:$12 sps:$4 sm:$0xff]  }
 0xc16   :  { %1612 = vst [vmem:[#allocation5 + $0x58] sm:$0xff] %v1610_v52  ;;  %v1621_v20 = vpack.c.bf16 %v3938_v60, %v3938_v60  ;;  %v4121_v52 = vld [vmem:[%s4225_s2 + $0x18] ss:$12 sps:$4 sm:$0xff]  }
 0xc18   :  { %1655 = vmatmul.mubr.bf16.vlgmr.msra.gmra.mxu0 %v1621_v20  ;;  %2624 = vmatmul.mubr.bf16.vlgmr.msra.gmra.mxu1 %v1621_v20  ;;  %v4127_v20 = vld [vmem:[%s4225_s2 + $0x20] ss:$12 sps:$4 sm:$0xff]  }
 0xc19   :  { %1740 = vmatpush1.bf16.msra.mxu0 %v3521_v62  ;;  %2628 = vmatpush3.bf16.msra.mxu1 %v3527_v63  ;;  %v3978_v62 = vld [vmem:[%s4225_s2 + $0xac] ss:$12 sps:$4 sm:$0xff]   ;;  %v2198_v63 = vld [vmem:[%s4224_s1 + $0x90] sm:$0xff] }
 0xc1a   :  { %1741 = vmatprep.subr.bf16.mxu0 %v3533_v25  ;;  %2629 = vmatprep.subr.bf16.mxu1 %v2995_v2  ;;  %v1618_v25 = vunpack.c.l.bf16 %v2198_v63 }
 0xc1b   :  { %1771 = vmatprep.mubr.bf16.mxu0 %v2996_v3  ;;  %2643 = vmatprep.mubr.msk.bf16.mxu1 %vm2997_vm0, %v2995_v2 }
 0xc1d   :  { %1742 = vmatpush1.bf16.msra.mxu0 %v3543_v27  ;;  %2630 = vmatpush3.bf16.msra.mxu1 %v3549_v29 }
 0xc1e   :  { %1743 = vmatprep.subr.bf16.mxu0 %v3555_v30  ;;  %2631 = vmatprep.subr.bf16.mxu1 %v2995_v2 }
 0xc21   :  { %1744 = vmatpush1.bf16.msra.mxu0 %v3562_v31  ;;  %2632 = vmatpush3.bf16.msra.mxu1 %v3568_v33 }
 0xc22   :  { %1745 = vmatprep.subr.bf16.mxu0 %v3574_v35  ;;  %2633 = vmatprep.subr.bf16.mxu1 %v2995_v2 }
 0xc25   :  { %1746 = vmatpush1.bf16.msra.mxu0 %v3581_v36  ;;  %2634 = vmatpush3.bf16.msra.mxu1 %v3587_v38 }
 0xc26   :  { %1747 = vmatprep.subr.bf16.mxu0 %v3593_v39  ;;  %2635 = vmatprep.subr.bf16.mxu1 %v2995_v2 }
 0xc29   :  { %1748 = vmatpush1.bf16.msra.mxu0 %v3600_v34  ;;  %2636 = vmatpush3.bf16.msra.mxu1 %v3606_v41  ;;  %v1619_v34 = vunpack.c.h.bf16 %v2198_v63  ;;  %v4133_v63 = vld [vmem:[%s4225_s2 + $0x4] ss:$12 sps:$4 sm:$0xff]  }
 0xc2a   :  { %1749 = vmatprep.subr.bf16.mxu0 %v3612_v42  ;;  %2637 = vmatprep.subr.bf16.mxu1 %v2995_v2 }
 0xc2d   :  { %1750 = vmatpush1.bf16.msra.mxu0 %v3619_v56  ;;  %2638 = vmatpush3.bf16.msra.mxu1 %v3625_v43 }
 0xc2e   :  { %1751 = vmatprep.subr.bf16.mxu0 %v3631_v44  ;;  %2639 = vmatprep.subr.bf16.mxu1 %v2995_v2 }
 0xc31   :  { %1752 = vmatpush1.bf16.msra.mxu0 %v3638_v40  ;;  %2640 = vmatpush3.bf16.msra.mxu1 %v3644_v45 }
 0xc32   :  { %1753 = vmatprep.subr.bf16.mxu0 %v3650_v46  ;;  %2641 = vmatprep.subr.bf16.mxu1 %v2995_v2 }
 0xc35   :  { %1754 = vmatpush1.bf16.msra.mxu0 %v3657_v4  ;;  %2642 = vmatpush3.bf16.msra.mxu1 %v3663_v5  ;;  %v3990_v4 = vld [vmem:[%s4224_s1 + $0x98] ss:$12 sps:$4 sm:$0xff]  }
 0xc36   :  { %1856 = vmatprep.subr.bf16.mxu0 %v3978_v62  ;;  %2647 = vmatprep.subr.bf16.mxu1 %v2995_v2  ;;  %v1620_v17 = vunpack.c.l.bf16 %v3990_v4 }
 0xcd8   :  { %v1656_v27 = vpop.f32.mrf.mxu0  ;;  %v1697_v29 = vpop.f32.mrf.mxu1 }
 0xcd9   :  { %v1657_v30 = vadd.f32 %v1656_v27, %v3237_v32  ;;  %v1698_v21 = vadd.f32 %v1697_v29, %v3245_v54  ;;  %v4146_v27 = vld [vmem:[%s4225_s2 + $0x8] ss:$12 sps:$4 sm:$0xff]   ;;  %v2203_v29 = vld [vmem:[%s4224_s1 + $0x9c] sm:$0xff] }
 0xcda   :  { %v1658_v31 = vpop.f32.mrf.mxu0  ;;  %v2625_v33 = vpop.f32.mrf.mxu1 }
 0xcdb   :  { %v1703_v35 = vadd.f32 %v1657_v30, %v1618_v25  ;;  %v1659_v41 = vadd.f32 %v1658_v31, %v3241_v37  ;;  %v4140_v25 = vld [vmem:[%s4225_s2] ss:$12 sps:$4 sm:$0xff]   ;;  %v1735_v30 = vunpack.c.l.bf16 %v2203_v29 }
 0xcdc   :  { %v1660_v36 = vpop.f32.mrf.mxu0  ;;  %v1700_v38 = vpop.f32.mrf.mxu1 }
 0xcdd   :  { %v2200_v39 = vmul.f32 -1.442695, %v1703_v35  ;;  %v1710_v43 = vadd.f32 %v1659_v41, %v1619_v34 }
 0xcde   :  { %v1661_v42 = vpop.f32.mrf.mxu0  ;;  %v2626_v56 = vpop.f32.mrf.mxu1 }
 0xcdf   :  { %2848 = vpow2.f32 %v2200_v39  ;;  %v2201_v44 = vmul.f32 -1.442695, %v1710_v43  ;;  %v1736_v56 = vunpack.c.h.bf16 %v2203_v29 }
 0xce1   :  { %2850 = vpow2.f32 %v2201_v44 }
 0xcec   :  { %v2849_v40 = vpop.eup %2848 }
 0xced   :  { %v1707_v45 = vadd.f32 1.0, %v2849_v40 }
 0xcee   :  { %v2851_v46 = vpop.eup %2850 }
 0xcef   :  { %2852 = vrcp.f32 %v1707_v45  ;;  %v1714_v5 = vadd.f32 1.0, %v2851_v46 }
 0xcf1   :  { %2854 = vrcp.f32 %v1714_v5 }
 0xcfc   :  { %v2853_v22 = vpop.eup %2852 }
 0xcfd   :  { %v1717_v23 = vmul.f32 %v2853_v22, %v1698_v21  ;;  %v1737_v22 = vunpack.c.h.bf16 %v3990_v4 }
 0xcfe   :  { %v2855_v26 = vpop.eup %2854 }
 0xcff   :  { %v1718_v24 = vadd.f32 %v1717_v23, %v1620_v17  ;;  %v1720_v47 = vsub.f32 1.0, %v2855_v26  ;;  %v1722_v51 = vmul.f32 %v2855_v26, %v3938_v60 }
 0xd01   :  { %2856 = vtanh.f32 %v1718_v24 }
 0xd0e   :  { %v2857_v49 = vpop.eup %2856 }
 0xd0f   :  { %v1721_v50 = vmul.f32 %v2857_v49, %v1720_v47 }
 0xd11   :  { %v1723_v1 = vadd.f32 %v1722_v51, %v1721_v50 }
 0xd13   :  { %v3997_v53 = vsel %vm1725_vm14, %v1723_v1, %v3938_v60  ;;  %v1727_v55 = vsel %vm1725_vm14, %v1723_v1, 0.0  ;;  %v4114_v60 = vld [vmem:[%s4225_s2 + $0x1c] ss:$12 sps:$4 sm:$0xff]   ;;  %s2202_s2 = sld [smem:[#allocation4 + $0xd]] }
 0xd14   :  { %1729 = vst [vmem:[#allocation5 + $0x60] sm:$0xff] %v1727_v55  ;;  %v1738_v57 = vpack.c.bf16 %v3997_v53, %v3997_v53 }
 0xd16   :  { %1772 = vmatmul.mubr.bf16.vlgmr.msra.gmra.mxu0 %v1738_v57  ;;  %2644 = vmatmul.mubr.bf16.vlgmr.msra.gmra.mxu1 %v1738_v57 }
 0xd17   :  { %1857 = vmatpush1.bf16.msra.mxu0 %v4004_v0  ;;  %2648 = vmatpush3.bf16.msra.mxu1 %v4010_v59 }
 0xd18   :  { %1858 = vmatprep.subr.bf16.mxu0 %v4016_v6  ;;  %2649 = vmatprep.subr.bf16.mxu1 %v2995_v2 }
 0xd19   :  { %1888 = vmatprep.mubr.bf16.mxu0 %v2996_v3  ;;  %2663 = vmatprep.mubr.msk.bf16.mxu1 %vm2997_vm0, %v2995_v2  ;;  %v1841_v50 = vstv %s2202_s2 }
 0xd1a   :  { %vm1842_vm15 = vcmp.lt.s32.totalorder %v3228_v28, %v1841_v50 }
 0xd1b   :  { %1859 = vmatpush1.bf16.msra.mxu0 %v4026_v8  ;;  %2650 = vmatpush3.bf16.msra.mxu1 %v4032_v9 }
 0xd1c   :  { %1860 = vmatprep.subr.bf16.mxu0 %v4038_v58  ;;  %2651 = vmatprep.subr.bf16.mxu1 %v2995_v2 }
 0xd1f   :  { %1861 = vmatpush1.bf16.msra.mxu0 %v4045_v10  ;;  %2652 = vmatpush3.bf16.msra.mxu1 %v4051_v11 }
 0xd20   :  { %1862 = vmatprep.subr.bf16.mxu0 %v4057_v7  ;;  %2653 = vmatprep.subr.bf16.mxu1 %v2995_v2 }
 0xd23   :  { %1863 = vmatpush1.bf16.msra.mxu0 %v4064_v13  ;;  %2654 = vmatpush3.bf16.msra.mxu1 %v4070_v14 }
 0xd24   :  { %1864 = vmatprep.subr.bf16.mxu0 %v4076_v61  ;;  %2655 = vmatprep.subr.bf16.mxu1 %v2995_v2 }
 0xd27   :  { %1865 = vmatpush1.bf16.msra.mxu0 %v4083_v15  ;;  %2656 = vmatpush3.bf16.msra.mxu1 %v4089_v16 }
 0xd28   :  { %1866 = vmatprep.subr.bf16.mxu0 %v4095_v12  ;;  %2657 = vmatprep.subr.bf16.mxu1 %v2995_v2 }
 0xd2b   :  { %1867 = vmatpush1.bf16.msra.mxu0 %v4102_v18  ;;  %2658 = vmatpush3.bf16.msra.mxu1 %v4108_v19 }
 0xd2c   :  { %1868 = vmatprep.subr.bf16.mxu0 %v4114_v60  ;;  %2659 = vmatprep.subr.bf16.mxu1 %v2995_v2 }
 0xd2f   :  { %1869 = vmatpush1.bf16.msra.mxu0 %v4121_v52  ;;  %2660 = vmatpush3.bf16.msra.mxu1 %v4127_v20 }
 0xd30   :  { %1870 = vmatprep.subr.bf16.mxu0 %v4133_v63  ;;  %2661 = vmatprep.subr.bf16.mxu1 %v2995_v2 }
 0xd33   :  { %1871 = vmatpush1.bf16.msra.mxu0 %v4140_v25  ;;  %2662 = vmatpush3.bf16.msra.mxu1 %v4146_v27 }
 0xd34   :  { %1973 = vmatprep.subr.bf16.mxu0 %v3978_v62  ;;  %2667 = vmatprep.subr.bf16.mxu1 %v2995_v2 }
 0xdd6   :  { %v1773_v31 = vpop.f32.mrf.mxu0  ;;  %v1814_v33 = vpop.f32.mrf.mxu1 }
 0xdd7   :  { %v1774_v35 = vadd.f32 %v1773_v31, %v3237_v32  ;;  %v1815_v23 = vadd.f32 %v1814_v33, %v3245_v54 }
 0xdd8   :  { %v1775_v36 = vpop.f32.mrf.mxu0  ;;  %v2645_v38 = vpop.f32.mrf.mxu1 }
 0xdd9   :  { %v1820_v39 = vadd.f32 %v1774_v35, %v1735_v30  ;;  %v1776_v62 = vadd.f32 %v1775_v36, %v3241_v37  ;;  %v1958_v36 = vstv %s2207_s14 }
 0xdda   :  { %v1777_v34 = vpop.f32.mrf.mxu0  ;;  %v1817_v41 = vpop.f32.mrf.mxu1 }
 0xddb   :  { %v2205_v42 = vmul.f32 -1.442695, %v1820_v39  ;;  %v1827_v40 = vadd.f32 %v1776_v62, %v1736_v56 }
 0xddc   :  { %v1778_v43 = vpop.f32.mrf.mxu0  ;;  %v2646_v44 = vpop.f32.mrf.mxu1 }
 0xddd   :  { %2858 = vpow2.f32 %v2205_v42  ;;  %v2206_v45 = vmul.f32 -1.442695, %v1827_v40  ;;  %v2213_v43 = vld [vmem:[%s4224_s1 + $0xb4] sm:$0xff] }
 0xdde   :  { %v1969_v44 = vunpack.c.l.bf16 %v2213_v43 }
 0xddf   :  { %2860 = vpow2.f32 %v2206_v45 }
 0xdea   :  { %v2859_v46 = vpop.eup %2858 }
 0xdeb   :  { %v1824_v5 = vadd.f32 1.0, %v2859_v46 }
 0xdec   :  { %v2861_v17 = vpop.eup %2860 }
 0xded   :  { %2862 = vrcp.f32 %v1824_v5  ;;  %v1831_v21 = vadd.f32 1.0, %v2861_v17 }
 0xdef   :  { %2864 = vrcp.f32 %v1831_v21 }
 0xdfa   :  { %v2863_v24 = vpop.eup %2862 }
 0xdfb   :  { %v1834_v26 = vmul.f32 %v2863_v24, %v1815_v23 }
 0xdfc   :  { %v2865_v48 = vpop.eup %2864 }
 0xdfd   :  { %v1835_v47 = vadd.f32 %v1834_v26, %v1737_v22  ;;  %v1837_v49 = vsub.f32 1.0, %v2865_v48  ;;  %v1839_v55 = vmul.f32 %v2865_v48, %v3997_v53  ;;  %v1970_v26 = vunpack.c.h.bf16 %v2213_v43 }
 0xdff   :  { %2866 = vtanh.f32 %v1835_v47 }
 0xe0c   :  { %v2867_v51 = vpop.eup %2866 }
 0xe0d   :  { %v1838_v1 = vmul.f32 %v2867_v51, %v1837_v49 }
 0xe0f   :  { %v1840_v57 = vadd.f32 %v1839_v55, %v1838_v1 }
 0xe11   :  { %v4161_v4 = vsel %vm1842_vm15, %v1840_v57, %v3997_v53  ;;  %v1844_v29 = vsel %vm1842_vm15, %v1840_v57, 0.0 }
 0xe12   :  { %1846 = vst [vmem:[#allocation5 + $0x68] sm:$0xff] %v1844_v29  ;;  %v1855_v30 = vpack.c.bf16 %v4161_v4, %v4161_v4 }
 0xe14   :  { %1889 = vmatmul.mubr.bf16.vlgmr.msra.gmra.mxu0 %v1855_v30  ;;  %2664 = vmatmul.mubr.bf16.vlgmr.msra.gmra.mxu1 %v1855_v30 }
 0xe15   :  { %1974 = vmatpush1.bf16.msra.mxu0 %v4004_v0  ;;  %2668 = vmatpush3.bf16.msra.mxu1 %v4010_v59 }
 0xe16   :  { %1975 = vmatprep.subr.bf16.mxu0 %v4016_v6  ;;  %2669 = vmatprep.subr.bf16.mxu1 %v2995_v2 }
 0xe17   :  { %2005 = vmatprep.mubr.bf16.mxu0 %v2996_v3  ;;  %2683 = vmatprep.mubr.msk.bf16.mxu1 %vm2997_vm0, %v2995_v2  ;;  %v2208_v3 = vld [vmem:[%s4224_s1 + $0xa8] sm:$0xff]  ;;  %vm1959_vm0 = vcmp.lt.s32.totalorder %v3228_v28, %v1958_v36 }
 0xe18   :  { %v1852_v53 = vunpack.c.l.bf16 %v2208_v3 }
 0xe19   :  { %1976 = vmatpush1.bf16.msra.mxu0 %v4026_v8  ;;  %2670 = vmatpush3.bf16.msra.mxu1 %v4032_v9 }
 0xe1a   :  { %1977 = vmatprep.subr.bf16.mxu0 %v4038_v58  ;;  %2671 = vmatprep.subr.bf16.mxu1 %v2995_v2 }
 0xe1d   :  { %1978 = vmatpush1.bf16.msra.mxu0 %v4045_v10  ;;  %2672 = vmatpush3.bf16.msra.mxu1 %v4051_v11 }
 0xe1e   :  { %1979 = vmatprep.subr.bf16.mxu0 %v4057_v7  ;;  %2673 = vmatprep.subr.bf16.mxu1 %v2995_v2 }
 0xe21   :  { %1980 = vmatpush1.bf16.msra.mxu0 %v4064_v13  ;;  %2674 = vmatpush3.bf16.msra.mxu1 %v4070_v14 }
 0xe22   :  { %1981 = vmatprep.subr.bf16.mxu0 %v4076_v61  ;;  %2675 = vmatprep.subr.bf16.mxu1 %v2995_v2 }
 0xe25   :  { %1982 = vmatpush1.bf16.msra.mxu0 %v4083_v15  ;;  %2676 = vmatpush3.bf16.msra.mxu1 %v4089_v16 }
 0xe26   :  { %1983 = vmatprep.subr.bf16.mxu0 %v4095_v12  ;;  %2677 = vmatprep.subr.bf16.mxu1 %v2995_v2 }
 0xe29   :  { %1984 = vmatpush1.bf16.msra.mxu0 %v4102_v18  ;;  %2678 = vmatpush3.bf16.msra.mxu1 %v4108_v19 }
 0xe2a   :  { %1985 = vmatprep.subr.bf16.mxu0 %v4114_v60  ;;  %2679 = vmatprep.subr.bf16.mxu1 %v2995_v2  ;;  %v2209_v60 = vld [vmem:[%s4224_s1 + $0xb0] ss:$12 sps:$4 sm:$0xff]   ;;  %s2212_s1 = sld [smem:[#allocation4 + $0xf]] }
 0xe2d   :  { %1986 = vmatpush1.bf16.msra.mxu0 %v4121_v52  ;;  %2680 = vmatpush3.bf16.msra.mxu1 %v4127_v20  ;;  %v1854_v20 = vunpack.c.l.bf16 %v2209_v60 }
 0xe2e   :  { %1987 = vmatprep.subr.bf16.mxu0 %v4133_v63  ;;  %2681 = vmatprep.subr.bf16.mxu1 %v2995_v2  ;;  %v1853_v2 = vunpack.c.h.bf16 %v2208_v3 }
 0xe31   :  { %1988 = vmatpush1.bf16.msra.mxu0 %v4140_v25  ;;  %2682 = vmatpush3.bf16.msra.mxu1 %v4146_v27 }
 0xed4   :  { %v1890_v0 = vpop.f32.mrf.mxu0  ;;  %v1931_v59 = vpop.f32.mrf.mxu1 }
 0xed5   :  { %v1891_v6 = vadd.f32 %v1890_v0, %v3237_v32  ;;  %v1932_v63 = vadd.f32 %v1931_v59, %v3245_v54  ;;  %v2075_v59 = vstv %s2212_s1 }
 0xed6   :  { %v1892_v8 = vpop.f32.mrf.mxu0  ;;  %v2665_v9 = vpop.f32.mrf.mxu1  ;;  %vm2076_vm1 = vcmp.lt.s32.totalorder %v3228_v28, %v2075_v59 }
 0xed7   :  { %v1937_v58 = vadd.f32 %v1891_v6, %v1852_v53  ;;  %v1893_v13 = vadd.f32 %v1892_v8, %v3241_v37 }
 0xed8   :  { %v1894_v10 = vpop.f32.mrf.mxu0  ;;  %v1934_v11 = vpop.f32.mrf.mxu1 }
 0xed9   :  { %v2210_v7 = vmul.f32 -1.442695, %v1937_v58  ;;  %v1944_v15 = vadd.f32 %v1893_v13, %v1853_v2 }
 0xeda   :  { %v1895_v14 = vpop.f32.mrf.mxu0  ;;  %v2666_v61 = vpop.f32.mrf.mxu1 }
 0xedb   :  { %2868 = vpow2.f32 %v2210_v7  ;;  %v2211_v16 = vmul.f32 -1.442695, %v1944_v15 }
 0xedd   :  { %2870 = vpow2.f32 %v2211_v16 }
 0xee8   :  { %v2869_v12 = vpop.eup %2868 }
 0xee9   :  { %v1941_v18 = vadd.f32 1.0, %v2869_v12 }
 0xeea   :  { %v2871_v19 = vpop.eup %2870 }
 0xeeb   :  { %2872 = vrcp.f32 %v1941_v18  ;;  %v1948_v52 = vadd.f32 1.0, %v2871_v19 }
 0xeed   :  { %2874 = vrcp.f32 %v1948_v52 }
 0xef8   :  { %v2873_v25 = vpop.eup %2872 }
 0xef9   :  { %v1951_v27 = vmul.f32 %v2873_v25, %v1932_v63 }
 0xefa   :  { %v2875_v33 = vpop.eup %2874 }
 0xefb   :  { %v1952_v31 = vadd.f32 %v1951_v27, %v1854_v20  ;;  %v1954_v35 = vsub.f32 1.0, %v2875_v33  ;;  %v1956_v34 = vmul.f32 %v2875_v33, %v4161_v4 }
 0xefd   :  { %2876 = vtanh.f32 %v1952_v31 }
 0xf0a   :  { %v2877_v38 = vpop.eup %2876 }
 0xf0b   :  { %v1955_v39 = vmul.f32 %v2877_v38, %v1954_v35 }
 0xf0d   :  { %v1957_v41 = vadd.f32 %v1956_v34, %v1955_v39 }
 0xf0f   :  { %v1960_v42 = vsel %vm1959_vm0, %v1957_v41, %v4161_v4  ;;  %v1961_v56 = vsel %vm1959_vm0, %v1957_v41, 0.0  ;;  %v1971_v4 = vunpack.c.h.bf16 %v2209_v60 }
 0xf10   :  { %1963 = vst [vmem:[#allocation5 + $0x70] sm:$0xff] %v1961_v56  ;;  %v1972_v62 = vpack.c.bf16 %v1960_v42, %v1960_v42 }
 0xf12   :  { %2006 = vmatmul.mubr.bf16.vlgmr.msra.gmra.mxu0 %v1972_v62  ;;  %2684 = vmatmul.mubr.bf16.vlgmr.msra.gmra.mxu1 %v1972_v62 }
 0xfd2   :  { %v2007_v40 = vpop.f32.mrf.mxu0  ;;  %v2048_v45 = vpop.f32.mrf.mxu1 }
 0xfd3   :  { %v2008_v46 = vadd.f32 %v2007_v40, %v3237_v32  ;;  %v2049_v29 = vadd.f32 %v2048_v45, %v3245_v54 }
 0xfd4   :  { %v2009_v5 = vpop.f32.mrf.mxu0  ;;  %v2685_v17 = vpop.f32.mrf.mxu1 }
 0xfd5   :  { %v2054_v21 = vadd.f32 %v2008_v46, %v1969_v44  ;;  %v2010_v47 = vadd.f32 %v2009_v5, %v3241_v37 }
 0xfd6   :  { %v2011_v22 = vpop.f32.mrf.mxu0  ;;  %v2051_v23 = vpop.f32.mrf.mxu1 }
 0xfd7   :  { %v2215_v24 = vmul.f32 -1.442695, %v2054_v21  ;;  %v2061_v50 = vadd.f32 %v2010_v47, %v1970_v26 }
 0xfd8   :  { %v2012_v48 = vpop.f32.mrf.mxu0  ;;  %v2686_v49 = vpop.f32.mrf.mxu1 }
 0xfd9   :  { %2878 = vpow2.f32 %v2215_v24  ;;  %v2216_v51 = vmul.f32 -1.442695, %v2061_v50 }
 0xfdb   :  { %2880 = vpow2.f32 %v2216_v51 }
 0xfe6   :  { %v2879_v1 = vpop.eup %2878 }
 0xfe7   :  { %v2058_v55 = vadd.f32 1.0, %v2879_v1 }
 0xfe8   :  { %v2881_v57 = vpop.eup %2880 }
 0xfe9   :  { %2882 = vrcp.f32 %v2058_v55  ;;  %v2065_v32 = vadd.f32 1.0, %v2881_v57 }
 0xfeb   :  { %2884 = vrcp.f32 %v2065_v32 }
 0xff6   :  { %v2883_v30 = vpop.eup %2882 }
 0xff7   :  { %v2068_v3 = vmul.f32 %v2883_v30, %v2049_v29 }
 0xff8   :  { %v2885_v37 = vpop.eup %2884 }
 0xff9   :  { %v2069_v53 = vadd.f32 %v2068_v3, %v1971_v4  ;;  %v2071_v0 = vsub.f32 1.0, %v2885_v37  ;;  %v2073_v9 = vmul.f32 %v2885_v37, %v1960_v42 }
 0xffb   :  { %2886 = vtanh.f32 %v2069_v53 }
0x1008   :  { %v2887_v6 = vpop.eup %2886 }
0x1009   :  { %v2072_v8 = vmul.f32 %v2887_v6, %v2071_v0 }
0x100b   :  { %v2074_v58 = vadd.f32 %v2073_v9, %v2072_v8 }
0x100d   :  { %v2078_v54 = vsel %vm2076_vm1, %v2074_v58, 0.0  ;;  %v2077_v10 = vsel %vm2076_vm1, %v2074_v58, %v1960_v42 }
0x100e   :  { %2080 = vst [vmem:[#allocation5 + $0x78] sm:$0xff] %v2078_v54  ;;  %2085 = vst [vmem:[#allocation7] sm:$0xff] %v2077_v10 }
0x100f   :  { %2959 = shalt.err (!%p2956_p9)
}
0x1010   :  { %s3001_s22 = smov 128   ;;  %s3002_s3 = smov 8  }
0x1011   :  { %2097 = dma.vmem_to_hbm [thread:$0]  %s2092_s18, 2048, %s4227_s4, [#allocation6], %s3001_s22, %s3001_s22, %s3002_s3  }
0x1012   :  { %s2968_s0 = scalar_lea.vmem %s2105_s20, 128  ;;  %p2973_p11 = scmp.lt.s32.totalorder %s2105_s20, %s2105_s20 }
0x1013   :  { %p2969_p10 = scmp.ne.s32.totalorder %s2105_s20, %s2968_s0  ;;  %p2974_p12 = scmp.lt.s32.totalorder %s2968_s0, %s2968_s0 }
0x1015   :  { %p2975_p13 = por %p2974_p12, %p2973_p11 }
0x1017   :  { %p2976_p0 = pnand %p2975_p13, %p2969_p10 }
0x1019   :  { %2979 = shalt.err (!%p2976_p0)
}
0x101a   :  { %2107 = dma.vmem_to_hbm [thread:$0]  %s2105_s20, 128, %s4228_s5, [#allocation8]  }
0x101b   :  { %2990 = dma.done.wait [#allocation6], 2048  }
0x101c   :  { %2991 = vsyncadd [#allocation6], 4294965248 }
0x101d   :  { %2992 = dma.done.wait [#allocation8], 128  }
0x101e   :  { %2993 = vsyncadd [#allocation8], 4294967168 }
0x101f   :  { %2114 = vsyncpa [#allocation6], 1 }
0x1020   :  { %2115 = vsyncpa [#allocation8], 1 }

</bundles_post_ra>
